<compile_context>
chip_gen: v7x
topology: tpu7x:2x2x1
jax: 0.10.0
libtpu: 0.0.40
codegen_flags: <defaults>
</compile_context>

<pallas_src>
import functools
import math

import jax
import jax.numpy as jnp
from jax.experimental import pallas as pl
from jax.experimental.pallas import tpu as pltpu

D_MODEL = 32
N_HEADS = 4
D_HEAD = D_MODEL // N_HEADS
D_FF = 64
N_LAYERS = 2
EPS = 1e-6


# ----------------------------- Fused Pallas kernel -----------------------------

def _decoder_kernel(x_ref, mem_ref,
                    ln_g_ref, ln_b_ref,
                    wqkv_self_ref, bqkv_self_ref, wo_self_ref, bo_self_ref,
                    wqkv_src_ref, bqkv_src_ref, wo_src_ref, bo_src_ref,
                    w1_ref, b1_ref, w2_ref, b2_ref,
                    norm_g_ref, norm_b_ref,
                    o_ref,
                    *, n_layers, n_heads, d_head, eps):
    d_model = n_heads * d_head
    scale = 1.0 / math.sqrt(d_head)

    def layer_norm(x, g, b):
        # Matches the PyTorch module exactly: unbiased std (n-1), eps added
        # to the std (not the variance).
        mean = jnp.mean(x, axis=-1, keepdims=True)
        diff = x - mean
        var = jnp.sum(diff * diff, axis=-1, keepdims=True) / (d_model - 1)
        inv = pl.reciprocal(jnp.sqrt(var) + eps, approx=True)
        return g * diff * inv + b

    def attention(q, k, v):
        # Heads picked with static lane slices; everything stays in vregs.
        head_outs = []
        for h in range(n_heads):
            sl = slice(h * d_head, (h + 1) * d_head)
            qh, kh, vh = q[:, sl], k[:, sl], v[:, sl]
            s = jnp.dot(qh, kh.T, preferred_element_type=jnp.float32) * scale
            s = s - jnp.max(s, axis=-1, keepdims=True)
            p = jnp.exp(s)
            p = p * pl.reciprocal(jnp.sum(p, axis=-1, keepdims=True), approx=True)
            head_outs.append(jnp.dot(p, vh, preferred_element_type=jnp.float32))
        return jnp.concatenate(head_outs, axis=-1)

    x = x_ref[0].astype(jnp.float32)         # (T, D)
    memory = mem_ref[0].astype(jnp.float32)  # (S, D)

    # TODO(synk): `layer` is an injected nn.Module in the reference; we use the
    # standard Annotated-Transformer DecoderLayer. Dropout=identity, masks unused.
    for l in range(n_layers):
        # ---- self-attention sublayer (pre-norm residual) ----
        y = layer_norm(x, ln_g_ref[l, 0], ln_b_ref[l, 0])
        qkv = (jnp.dot(y, wqkv_self_ref[l], preferred_element_type=jnp.float32)
               + bqkv_self_ref[l])
        o = attention(qkv[:, :d_model],
                      qkv[:, d_model:2 * d_model],
                      qkv[:, 2 * d_model:])
        x = x + jnp.dot(o, wo_self_ref[l],
                        preferred_element_type=jnp.float32) + bo_self_ref[l]

        # ---- source (cross) attention sublayer ----
        y = layer_norm(x, ln_g_ref[l, 1], ln_b_ref[l, 1])
        wqkv = wqkv_src_ref[l]
        bqkv = bqkv_src_ref[l]
        q = (jnp.dot(y, wqkv[:, :d_model], preferred_element_type=jnp.float32)
             + bqkv[:, :d_model])
        kv = (jnp.dot(memory, wqkv[:, d_model:], preferred_element_type=jnp.float32)
              + bqkv[:, d_model:])
        o = attention(q, kv[:, :d_model], kv[:, d_model:])
        x = x + jnp.dot(o, wo_src_ref[l],
                        preferred_element_type=jnp.float32) + bo_src_ref[l]

        # ---- position-wise feed-forward sublayer ----
        y = layer_norm(x, ln_g_ref[l, 2], ln_b_ref[l, 2])
        h = jnp.maximum(
            jnp.dot(y, w1_ref[l], preferred_element_type=jnp.float32) + b1_ref[l], 0.0)
        x = x + jnp.dot(h, w2_ref[l],
                        preferred_element_type=jnp.float32) + b2_ref[l]

    o_ref[0] = layer_norm(x, norm_g_ref[...], norm_b_ref[...]).astype(o_ref.dtype)


# ----------------------------- Parameter packing -----------------------------

def _pack_params(params):
    layers = params["layers"]

    def stack(fn):
        return jnp.stack([fn(p) for p in layers])

    ln_g = stack(lambda p: jnp.stack([p["ln0_g"], p["ln1_g"], p["ln2_g"]]))[:, :, None, :]
    ln_b = stack(lambda p: jnp.stack([p["ln0_b"], p["ln1_b"], p["ln2_b"]]))[:, :, None, :]

    def qkv_w(ap):
        return jnp.concatenate([ap["wq"], ap["wk"], ap["wv"]], axis=1)

    def qkv_b(ap):
        return jnp.concatenate([ap["bq"], ap["bk"], ap["bv"]], axis=0)

    wqkv_self = stack(lambda p: qkv_w(p["self_attn"]))
    bqkv_self = stack(lambda p: qkv_b(p["self_attn"]))[:, None, :]
    wo_self = stack(lambda p: p["self_attn"]["wo"])
    bo_self = stack(lambda p: p["self_attn"]["bo"])[:, None, :]

    wqkv_src = stack(lambda p: qkv_w(p["src_attn"]))
    bqkv_src = stack(lambda p: qkv_b(p["src_attn"]))[:, None, :]
    wo_src = stack(lambda p: p["src_attn"]["wo"])
    bo_src = stack(lambda p: p["src_attn"]["bo"])[:, None, :]

    w1 = stack(lambda p: p["ffn"]["w1"])
    b1 = stack(lambda p: p["ffn"]["b1"])[:, None, :]
    w2 = stack(lambda p: p["ffn"]["w2"])
    b2 = stack(lambda p: p["ffn"]["b2"])[:, None, :]

    norm_g = params["norm_g"].reshape(1, -1)
    norm_b = params["norm_b"].reshape(1, -1)

    return (ln_g, ln_b,
            wqkv_self, bqkv_self, wo_self, bo_self,
            wqkv_src, bqkv_src, wo_src, bo_src,
            w1, b1, w2, b2,
            norm_g, norm_b)


# ----------------------------- Forward (single pallas_call) -----------------------------

def decoder_forward(params, x, memory, src_mask=None, tgt_mask=None):
    del src_mask, tgt_mask  # "we do not have mask in the real implementation"
    B, T, D = x.shape
    S = memory.shape[1]
    packed = _pack_params(params)

    kernel = functools.partial(
        _decoder_kernel,
        n_layers=N_LAYERS, n_heads=N_HEADS, d_head=D_HEAD, eps=EPS)

    def full_spec(shape):
        zeros = (0,) * len(shape)
        return pl.BlockSpec(shape, lambda b, _z=zeros: _z)

    weight_specs = [full_spec(a.shape) for a in packed]

    return pl.pallas_call(
        kernel,
        out_shape=jax.ShapeDtypeStruct((B, T, D), x.dtype),
        grid=(B,),
        in_specs=[pl.BlockSpec((1, T, D), lambda b: (b, 0, 0)),
                  pl.BlockSpec((1, S, D), lambda b: (b, 0, 0))] + weight_specs,
        out_specs=pl.BlockSpec((1, T, D), lambda b: (b, 0, 0)),
        compiler_params=pltpu.CompilerParams(
            dimension_semantics=("parallel",)),
    )(x, memory, *packed)


# ----------------------------- Pure-JAX reference -----------------------------

def _ref_ln(x, g, b, eps=EPS):
    mean = jnp.mean(x, axis=-1, keepdims=True)
    diff = x - mean
    var = jnp.sum(diff * diff, axis=-1, keepdims=True) / (x.shape[-1] - 1)
    return g * diff / (jnp.sqrt(var) + eps) + b


def _ref_mha(p, q_in, k_in, v_in):
    B, T, D = q_in.shape
    S = k_in.shape[1]
    q = (q_in @ p["wq"] + p["bq"]).reshape(B, T, N_HEADS, D_HEAD).transpose(0, 2, 1, 3)
    k = (k_in @ p["wk"] + p["bk"]).reshape(B, S, N_HEADS, D_HEAD).transpose(0, 2, 1, 3)
    v = (v_in @ p["wv"] + p["bv"]).reshape(B, S, N_HEADS, D_HEAD).transpose(0, 2, 1, 3)
    s = jnp.einsum("bhtd,bhsd->bhts", q, k) / math.sqrt(D_HEAD)
    p_attn = jax.nn.softmax(s, axis=-1)
    o = jnp.einsum("bhts,bhsd->bhtd", p_attn, v)
    o = o.transpose(0, 2, 1, 3).reshape(B, T, D)
    return o @ p["wo"] + p["bo"]


def _ref_decoder(params, x, memory):
    for p in params["layers"]:
        y = _ref_ln(x, p["ln0_g"], p["ln0_b"])
        x = x + _ref_mha(p["self_attn"], y, y, y)
        y = _ref_ln(x, p["ln1_g"], p["ln1_b"])
        x = x + _ref_mha(p["src_attn"], y, memory, memory)
        y = _ref_ln(x, p["ln2_g"], p["ln2_b"])
        h = jnp.maximum(y @ p["ffn"]["w1"] + p["ffn"]["b1"], 0.0)
        x = x + (h @ p["ffn"]["w2"] + p["ffn"]["b2"])
    return _ref_ln(x, params["norm_g"], params["norm_b"])


# ----------------------------- Parameter init -----------------------------

def init_params(key):
    def lin(k, din, dout):
        return (jax.random.normal(k, (din, dout), jnp.float32) * 0.02,
                jnp.zeros((dout,), jnp.float32))

    def attn_params(k):
        ks = jax.random.split(k, 4)
        p = {}
        p["wq"], p["bq"] = lin(ks[0], D_MODEL, D_MODEL)
        p["wk"], p["bk"] = lin(ks[1], D_MODEL, D_MODEL)
        p["wv"], p["bv"] = lin(ks[2], D_MODEL, D_MODEL)
        p["wo"], p["bo"] = lin(ks[3], D_MODEL, D_MODEL)
        return p

    layers = []
    for i in range(N_LAYERS):
        ks = jax.random.split(jax.random.fold_in(key, i), 4)
        w1, b1 = lin(ks[2], D_MODEL, D_FF)
        w2, b2 = lin(ks[3], D_FF, D_MODEL)
        layers.append({
            "self_attn": attn_params(ks[0]),
            "src_attn": attn_params(ks[1]),
            "ffn": {"w1": w1, "b1": b1, "w2": w2, "b2": b2},
            "ln0_g": jnp.ones((D_MODEL,), jnp.float32), "ln0_b": jnp.zeros((D_MODEL,), jnp.float32),
            "ln1_g": jnp.ones((D_MODEL,), jnp.float32), "ln1_b": jnp.zeros((D_MODEL,), jnp.float32),
            "ln2_g": jnp.ones((D_MODEL,), jnp.float32), "ln2_b": jnp.zeros((D_MODEL,), jnp.float32),
        })
    return {
        "layers": layers,
        "norm_g": jnp.ones((D_MODEL,), jnp.float32),
        "norm_b": jnp.zeros((D_MODEL,), jnp.float32),
    }


# ----------------------------- Main -----------------------------

if __name__ == "__main__":
    B, T, S = 2, 8, 8
    key = jax.random.PRNGKey(0)
    k_x, k_m, k_p = jax.random.split(key, 3)
    x = jax.random.normal(k_x, (B, T, D_MODEL), jnp.float32)
    memory = jax.random.normal(k_m, (B, S, D_MODEL), jnp.float32)
    params = init_params(k_p)

    fwd = jax.jit(decoder_forward)
    out = fwd(params, x, memory)
    out = jax.block_until_ready(out)

    ref = _ref_decoder(params, x, memory)
    assert out.shape == (B, T, D_MODEL)
    assert jnp.allclose(out, ref, atol=5e-3, rtol=5e-3), float(jnp.max(jnp.abs(out - ref)))

    print("KERNEL_OK")
</pallas_src>

<mosaic_0001>
module attributes {stable_mosaic.version = 11 : i64} {
  func.func @_decoder_kernel(%arg0: i32, %arg1: memref<1x8x32xf32, #tpu.memory_space<vmem>>, %arg2: memref<1x8x32xf32, #tpu.memory_space<vmem>>, %arg3: memref<2x3x1x32xf32, #tpu.memory_space<vmem>>, %arg4: memref<2x3x1x32xf32, #tpu.memory_space<vmem>>, %arg5: memref<2x32x96xf32, #tpu.memory_space<vmem>>, %arg6: memref<2x1x96xf32, #tpu.memory_space<vmem>>, %arg7: memref<2x32x32xf32, #tpu.memory_space<vmem>>, %arg8: memref<2x1x32xf32, #tpu.memory_space<vmem>>, %arg9: memref<2x32x96xf32, #tpu.memory_space<vmem>>, %arg10: memref<2x1x96xf32, #tpu.memory_space<vmem>>, %arg11: memref<2x32x32xf32, #tpu.memory_space<vmem>>, %arg12: memref<2x1x32xf32, #tpu.memory_space<vmem>>, %arg13: memref<2x32x64xf32, #tpu.memory_space<vmem>>, %arg14: memref<2x1x64xf32, #tpu.memory_space<vmem>>, %arg15: memref<2x64x32xf32, #tpu.memory_space<vmem>>, %arg16: memref<2x1x32xf32, #tpu.memory_space<vmem>>, %arg17: memref<1x32xf32, #tpu.memory_space<vmem>>, %arg18: memref<1x32xf32, #tpu.memory_space<vmem>>, %arg19: memref<1x8x32xf32, #tpu.memory_space<vmem>>) attributes {dimension_semantics = [#tpu.dimension_semantics<parallel>], iteration_bounds = array<i64: 2>, scalar_prefetch = 0 : i64, scratch_operands = 0 : i64, tpu.core_type = #tpu.core_type<tc>, window_params = [{transform_indices = @transform_0, window_bounds = array<i64: 1, 8, 32>}, {transform_indices = @transform_1, window_bounds = array<i64: 1, 8, 32>}, {pipeline_mode = #tpu.pipeline_mode<synchronous>, transform_indices = @transform_2, window_bounds = array<i64: 2, 3, 1, 32>}, {pipeline_mode = #tpu.pipeline_mode<synchronous>, transform_indices = @transform_3, window_bounds = array<i64: 2, 3, 1, 32>}, {pipeline_mode = #tpu.pipeline_mode<synchronous>, transform_indices = @transform_4, window_bounds = array<i64: 2, 32, 96>}, {pipeline_mode = #tpu.pipeline_mode<synchronous>, transform_indices = @transform_5, window_bounds = array<i64: 2, 1, 96>}, {pipeline_mode = #tpu.pipeline_mode<synchronous>, transform_indices = @transform_6, window_bounds = array<i64: 2, 32, 32>}, {pipeline_mode = #tpu.pipeline_mode<synchronous>, transform_indices = @transform_7, window_bounds = array<i64: 2, 1, 32>}, {pipeline_mode = #tpu.pipeline_mode<synchronous>, transform_indices = @transform_8, window_bounds = array<i64: 2, 32, 96>}, {pipeline_mode = #tpu.pipeline_mode<synchronous>, transform_indices = @transform_9, window_bounds = array<i64: 2, 1, 96>}, {pipeline_mode = #tpu.pipeline_mode<synchronous>, transform_indices = @transform_10, window_bounds = array<i64: 2, 32, 32>}, {pipeline_mode = #tpu.pipeline_mode<synchronous>, transform_indices = @transform_11, window_bounds = array<i64: 2, 1, 32>}, {pipeline_mode = #tpu.pipeline_mode<synchronous>, transform_indices = @transform_12, window_bounds = array<i64: 2, 32, 64>}, {pipeline_mode = #tpu.pipeline_mode<synchronous>, transform_indices = @transform_13, window_bounds = array<i64: 2, 1, 64>}, {pipeline_mode = #tpu.pipeline_mode<synchronous>, transform_indices = @transform_14, window_bounds = array<i64: 2, 64, 32>}, {pipeline_mode = #tpu.pipeline_mode<synchronous>, transform_indices = @transform_15, window_bounds = array<i64: 2, 1, 32>}, {pipeline_mode = #tpu.pipeline_mode<synchronous>, transform_indices = @transform_16, window_bounds = array<i64: 1, 32>}, {pipeline_mode = #tpu.pipeline_mode<synchronous>, transform_indices = @transform_17, window_bounds = array<i64: 1, 32>}, {transform_indices = @transform_18, window_bounds = array<i64: 1, 8, 32>}]} {
    %c0 = arith.constant 0 : index
    %c0_0 = arith.constant 0 : index
    %c0_1 = arith.constant 0 : index
    %0 = vector.load %arg1[%c0, %c0_0, %c0_1] : memref<1x8x32xf32, #tpu.memory_space<vmem>>, vector<1x8x32xf32>
    %1 = vector.shape_cast %0 : vector<1x8x32xf32> to vector<8x32xf32>
    %c0_2 = arith.constant 0 : index
    %c0_3 = arith.constant 0 : index
    %c0_4 = arith.constant 0 : index
    %2 = vector.load %arg2[%c0_2, %c0_3, %c0_4] : memref<1x8x32xf32, #tpu.memory_space<vmem>>, vector<1x8x32xf32>
    %3 = vector.shape_cast %2 : vector<1x8x32xf32> to vector<8x32xf32>
    %c0_5 = arith.constant 0 : index
    %c0_6 = arith.constant 0 : index
    %c0_7 = arith.constant 0 : index
    %c0_8 = arith.constant 0 : index
    %4 = vector.load %arg3[%c0_5, %c0_6, %c0_7, %c0_8] : memref<2x3x1x32xf32, #tpu.memory_space<vmem>>, vector<1x1x1x32xf32>
    %5 = vector.shape_cast %4 : vector<1x1x1x32xf32> to vector<1x32xf32>
    %c0_9 = arith.constant 0 : index
    %c0_10 = arith.constant 0 : index
    %c0_11 = arith.constant 0 : index
    %c0_12 = arith.constant 0 : index
    %6 = vector.load %arg4[%c0_9, %c0_10, %c0_11, %c0_12] : memref<2x3x1x32xf32, #tpu.memory_space<vmem>>, vector<1x1x1x32xf32>
    %7 = vector.shape_cast %6 : vector<1x1x1x32xf32> to vector<1x32xf32>
    %cst = arith.constant dense<0.000000e+00> : vector<8xf32>
    %8 = vector.multi_reduction <add>, %1, %cst [1] : vector<8x32xf32> to vector<8xf32>
    %9 = vector.shape_cast %8 : vector<8xf32> to vector<8x1xf32>
    %cst_13 = arith.constant 3.200000e+01 : f32
    %10 = vector.broadcast %cst_13 : f32 to vector<8x1xf32>
    %11 = arith.divf %9, %10 : vector<8x1xf32>
    %12 = vector.broadcast %11 : vector<8x1xf32> to vector<8x32xf32>
    %13 = arith.subf %1, %12 : vector<8x32xf32>
    %14 = arith.mulf %13, %13 : vector<8x32xf32>
    %cst_14 = arith.constant dense<0.000000e+00> : vector<8xf32>
    %15 = vector.multi_reduction <add>, %14, %cst_14 [1] : vector<8x32xf32> to vector<8xf32>
    %16 = vector.shape_cast %15 : vector<8xf32> to vector<8x1xf32>
    %cst_15 = arith.constant 3.100000e+01 : f32
    %17 = vector.broadcast %cst_15 : f32 to vector<8x1xf32>
    %18 = arith.divf %16, %17 : vector<8x1xf32>
    %19 = math.sqrt %18 : vector<8x1xf32>
    %cst_16 = arith.constant 9.99999997E-7 : f32
    %20 = vector.broadcast %cst_16 : f32 to vector<8x1xf32>
    %21 = arith.addf %19, %20 : vector<8x1xf32>
    %22 = tpu.reciprocal %21 {approx = true} : vector<8x1xf32> -> vector<8x1xf32>
    %23 = vector.broadcast %5 : vector<1x32xf32> to vector<8x32xf32>
    %24 = arith.mulf %23, %13 : vector<8x32xf32>
    %25 = vector.broadcast %22 : vector<8x1xf32> to vector<8x32xf32>
    %26 = arith.mulf %24, %25 : vector<8x32xf32>
    %27 = vector.broadcast %7 : vector<1x32xf32> to vector<8x32xf32>
    %28 = arith.addf %26, %27 : vector<8x32xf32>
    %c0_17 = arith.constant 0 : index
    %c0_18 = arith.constant 0 : index
    %c0_19 = arith.constant 0 : index
    %29 = vector.load %arg5[%c0_17, %c0_18, %c0_19] : memref<2x32x96xf32, #tpu.memory_space<vmem>>, vector<1x32x96xf32>
    %30 = vector.shape_cast %29 : vector<1x32x96xf32> to vector<32x96xf32>
    %cst_20 = arith.constant dense<0.000000e+00> : vector<8x96xf32>
    %31 = tpu.matmul %28, %30, %cst_20 {dimension_numbers = #tpu.dot_dimension_numbers<[1], [0], [0], [1], [0, 0, 1, 1], [], []>} : vector<8x32xf32>, vector<32x96xf32>, vector<8x96xf32> -> vector<8x96xf32>
    %c0_21 = arith.constant 0 : index
    %c0_22 = arith.constant 0 : index
    %c0_23 = arith.constant 0 : index
    %32 = vector.load %arg6[%c0_21, %c0_22, %c0_23] : memref<2x1x96xf32, #tpu.memory_space<vmem>>, vector<1x1x96xf32>
    %33 = vector.shape_cast %32 : vector<1x1x96xf32> to vector<1x96xf32>
    %34 = vector.broadcast %33 : vector<1x96xf32> to vector<8x96xf32>
    %35 = arith.addf %31, %34 : vector<8x96xf32>
    %36 = vector.extract_strided_slice %35 {offsets = [0, 0], sizes = [8, 32], strides = [1, 1]} : vector<8x96xf32> to vector<8x32xf32>
    %37 = vector.extract_strided_slice %35 {offsets = [0, 32], sizes = [8, 32], strides = [1, 1]} : vector<8x96xf32> to vector<8x32xf32>
    %38 = vector.extract_strided_slice %35 {offsets = [0, 64], sizes = [8, 32], strides = [1, 1]} : vector<8x96xf32> to vector<8x32xf32>
    %39 = vector.extract_strided_slice %36 {offsets = [0, 0], sizes = [8, 8], strides = [1, 1]} : vector<8x32xf32> to vector<8x8xf32>
    %40 = vector.extract_strided_slice %37 {offsets = [0, 0], sizes = [8, 8], strides = [1, 1]} : vector<8x32xf32> to vector<8x8xf32>
    %41 = vector.extract_strided_slice %38 {offsets = [0, 0], sizes = [8, 8], strides = [1, 1]} : vector<8x32xf32> to vector<8x8xf32>
    %42 = tpu.transpose %40, [1, 0] : vector<8x8xf32> -> vector<8x8xf32>
    %cst_24 = arith.constant dense<0.000000e+00> : vector<8x8xf32>
    %43 = tpu.matmul %39, %42, %cst_24 {dimension_numbers = #tpu.dot_dimension_numbers<[1], [0], [0], [1], [0, 0, 1, 1], [], []>} : vector<8x8xf32>, vector<8x8xf32>, vector<8x8xf32> -> vector<8x8xf32>
    %cst_25 = arith.constant 0.353553385 : f32
    %44 = vector.broadcast %cst_25 : f32 to vector<8x8xf32>
    %45 = arith.mulf %43, %44 : vector<8x8xf32>
    %cst_26 = arith.constant dense<0xFF800000> : vector<8xf32>
    %46 = vector.multi_reduction <maximumf>, %45, %cst_26 [1] : vector<8x8xf32> to vector<8xf32>
    %47 = vector.shape_cast %46 : vector<8xf32> to vector<8x1xf32>
    %48 = vector.broadcast %47 : vector<8x1xf32> to vector<8x8xf32>
    %49 = arith.subf %45, %48 : vector<8x8xf32>
    %50 = math.exp %49 : vector<8x8xf32>
    %cst_27 = arith.constant dense<0.000000e+00> : vector<8xf32>
    %51 = vector.multi_reduction <add>, %50, %cst_27 [1] : vector<8x8xf32> to vector<8xf32>
    %52 = vector.shape_cast %51 : vector<8xf32> to vector<8x1xf32>
    %53 = tpu.reciprocal %52 {approx = true} : vector<8x1xf32> -> vector<8x1xf32>
    %54 = vector.broadcast %53 : vector<8x1xf32> to vector<8x8xf32>
    %55 = arith.mulf %50, %54 : vector<8x8xf32>
    %cst_28 = arith.constant dense<0.000000e+00> : vector<8x8xf32>
    %56 = tpu.matmul %55, %41, %cst_28 {dimension_numbers = #tpu.dot_dimension_numbers<[1], [0], [0], [1], [0, 0, 1, 1], [], []>} : vector<8x8xf32>, vector<8x8xf32>, vector<8x8xf32> -> vector<8x8xf32>
    %57 = vector.extract_strided_slice %36 {offsets = [0, 8], sizes = [8, 8], strides = [1, 1]} : vector<8x32xf32> to vector<8x8xf32>
    %58 = vector.extract_strided_slice %37 {offsets = [0, 8], sizes = [8, 8], strides = [1, 1]} : vector<8x32xf32> to vector<8x8xf32>
    %59 = vector.extract_strided_slice %38 {offsets = [0, 8], sizes = [8, 8], strides = [1, 1]} : vector<8x32xf32> to vector<8x8xf32>
    %60 = tpu.transpose %58, [1, 0] : vector<8x8xf32> -> vector<8x8xf32>
    %cst_29 = arith.constant dense<0.000000e+00> : vector<8x8xf32>
    %61 = tpu.matmul %57, %60, %cst_29 {dimension_numbers = #tpu.dot_dimension_numbers<[1], [0], [0], [1], [0, 0, 1, 1], [], []>} : vector<8x8xf32>, vector<8x8xf32>, vector<8x8xf32> -> vector<8x8xf32>
    %cst_30 = arith.constant 0.353553385 : f32
    %62 = vector.broadcast %cst_30 : f32 to vector<8x8xf32>
    %63 = arith.mulf %61, %62 : vector<8x8xf32>
    %cst_31 = arith.constant dense<0xFF800000> : vector<8xf32>
    %64 = vector.multi_reduction <maximumf>, %63, %cst_31 [1] : vector<8x8xf32> to vector<8xf32>
    %65 = vector.shape_cast %64 : vector<8xf32> to vector<8x1xf32>
    %66 = vector.broadcast %65 : vector<8x1xf32> to vector<8x8xf32>
    %67 = arith.subf %63, %66 : vector<8x8xf32>
    %68 = math.exp %67 : vector<8x8xf32>
    %cst_32 = arith.constant dense<0.000000e+00> : vector<8xf32>
    %69 = vector.multi_reduction <add>, %68, %cst_32 [1] : vector<8x8xf32> to vector<8xf32>
    %70 = vector.shape_cast %69 : vector<8xf32> to vector<8x1xf32>
    %71 = tpu.reciprocal %70 {approx = true} : vector<8x1xf32> -> vector<8x1xf32>
    %72 = vector.broadcast %71 : vector<8x1xf32> to vector<8x8xf32>
    %73 = arith.mulf %68, %72 : vector<8x8xf32>
    %cst_33 = arith.constant dense<0.000000e+00> : vector<8x8xf32>
    %74 = tpu.matmul %73, %59, %cst_33 {dimension_numbers = #tpu.dot_dimension_numbers<[1], [0], [0], [1], [0, 0, 1, 1], [], []>} : vector<8x8xf32>, vector<8x8xf32>, vector<8x8xf32> -> vector<8x8xf32>
    %75 = vector.extract_strided_slice %36 {offsets = [0, 16], sizes = [8, 8], strides = [1, 1]} : vector<8x32xf32> to vector<8x8xf32>
    %76 = vector.extract_strided_slice %37 {offsets = [0, 16], sizes = [8, 8], strides = [1, 1]} : vector<8x32xf32> to vector<8x8xf32>
    %77 = vector.extract_strided_slice %38 {offsets = [0, 16], sizes = [8, 8], strides = [1, 1]} : vector<8x32xf32> to vector<8x8xf32>
    %78 = tpu.transpose %76, [1, 0] : vector<8x8xf32> -> vector<8x8xf32>
    %cst_34 = arith.constant dense<0.000000e+00> : vector<8x8xf32>
    %79 = tpu.matmul %75, %78, %cst_34 {dimension_numbers = #tpu.dot_dimension_numbers<[1], [0], [0], [1], [0, 0, 1, 1], [], []>} : vector<8x8xf32>, vector<8x8xf32>, vector<8x8xf32> -> vector<8x8xf32>
    %cst_35 = arith.constant 0.353553385 : f32
    %80 = vector.broadcast %cst_35 : f32 to vector<8x8xf32>
    %81 = arith.mulf %79, %80 : vector<8x8xf32>
    %cst_36 = arith.constant dense<0xFF800000> : vector<8xf32>
    %82 = vector.multi_reduction <maximumf>, %81, %cst_36 [1] : vector<8x8xf32> to vector<8xf32>
    %83 = vector.shape_cast %82 : vector<8xf32> to vector<8x1xf32>
    %84 = vector.broadcast %83 : vector<8x1xf32> to vector<8x8xf32>
    %85 = arith.subf %81, %84 : vector<8x8xf32>
    %86 = math.exp %85 : vector<8x8xf32>
    %cst_37 = arith.constant dense<0.000000e+00> : vector<8xf32>
    %87 = vector.multi_reduction <add>, %86, %cst_37 [1] : vector<8x8xf32> to vector<8xf32>
    %88 = vector.shape_cast %87 : vector<8xf32> to vector<8x1xf32>
    %89 = tpu.reciprocal %88 {approx = true} : vector<8x1xf32> -> vector<8x1xf32>
    %90 = vector.broadcast %89 : vector<8x1xf32> to vector<8x8xf32>
    %91 = arith.mulf %86, %90 : vector<8x8xf32>
    %cst_38 = arith.constant dense<0.000000e+00> : vector<8x8xf32>
    %92 = tpu.matmul %91, %77, %cst_38 {dimension_numbers = #tpu.dot_dimension_numbers<[1], [0], [0], [1], [0, 0, 1, 1], [], []>} : vector<8x8xf32>, vector<8x8xf32>, vector<8x8xf32> -> vector<8x8xf32>
    %93 = vector.extract_strided_slice %36 {offsets = [0, 24], sizes = [8, 8], strides = [1, 1]} : vector<8x32xf32> to vector<8x8xf32>
    %94 = vector.extract_strided_slice %37 {offsets = [0, 24], sizes = [8, 8], strides = [1, 1]} : vector<8x32xf32> to vector<8x8xf32>
    %95 = vector.extract_strided_slice %38 {offsets = [0, 24], sizes = [8, 8], strides = [1, 1]} : vector<8x32xf32> to vector<8x8xf32>
    %96 = tpu.transpose %94, [1, 0] : vector<8x8xf32> -> vector<8x8xf32>
    %cst_39 = arith.constant dense<0.000000e+00> : vector<8x8xf32>
    %97 = tpu.matmul %93, %96, %cst_39 {dimension_numbers = #tpu.dot_dimension_numbers<[1], [0], [0], [1], [0, 0, 1, 1], [], []>} : vector<8x8xf32>, vector<8x8xf32>, vector<8x8xf32> -> vector<8x8xf32>
    %cst_40 = arith.constant 0.353553385 : f32
    %98 = vector.broadcast %cst_40 : f32 to vector<8x8xf32>
    %99 = arith.mulf %97, %98 : vector<8x8xf32>
    %cst_41 = arith.constant dense<0xFF800000> : vector<8xf32>
    %100 = vector.multi_reduction <maximumf>, %99, %cst_41 [1] : vector<8x8xf32> to vector<8xf32>
    %101 = vector.shape_cast %100 : vector<8xf32> to vector<8x1xf32>
    %102 = vector.broadcast %101 : vector<8x1xf32> to vector<8x8xf32>
    %103 = arith.subf %99, %102 : vector<8x8xf32>
    %104 = math.exp %103 : vector<8x8xf32>
    %cst_42 = arith.constant dense<0.000000e+00> : vector<8xf32>
    %105 = vector.multi_reduction <add>, %104, %cst_42 [1] : vector<8x8xf32> to vector<8xf32>
    %106 = vector.shape_cast %105 : vector<8xf32> to vector<8x1xf32>
    %107 = tpu.reciprocal %106 {approx = true} : vector<8x1xf32> -> vector<8x1xf32>
    %108 = vector.broadcast %107 : vector<8x1xf32> to vector<8x8xf32>
    %109 = arith.mulf %104, %108 : vector<8x8xf32>
    %cst_43 = arith.constant dense<0.000000e+00> : vector<8x8xf32>
    %110 = tpu.matmul %109, %95, %cst_43 {dimension_numbers = #tpu.dot_dimension_numbers<[1], [0], [0], [1], [0, 0, 1, 1], [], []>} : vector<8x8xf32>, vector<8x8xf32>, vector<8x8xf32> -> vector<8x8xf32>
    %111 = tpu.concatenate %56, %74, %92, %110 in 1 : vector<8x8xf32>, vector<8x8xf32>, vector<8x8xf32>, vector<8x8xf32> -> vector<8x32xf32>
    %c0_44 = arith.constant 0 : index
    %c0_45 = arith.constant 0 : index
    %c0_46 = arith.constant 0 : index
    %112 = vector.load %arg7[%c0_44, %c0_45, %c0_46] : memref<2x32x32xf32, #tpu.memory_space<vmem>>, vector<1x32x32xf32>
    %113 = vector.shape_cast %112 : vector<1x32x32xf32> to vector<32x32xf32>
    %cst_47 = arith.constant dense<0.000000e+00> : vector<8x32xf32>
    %114 = tpu.matmul %111, %113, %cst_47 {dimension_numbers = #tpu.dot_dimension_numbers<[1], [0], [0], [1], [0, 0, 1, 1], [], []>} : vector<8x32xf32>, vector<32x32xf32>, vector<8x32xf32> -> vector<8x32xf32>
    %115 = arith.addf %1, %114 : vector<8x32xf32>
    %c0_48 = arith.constant 0 : index
    %c0_49 = arith.constant 0 : index
    %c0_50 = arith.constant 0 : index
    %116 = vector.load %arg8[%c0_48, %c0_49, %c0_50] : memref<2x1x32xf32, #tpu.memory_space<vmem>>, vector<1x1x32xf32>
    %117 = vector.shape_cast %116 : vector<1x1x32xf32> to vector<1x32xf32>
    %118 = vector.broadcast %117 : vector<1x32xf32> to vector<8x32xf32>
    %119 = arith.addf %115, %118 : vector<8x32xf32>
    %c0_51 = arith.constant 0 : index
    %c1 = arith.constant 1 : index
    %c0_52 = arith.constant 0 : index
    %c0_53 = arith.constant 0 : index
    %120 = vector.load %arg3[%c0_51, %c1, %c0_52, %c0_53] : memref<2x3x1x32xf32, #tpu.memory_space<vmem>>, vector<1x1x1x32xf32>
    %121 = vector.shape_cast %120 : vector<1x1x1x32xf32> to vector<1x32xf32>
    %c0_54 = arith.constant 0 : index
    %c1_55 = arith.constant 1 : index
    %c0_56 = arith.constant 0 : index
    %c0_57 = arith.constant 0 : index
    %122 = vector.load %arg4[%c0_54, %c1_55, %c0_56, %c0_57] : memref<2x3x1x32xf32, #tpu.memory_space<vmem>>, vector<1x1x1x32xf32>
    %123 = vector.shape_cast %122 : vector<1x1x1x32xf32> to vector<1x32xf32>
    %cst_58 = arith.constant dense<0.000000e+00> : vector<8xf32>
    %124 = vector.multi_reduction <add>, %119, %cst_58 [1] : vector<8x32xf32> to vector<8xf32>
    %125 = vector.shape_cast %124 : vector<8xf32> to vector<8x1xf32>
    %cst_59 = arith.constant 3.200000e+01 : f32
    %126 = vector.broadcast %cst_59 : f32 to vector<8x1xf32>
    %127 = arith.divf %125, %126 : vector<8x1xf32>
    %128 = vector.broadcast %127 : vector<8x1xf32> to vector<8x32xf32>
    %129 = arith.subf %119, %128 : vector<8x32xf32>
    %130 = arith.mulf %129, %129 : vector<8x32xf32>
    %cst_60 = arith.constant dense<0.000000e+00> : vector<8xf32>
    %131 = vector.multi_reduction <add>, %130, %cst_60 [1] : vector<8x32xf32> to vector<8xf32>
    %132 = vector.shape_cast %131 : vector<8xf32> to vector<8x1xf32>
    %cst_61 = arith.constant 3.100000e+01 : f32
    %133 = vector.broadcast %cst_61 : f32 to vector<8x1xf32>
    %134 = arith.divf %132, %133 : vector<8x1xf32>
    %135 = math.sqrt %134 : vector<8x1xf32>
    %cst_62 = arith.constant 9.99999997E-7 : f32
    %136 = vector.broadcast %cst_62 : f32 to vector<8x1xf32>
    %137 = arith.addf %135, %136 : vector<8x1xf32>
    %138 = tpu.reciprocal %137 {approx = true} : vector<8x1xf32> -> vector<8x1xf32>
    %139 = vector.broadcast %121 : vector<1x32xf32> to vector<8x32xf32>
    %140 = arith.mulf %139, %129 : vector<8x32xf32>
    %141 = vector.broadcast %138 : vector<8x1xf32> to vector<8x32xf32>
    %142 = arith.mulf %140, %141 : vector<8x32xf32>
    %143 = vector.broadcast %123 : vector<1x32xf32> to vector<8x32xf32>
    %144 = arith.addf %142, %143 : vector<8x32xf32>
    %c0_63 = arith.constant 0 : index
    %c0_64 = arith.constant 0 : index
    %c0_65 = arith.constant 0 : index
    %145 = vector.load %arg9[%c0_63, %c0_64, %c0_65] : memref<2x32x96xf32, #tpu.memory_space<vmem>>, vector<1x32x96xf32>
    %146 = vector.shape_cast %145 : vector<1x32x96xf32> to vector<32x96xf32>
    %c0_66 = arith.constant 0 : index
    %c0_67 = arith.constant 0 : index
    %c0_68 = arith.constant 0 : index
    %147 = vector.load %arg10[%c0_66, %c0_67, %c0_68] : memref<2x1x96xf32, #tpu.memory_space<vmem>>, vector<1x1x96xf32>
    %148 = vector.shape_cast %147 : vector<1x1x96xf32> to vector<1x96xf32>
    %149 = vector.extract_strided_slice %146 {offsets = [0, 0], sizes = [32, 32], strides = [1, 1]} : vector<32x96xf32> to vector<32x32xf32>
    %cst_69 = arith.constant dense<0.000000e+00> : vector<8x32xf32>
    %150 = tpu.matmul %144, %149, %cst_69 {dimension_numbers = #tpu.dot_dimension_numbers<[1], [0], [0], [1], [0, 0, 1, 1], [], []>} : vector<8x32xf32>, vector<32x32xf32>, vector<8x32xf32> -> vector<8x32xf32>
    %151 = vector.extract_strided_slice %148 {offsets = [0, 0], sizes = [1, 32], strides = [1, 1]} : vector<1x96xf32> to vector<1x32xf32>
    %152 = vector.broadcast %151 : vector<1x32xf32> to vector<8x32xf32>
    %153 = arith.addf %150, %152 : vector<8x32xf32>
    %154 = vector.extract_strided_slice %146 {offsets = [0, 32], sizes = [32, 64], strides = [1, 1]} : vector<32x96xf32> to vector<32x64xf32>
    %cst_70 = arith.constant dense<0.000000e+00> : vector<8x64xf32>
    %155 = tpu.matmul %3, %154, %cst_70 {dimension_numbers = #tpu.dot_dimension_numbers<[1], [0], [0], [1], [0, 0, 1, 1], [], []>} : vector<8x32xf32>, vector<32x64xf32>, vector<8x64xf32> -> vector<8x64xf32>
    %156 = vector.extract_strided_slice %148 {offsets = [0, 32], sizes = [1, 64], strides = [1, 1]} : vector<1x96xf32> to vector<1x64xf32>
    %157 = vector.broadcast %156 : vector<1x64xf32> to vector<8x64xf32>
    %158 = arith.addf %155, %157 : vector<8x64xf32>
    %159 = vector.extract_strided_slice %158 {offsets = [0, 0], sizes = [8, 32], strides = [1, 1]} : vector<8x64xf32> to vector<8x32xf32>
    %160 = vector.extract_strided_slice %158 {offsets = [0, 32], sizes = [8, 32], strides = [1, 1]} : vector<8x64xf32> to vector<8x32xf32>
    %161 = vector.extract_strided_slice %153 {offsets = [0, 0], sizes = [8, 8], strides = [1, 1]} : vector<8x32xf32> to vector<8x8xf32>
    %162 = vector.extract_strided_slice %159 {offsets = [0, 0], sizes = [8, 8], strides = [1, 1]} : vector<8x32xf32> to vector<8x8xf32>
    %163 = vector.extract_strided_slice %160 {offsets = [0, 0], sizes = [8, 8], strides = [1, 1]} : vector<8x32xf32> to vector<8x8xf32>
    %164 = tpu.transpose %162, [1, 0] : vector<8x8xf32> -> vector<8x8xf32>
    %cst_71 = arith.constant dense<0.000000e+00> : vector<8x8xf32>
    %165 = tpu.matmul %161, %164, %cst_71 {dimension_numbers = #tpu.dot_dimension_numbers<[1], [0], [0], [1], [0, 0, 1, 1], [], []>} : vector<8x8xf32>, vector<8x8xf32>, vector<8x8xf32> -> vector<8x8xf32>
    %cst_72 = arith.constant 0.353553385 : f32
    %166 = vector.broadcast %cst_72 : f32 to vector<8x8xf32>
    %167 = arith.mulf %165, %166 : vector<8x8xf32>
    %cst_73 = arith.constant dense<0xFF800000> : vector<8xf32>
    %168 = vector.multi_reduction <maximumf>, %167, %cst_73 [1] : vector<8x8xf32> to vector<8xf32>
    %169 = vector.shape_cast %168 : vector<8xf32> to vector<8x1xf32>
    %170 = vector.broadcast %169 : vector<8x1xf32> to vector<8x8xf32>
    %171 = arith.subf %167, %170 : vector<8x8xf32>
    %172 = math.exp %171 : vector<8x8xf32>
    %cst_74 = arith.constant dense<0.000000e+00> : vector<8xf32>
    %173 = vector.multi_reduction <add>, %172, %cst_74 [1] : vector<8x8xf32> to vector<8xf32>
    %174 = vector.shape_cast %173 : vector<8xf32> to vector<8x1xf32>
    %175 = tpu.reciprocal %174 {approx = true} : vector<8x1xf32> -> vector<8x1xf32>
    %176 = vector.broadcast %175 : vector<8x1xf32> to vector<8x8xf32>
    %177 = arith.mulf %172, %176 : vector<8x8xf32>
    %cst_75 = arith.constant dense<0.000000e+00> : vector<8x8xf32>
    %178 = tpu.matmul %177, %163, %cst_75 {dimension_numbers = #tpu.dot_dimension_numbers<[1], [0], [0], [1], [0, 0, 1, 1], [], []>} : vector<8x8xf32>, vector<8x8xf32>, vector<8x8xf32> -> vector<8x8xf32>
    %179 = vector.extract_strided_slice %153 {offsets = [0, 8], sizes = [8, 8], strides = [1, 1]} : vector<8x32xf32> to vector<8x8xf32>
    %180 = vector.extract_strided_slice %159 {offsets = [0, 8], sizes = [8, 8], strides = [1, 1]} : vector<8x32xf32> to vector<8x8xf32>
    %181 = vector.extract_strided_slice %160 {offsets = [0, 8], sizes = [8, 8], strides = [1, 1]} : vector<8x32xf32> to vector<8x8xf32>
    %182 = tpu.transpose %180, [1, 0] : vector<8x8xf32> -> vector<8x8xf32>
    %cst_76 = arith.constant dense<0.000000e+00> : vector<8x8xf32>
    %183 = tpu.matmul %179, %182, %cst_76 {dimension_numbers = #tpu.dot_dimension_numbers<[1], [0], [0], [1], [0, 0, 1, 1], [], []>} : vector<8x8xf32>, vector<8x8xf32>, vector<8x8xf32> -> vector<8x8xf32>
    %cst_77 = arith.constant 0.353553385 : f32
    %184 = vector.broadcast %cst_77 : f32 to vector<8x8xf32>
    %185 = arith.mulf %183, %184 : vector<8x8xf32>
    %cst_78 = arith.constant dense<0xFF800000> : vector<8xf32>
    %186 = vector.multi_reduction <maximumf>, %185, %cst_78 [1] : vector<8x8xf32> to vector<8xf32>
    %187 = vector.shape_cast %186 : vector<8xf32> to vector<8x1xf32>
    %188 = vector.broadcast %187 : vector<8x1xf32> to vector<8x8xf32>
    %189 = arith.subf %185, %188 : vector<8x8xf32>
    %190 = math.exp %189 : vector<8x8xf32>
    %cst_79 = arith.constant dense<0.000000e+00> : vector<8xf32>
    %191 = vector.multi_reduction <add>, %190, %cst_79 [1] : vector<8x8xf32> to vector<8xf32>
    %192 = vector.shape_cast %191 : vector<8xf32> to vector<8x1xf32>
    %193 = tpu.reciprocal %192 {approx = true} : vector<8x1xf32> -> vector<8x1xf32>
    %194 = vector.broadcast %193 : vector<8x1xf32> to vector<8x8xf32>
    %195 = arith.mulf %190, %194 : vector<8x8xf32>
    %cst_80 = arith.constant dense<0.000000e+00> : vector<8x8xf32>
    %196 = tpu.matmul %195, %181, %cst_80 {dimension_numbers = #tpu.dot_dimension_numbers<[1], [0], [0], [1], [0, 0, 1, 1], [], []>} : vector<8x8xf32>, vector<8x8xf32>, vector<8x8xf32> -> vector<8x8xf32>
    %197 = vector.extract_strided_slice %153 {offsets = [0, 16], sizes = [8, 8], strides = [1, 1]} : vector<8x32xf32> to vector<8x8xf32>
    %198 = vector.extract_strided_slice %159 {offsets = [0, 16], sizes = [8, 8], strides = [1, 1]} : vector<8x32xf32> to vector<8x8xf32>
    %199 = vector.extract_strided_slice %160 {offsets = [0, 16], sizes = [8, 8], strides = [1, 1]} : vector<8x32xf32> to vector<8x8xf32>
    %200 = tpu.transpose %198, [1, 0] : vector<8x8xf32> -> vector<8x8xf32>
    %cst_81 = arith.constant dense<0.000000e+00> : vector<8x8xf32>
    %201 = tpu.matmul %197, %200, %cst_81 {dimension_numbers = #tpu.dot_dimension_numbers<[1], [0], [0], [1], [0, 0, 1, 1], [], []>} : vector<8x8xf32>, vector<8x8xf32>, vector<8x8xf32> -> vector<8x8xf32>
    %cst_82 = arith.constant 0.353553385 : f32
    %202 = vector.broadcast %cst_82 : f32 to vector<8x8xf32>
    %203 = arith.mulf %201, %202 : vector<8x8xf32>
    %cst_83 = arith.constant dense<0xFF800000> : vector<8xf32>
    %204 = vector.multi_reduction <maximumf>, %203, %cst_83 [1] : vector<8x8xf32> to vector<8xf32>
    %205 = vector.shape_cast %204 : vector<8xf32> to vector<8x1xf32>
    %206 = vector.broadcast %205 : vector<8x1xf32> to vector<8x8xf32>
    %207 = arith.subf %203, %206 : vector<8x8xf32>
    %208 = math.exp %207 : vector<8x8xf32>
    %cst_84 = arith.constant dense<0.000000e+00> : vector<8xf32>
    %209 = vector.multi_reduction <add>, %208, %cst_84 [1] : vector<8x8xf32> to vector<8xf32>
    %210 = vector.shape_cast %209 : vector<8xf32> to vector<8x1xf32>
    %211 = tpu.reciprocal %210 {approx = true} : vector<8x1xf32> -> vector<8x1xf32>
    %212 = vector.broadcast %211 : vector<8x1xf32> to vector<8x8xf32>
    %213 = arith.mulf %208, %212 : vector<8x8xf32>
    %cst_85 = arith.constant dense<0.000000e+00> : vector<8x8xf32>
    %214 = tpu.matmul %213, %199, %cst_85 {dimension_numbers = #tpu.dot_dimension_numbers<[1], [0], [0], [1], [0, 0, 1, 1], [], []>} : vector<8x8xf32>, vector<8x8xf32>, vector<8x8xf32> -> vector<8x8xf32>
    %215 = vector.extract_strided_slice %153 {offsets = [0, 24], sizes = [8, 8], strides = [1, 1]} : vector<8x32xf32> to vector<8x8xf32>
    %216 = vector.extract_strided_slice %159 {offsets = [0, 24], sizes = [8, 8], strides = [1, 1]} : vector<8x32xf32> to vector<8x8xf32>
    %217 = vector.extract_strided_slice %160 {offsets = [0, 24], sizes = [8, 8], strides = [1, 1]} : vector<8x32xf32> to vector<8x8xf32>
    %218 = tpu.transpose %216, [1, 0] : vector<8x8xf32> -> vector<8x8xf32>
    %cst_86 = arith.constant dense<0.000000e+00> : vector<8x8xf32>
    %219 = tpu.matmul %215, %218, %cst_86 {dimension_numbers = #tpu.dot_dimension_numbers<[1], [0], [0], [1], [0, 0, 1, 1], [], []>} : vector<8x8xf32>, vector<8x8xf32>, vector<8x8xf32> -> vector<8x8xf32>
    %cst_87 = arith.constant 0.353553385 : f32
    %220 = vector.broadcast %cst_87 : f32 to vector<8x8xf32>
    %221 = arith.mulf %219, %220 : vector<8x8xf32>
    %cst_88 = arith.constant dense<0xFF800000> : vector<8xf32>
    %222 = vector.multi_reduction <maximumf>, %221, %cst_88 [1] : vector<8x8xf32> to vector<8xf32>
    %223 = vector.shape_cast %222 : vector<8xf32> to vector<8x1xf32>
    %224 = vector.broadcast %223 : vector<8x1xf32> to vector<8x8xf32>
    %225 = arith.subf %221, %224 : vector<8x8xf32>
    %226 = math.exp %225 : vector<8x8xf32>
    %cst_89 = arith.constant dense<0.000000e+00> : vector<8xf32>
    %227 = vector.multi_reduction <add>, %226, %cst_89 [1] : vector<8x8xf32> to vector<8xf32>
    %228 = vector.shape_cast %227 : vector<8xf32> to vector<8x1xf32>
    %229 = tpu.reciprocal %228 {approx = true} : vector<8x1xf32> -> vector<8x1xf32>
    %230 = vector.broadcast %229 : vector<8x1xf32> to vector<8x8xf32>
    %231 = arith.mulf %226, %230 : vector<8x8xf32>
    %cst_90 = arith.constant dense<0.000000e+00> : vector<8x8xf32>
    %232 = tpu.matmul %231, %217, %cst_90 {dimension_numbers = #tpu.dot_dimension_numbers<[1], [0], [0], [1], [0, 0, 1, 1], [], []>} : vector<8x8xf32>, vector<8x8xf32>, vector<8x8xf32> -> vector<8x8xf32>
    %233 = tpu.concatenate %178, %196, %214, %232 in 1 : vector<8x8xf32>, vector<8x8xf32>, vector<8x8xf32>, vector<8x8xf32> -> vector<8x32xf32>
    %c0_91 = arith.constant 0 : index
    %c0_92 = arith.constant 0 : index
    %c0_93 = arith.constant 0 : index
    %234 = vector.load %arg11[%c0_91, %c0_92, %c0_93] : memref<2x32x32xf32, #tpu.memory_space<vmem>>, vector<1x32x32xf32>
    %235 = vector.shape_cast %234 : vector<1x32x32xf32> to vector<32x32xf32>
    %cst_94 = arith.constant dense<0.000000e+00> : vector<8x32xf32>
    %236 = tpu.matmul %233, %235, %cst_94 {dimension_numbers = #tpu.dot_dimension_numbers<[1], [0], [0], [1], [0, 0, 1, 1], [], []>} : vector<8x32xf32>, vector<32x32xf32>, vector<8x32xf32> -> vector<8x32xf32>
    %237 = arith.addf %119, %236 : vector<8x32xf32>
    %c0_95 = arith.constant 0 : index
    %c0_96 = arith.constant 0 : index
    %c0_97 = arith.constant 0 : index
    %238 = vector.load %arg12[%c0_95, %c0_96, %c0_97] : memref<2x1x32xf32, #tpu.memory_space<vmem>>, vector<1x1x32xf32>
    %239 = vector.shape_cast %238 : vector<1x1x32xf32> to vector<1x32xf32>
    %240 = vector.broadcast %239 : vector<1x32xf32> to vector<8x32xf32>
    %241 = arith.addf %237, %240 : vector<8x32xf32>
    %c0_98 = arith.constant 0 : index
    %c2 = arith.constant 2 : index
    %c0_99 = arith.constant 0 : index
    %c0_100 = arith.constant 0 : index
    %242 = vector.load %arg3[%c0_98, %c2, %c0_99, %c0_100] : memref<2x3x1x32xf32, #tpu.memory_space<vmem>>, vector<1x1x1x32xf32>
    %243 = vector.shape_cast %242 : vector<1x1x1x32xf32> to vector<1x32xf32>
    %c0_101 = arith.constant 0 : index
    %c2_102 = arith.constant 2 : index
    %c0_103 = arith.constant 0 : index
    %c0_104 = arith.constant 0 : index
    %244 = vector.load %arg4[%c0_101, %c2_102, %c0_103, %c0_104] : memref<2x3x1x32xf32, #tpu.memory_space<vmem>>, vector<1x1x1x32xf32>
    %245 = vector.shape_cast %244 : vector<1x1x1x32xf32> to vector<1x32xf32>
    %cst_105 = arith.constant dense<0.000000e+00> : vector<8xf32>
    %246 = vector.multi_reduction <add>, %241, %cst_105 [1] : vector<8x32xf32> to vector<8xf32>
    %247 = vector.shape_cast %246 : vector<8xf32> to vector<8x1xf32>
    %cst_106 = arith.constant 3.200000e+01 : f32
    %248 = vector.broadcast %cst_106 : f32 to vector<8x1xf32>
    %249 = arith.divf %247, %248 : vector<8x1xf32>
    %250 = vector.broadcast %249 : vector<8x1xf32> to vector<8x32xf32>
    %251 = arith.subf %241, %250 : vector<8x32xf32>
    %252 = arith.mulf %251, %251 : vector<8x32xf32>
    %cst_107 = arith.constant dense<0.000000e+00> : vector<8xf32>
    %253 = vector.multi_reduction <add>, %252, %cst_107 [1] : vector<8x32xf32> to vector<8xf32>
    %254 = vector.shape_cast %253 : vector<8xf32> to vector<8x1xf32>
    %cst_108 = arith.constant 3.100000e+01 : f32
    %255 = vector.broadcast %cst_108 : f32 to vector<8x1xf32>
    %256 = arith.divf %254, %255 : vector<8x1xf32>
    %257 = math.sqrt %256 : vector<8x1xf32>
    %cst_109 = arith.constant 9.99999997E-7 : f32
    %258 = vector.broadcast %cst_109 : f32 to vector<8x1xf32>
    %259 = arith.addf %257, %258 : vector<8x1xf32>
    %260 = tpu.reciprocal %259 {approx = true} : vector<8x1xf32> -> vector<8x1xf32>
    %261 = vector.broadcast %243 : vector<1x32xf32> to vector<8x32xf32>
    %262 = arith.mulf %261, %251 : vector<8x32xf32>
    %263 = vector.broadcast %260 : vector<8x1xf32> to vector<8x32xf32>
    %264 = arith.mulf %262, %263 : vector<8x32xf32>
    %265 = vector.broadcast %245 : vector<1x32xf32> to vector<8x32xf32>
    %266 = arith.addf %264, %265 : vector<8x32xf32>
    %c0_110 = arith.constant 0 : index
    %c0_111 = arith.constant 0 : index
    %c0_112 = arith.constant 0 : index
    %267 = vector.load %arg13[%c0_110, %c0_111, %c0_112] : memref<2x32x64xf32, #tpu.memory_space<vmem>>, vector<1x32x64xf32>
    %268 = vector.shape_cast %267 : vector<1x32x64xf32> to vector<32x64xf32>
    %cst_113 = arith.constant dense<0.000000e+00> : vector<8x64xf32>
    %269 = tpu.matmul %266, %268, %cst_113 {dimension_numbers = #tpu.dot_dimension_numbers<[1], [0], [0], [1], [0, 0, 1, 1], [], []>} : vector<8x32xf32>, vector<32x64xf32>, vector<8x64xf32> -> vector<8x64xf32>
    %c0_114 = arith.constant 0 : index
    %c0_115 = arith.constant 0 : index
    %c0_116 = arith.constant 0 : index
    %270 = vector.load %arg14[%c0_114, %c0_115, %c0_116] : memref<2x1x64xf32, #tpu.memory_space<vmem>>, vector<1x1x64xf32>
    %271 = vector.shape_cast %270 : vector<1x1x64xf32> to vector<1x64xf32>
    %272 = vector.broadcast %271 : vector<1x64xf32> to vector<8x64xf32>
    %273 = arith.addf %269, %272 : vector<8x64xf32>
    %cst_117 = arith.constant 0.000000e+00 : f32
    %274 = vector.broadcast %cst_117 : f32 to vector<8x64xf32>
    %275 = arith.maximumf %273, %274 : vector<8x64xf32>
    %c0_118 = arith.constant 0 : index
    %c0_119 = arith.constant 0 : index
    %c0_120 = arith.constant 0 : index
    %276 = vector.load %arg15[%c0_118, %c0_119, %c0_120] : memref<2x64x32xf32, #tpu.memory_space<vmem>>, vector<1x64x32xf32>
    %277 = vector.shape_cast %276 : vector<1x64x32xf32> to vector<64x32xf32>
    %cst_121 = arith.constant dense<0.000000e+00> : vector<8x32xf32>
    %278 = tpu.matmul %275, %277, %cst_121 {dimension_numbers = #tpu.dot_dimension_numbers<[1], [0], [0], [1], [0, 0, 1, 1], [], []>} : vector<8x64xf32>, vector<64x32xf32>, vector<8x32xf32> -> vector<8x32xf32>
    %279 = arith.addf %241, %278 : vector<8x32xf32>
    %c0_122 = arith.constant 0 : index
    %c0_123 = arith.constant 0 : index
    %c0_124 = arith.constant 0 : index
    %280 = vector.load %arg16[%c0_122, %c0_123, %c0_124] : memref<2x1x32xf32, #tpu.memory_space<vmem>>, vector<1x1x32xf32>
    %281 = vector.shape_cast %280 : vector<1x1x32xf32> to vector<1x32xf32>
    %282 = vector.broadcast %281 : vector<1x32xf32> to vector<8x32xf32>
    %283 = arith.addf %279, %282 : vector<8x32xf32>
    %c1_125 = arith.constant 1 : index
    %c0_126 = arith.constant 0 : index
    %c0_127 = arith.constant 0 : index
    %c0_128 = arith.constant 0 : index
    %284 = vector.load %arg3[%c1_125, %c0_126, %c0_127, %c0_128] : memref<2x3x1x32xf32, #tpu.memory_space<vmem>>, vector<1x1x1x32xf32>
    %285 = vector.shape_cast %284 : vector<1x1x1x32xf32> to vector<1x32xf32>
    %c1_129 = arith.constant 1 : index
    %c0_130 = arith.constant 0 : index
    %c0_131 = arith.constant 0 : index
    %c0_132 = arith.constant 0 : index
    %286 = vector.load %arg4[%c1_129, %c0_130, %c0_131, %c0_132] : memref<2x3x1x32xf32, #tpu.memory_space<vmem>>, vector<1x1x1x32xf32>
    %287 = vector.shape_cast %286 : vector<1x1x1x32xf32> to vector<1x32xf32>
    %cst_133 = arith.constant dense<0.000000e+00> : vector<8xf32>
    %288 = vector.multi_reduction <add>, %283, %cst_133 [1] : vector<8x32xf32> to vector<8xf32>
    %289 = vector.shape_cast %288 : vector<8xf32> to vector<8x1xf32>
    %cst_134 = arith.constant 3.200000e+01 : f32
    %290 = vector.broadcast %cst_134 : f32 to vector<8x1xf32>
    %291 = arith.divf %289, %290 : vector<8x1xf32>
    %292 = vector.broadcast %291 : vector<8x1xf32> to vector<8x32xf32>
    %293 = arith.subf %283, %292 : vector<8x32xf32>
    %294 = arith.mulf %293, %293 : vector<8x32xf32>
    %cst_135 = arith.constant dense<0.000000e+00> : vector<8xf32>
    %295 = vector.multi_reduction <add>, %294, %cst_135 [1] : vector<8x32xf32> to vector<8xf32>
    %296 = vector.shape_cast %295 : vector<8xf32> to vector<8x1xf32>
    %cst_136 = arith.constant 3.100000e+01 : f32
    %297 = vector.broadcast %cst_136 : f32 to vector<8x1xf32>
    %298 = arith.divf %296, %297 : vector<8x1xf32>
    %299 = math.sqrt %298 : vector<8x1xf32>
    %cst_137 = arith.constant 9.99999997E-7 : f32
    %300 = vector.broadcast %cst_137 : f32 to vector<8x1xf32>
    %301 = arith.addf %299, %300 : vector<8x1xf32>
    %302 = tpu.reciprocal %301 {approx = true} : vector<8x1xf32> -> vector<8x1xf32>
    %303 = vector.broadcast %285 : vector<1x32xf32> to vector<8x32xf32>
    %304 = arith.mulf %303, %293 : vector<8x32xf32>
    %305 = vector.broadcast %302 : vector<8x1xf32> to vector<8x32xf32>
    %306 = arith.mulf %304, %305 : vector<8x32xf32>
    %307 = vector.broadcast %287 : vector<1x32xf32> to vector<8x32xf32>
    %308 = arith.addf %306, %307 : vector<8x32xf32>
    %c1_138 = arith.constant 1 : index
    %c0_139 = arith.constant 0 : index
    %c0_140 = arith.constant 0 : index
    %309 = vector.load %arg5[%c1_138, %c0_139, %c0_140] : memref<2x32x96xf32, #tpu.memory_space<vmem>>, vector<1x32x96xf32>
    %310 = vector.shape_cast %309 : vector<1x32x96xf32> to vector<32x96xf32>
    %cst_141 = arith.constant dense<0.000000e+00> : vector<8x96xf32>
    %311 = tpu.matmul %308, %310, %cst_141 {dimension_numbers = #tpu.dot_dimension_numbers<[1], [0], [0], [1], [0, 0, 1, 1], [], []>} : vector<8x32xf32>, vector<32x96xf32>, vector<8x96xf32> -> vector<8x96xf32>
    %c1_142 = arith.constant 1 : index
    %c0_143 = arith.constant 0 : index
    %c0_144 = arith.constant 0 : index
    %312 = vector.load %arg6[%c1_142, %c0_143, %c0_144] : memref<2x1x96xf32, #tpu.memory_space<vmem>>, vector<1x1x96xf32>
    %313 = vector.shape_cast %312 : vector<1x1x96xf32> to vector<1x96xf32>
    %314 = vector.broadcast %313 : vector<1x96xf32> to vector<8x96xf32>
    %315 = arith.addf %311, %314 : vector<8x96xf32>
    %316 = vector.extract_strided_slice %315 {offsets = [0, 0], sizes = [8, 32], strides = [1, 1]} : vector<8x96xf32> to vector<8x32xf32>
    %317 = vector.extract_strided_slice %315 {offsets = [0, 32], sizes = [8, 32], strides = [1, 1]} : vector<8x96xf32> to vector<8x32xf32>
    %318 = vector.extract_strided_slice %315 {offsets = [0, 64], sizes = [8, 32], strides = [1, 1]} : vector<8x96xf32> to vector<8x32xf32>
    %319 = vector.extract_strided_slice %316 {offsets = [0, 0], sizes = [8, 8], strides = [1, 1]} : vector<8x32xf32> to vector<8x8xf32>
    %320 = vector.extract_strided_slice %317 {offsets = [0, 0], sizes = [8, 8], strides = [1, 1]} : vector<8x32xf32> to vector<8x8xf32>
    %321 = vector.extract_strided_slice %318 {offsets = [0, 0], sizes = [8, 8], strides = [1, 1]} : vector<8x32xf32> to vector<8x8xf32>
    %322 = tpu.transpose %320, [1, 0] : vector<8x8xf32> -> vector<8x8xf32>
    %cst_145 = arith.constant dense<0.000000e+00> : vector<8x8xf32>
    %323 = tpu.matmul %319, %322, %cst_145 {dimension_numbers = #tpu.dot_dimension_numbers<[1], [0], [0], [1], [0, 0, 1, 1], [], []>} : vector<8x8xf32>, vector<8x8xf32>, vector<8x8xf32> -> vector<8x8xf32>
    %cst_146 = arith.constant 0.353553385 : f32
    %324 = vector.broadcast %cst_146 : f32 to vector<8x8xf32>
    %325 = arith.mulf %323, %324 : vector<8x8xf32>
    %cst_147 = arith.constant dense<0xFF800000> : vector<8xf32>
    %326 = vector.multi_reduction <maximumf>, %325, %cst_147 [1] : vector<8x8xf32> to vector<8xf32>
    %327 = vector.shape_cast %326 : vector<8xf32> to vector<8x1xf32>
    %328 = vector.broadcast %327 : vector<8x1xf32> to vector<8x8xf32>
    %329 = arith.subf %325, %328 : vector<8x8xf32>
    %330 = math.exp %329 : vector<8x8xf32>
    %cst_148 = arith.constant dense<0.000000e+00> : vector<8xf32>
    %331 = vector.multi_reduction <add>, %330, %cst_148 [1] : vector<8x8xf32> to vector<8xf32>
    %332 = vector.shape_cast %331 : vector<8xf32> to vector<8x1xf32>
    %333 = tpu.reciprocal %332 {approx = true} : vector<8x1xf32> -> vector<8x1xf32>
    %334 = vector.broadcast %333 : vector<8x1xf32> to vector<8x8xf32>
    %335 = arith.mulf %330, %334 : vector<8x8xf32>
    %cst_149 = arith.constant dense<0.000000e+00> : vector<8x8xf32>
    %336 = tpu.matmul %335, %321, %cst_149 {dimension_numbers = #tpu.dot_dimension_numbers<[1], [0], [0], [1], [0, 0, 1, 1], [], []>} : vector<8x8xf32>, vector<8x8xf32>, vector<8x8xf32> -> vector<8x8xf32>
    %337 = vector.extract_strided_slice %316 {offsets = [0, 8], sizes = [8, 8], strides = [1, 1]} : vector<8x32xf32> to vector<8x8xf32>
    %338 = vector.extract_strided_slice %317 {offsets = [0, 8], sizes = [8, 8], strides = [1, 1]} : vector<8x32xf32> to vector<8x8xf32>
    %339 = vector.extract_strided_slice %318 {offsets = [0, 8], sizes = [8, 8], strides = [1, 1]} : vector<8x32xf32> to vector<8x8xf32>
    %340 = tpu.transpose %338, [1, 0] : vector<8x8xf32> -> vector<8x8xf32>
    %cst_150 = arith.constant dense<0.000000e+00> : vector<8x8xf32>
    %341 = tpu.matmul %337, %340, %cst_150 {dimension_numbers = #tpu.dot_dimension_numbers<[1], [0], [0], [1], [0, 0, 1, 1], [], []>} : vector<8x8xf32>, vector<8x8xf32>, vector<8x8xf32> -> vector<8x8xf32>
    %cst_151 = arith.constant 0.353553385 : f32
    %342 = vector.broadcast %cst_151 : f32 to vector<8x8xf32>
    %343 = arith.mulf %341, %342 : vector<8x8xf32>
    %cst_152 = arith.constant dense<0xFF800000> : vector<8xf32>
    %344 = vector.multi_reduction <maximumf>, %343, %cst_152 [1] : vector<8x8xf32> to vector<8xf32>
    %345 = vector.shape_cast %344 : vector<8xf32> to vector<8x1xf32>
    %346 = vector.broadcast %345 : vector<8x1xf32> to vector<8x8xf32>
    %347 = arith.subf %343, %346 : vector<8x8xf32>
    %348 = math.exp %347 : vector<8x8xf32>
    %cst_153 = arith.constant dense<0.000000e+00> : vector<8xf32>
    %349 = vector.multi_reduction <add>, %348, %cst_153 [1] : vector<8x8xf32> to vector<8xf32>
    %350 = vector.shape_cast %349 : vector<8xf32> to vector<8x1xf32>
    %351 = tpu.reciprocal %350 {approx = true} : vector<8x1xf32> -> vector<8x1xf32>
    %352 = vector.broadcast %351 : vector<8x1xf32> to vector<8x8xf32>
    %353 = arith.mulf %348, %352 : vector<8x8xf32>
    %cst_154 = arith.constant dense<0.000000e+00> : vector<8x8xf32>
    %354 = tpu.matmul %353, %339, %cst_154 {dimension_numbers = #tpu.dot_dimension_numbers<[1], [0], [0], [1], [0, 0, 1, 1], [], []>} : vector<8x8xf32>, vector<8x8xf32>, vector<8x8xf32> -> vector<8x8xf32>
    %355 = vector.extract_strided_slice %316 {offsets = [0, 16], sizes = [8, 8], strides = [1, 1]} : vector<8x32xf32> to vector<8x8xf32>
    %356 = vector.extract_strided_slice %317 {offsets = [0, 16], sizes = [8, 8], strides = [1, 1]} : vector<8x32xf32> to vector<8x8xf32>
    %357 = vector.extract_strided_slice %318 {offsets = [0, 16], sizes = [8, 8], strides = [1, 1]} : vector<8x32xf32> to vector<8x8xf32>
    %358 = tpu.transpose %356, [1, 0] : vector<8x8xf32> -> vector<8x8xf32>
    %cst_155 = arith.constant dense<0.000000e+00> : vector<8x8xf32>
    %359 = tpu.matmul %355, %358, %cst_155 {dimension_numbers = #tpu.dot_dimension_numbers<[1], [0], [0], [1], [0, 0, 1, 1], [], []>} : vector<8x8xf32>, vector<8x8xf32>, vector<8x8xf32> -> vector<8x8xf32>
    %cst_156 = arith.constant 0.353553385 : f32
    %360 = vector.broadcast %cst_156 : f32 to vector<8x8xf32>
    %361 = arith.mulf %359, %360 : vector<8x8xf32>
    %cst_157 = arith.constant dense<0xFF800000> : vector<8xf32>
    %362 = vector.multi_reduction <maximumf>, %361, %cst_157 [1] : vector<8x8xf32> to vector<8xf32>
    %363 = vector.shape_cast %362 : vector<8xf32> to vector<8x1xf32>
    %364 = vector.broadcast %363 : vector<8x1xf32> to vector<8x8xf32>
    %365 = arith.subf %361, %364 : vector<8x8xf32>
    %366 = math.exp %365 : vector<8x8xf32>
    %cst_158 = arith.constant dense<0.000000e+00> : vector<8xf32>
    %367 = vector.multi_reduction <add>, %366, %cst_158 [1] : vector<8x8xf32> to vector<8xf32>
    %368 = vector.shape_cast %367 : vector<8xf32> to vector<8x1xf32>
    %369 = tpu.reciprocal %368 {approx = true} : vector<8x1xf32> -> vector<8x1xf32>
    %370 = vector.broadcast %369 : vector<8x1xf32> to vector<8x8xf32>
    %371 = arith.mulf %366, %370 : vector<8x8xf32>
    %cst_159 = arith.constant dense<0.000000e+00> : vector<8x8xf32>
    %372 = tpu.matmul %371, %357, %cst_159 {dimension_numbers = #tpu.dot_dimension_numbers<[1], [0], [0], [1], [0, 0, 1, 1], [], []>} : vector<8x8xf32>, vector<8x8xf32>, vector<8x8xf32> -> vector<8x8xf32>
    %373 = vector.extract_strided_slice %316 {offsets = [0, 24], sizes = [8, 8], strides = [1, 1]} : vector<8x32xf32> to vector<8x8xf32>
    %374 = vector.extract_strided_slice %317 {offsets = [0, 24], sizes = [8, 8], strides = [1, 1]} : vector<8x32xf32> to vector<8x8xf32>
    %375 = vector.extract_strided_slice %318 {offsets = [0, 24], sizes = [8, 8], strides = [1, 1]} : vector<8x32xf32> to vector<8x8xf32>
    %376 = tpu.transpose %374, [1, 0] : vector<8x8xf32> -> vector<8x8xf32>
    %cst_160 = arith.constant dense<0.000000e+00> : vector<8x8xf32>
    %377 = tpu.matmul %373, %376, %cst_160 {dimension_numbers = #tpu.dot_dimension_numbers<[1], [0], [0], [1], [0, 0, 1, 1], [], []>} : vector<8x8xf32>, vector<8x8xf32>, vector<8x8xf32> -> vector<8x8xf32>
    %cst_161 = arith.constant 0.353553385 : f32
    %378 = vector.broadcast %cst_161 : f32 to vector<8x8xf32>
    %379 = arith.mulf %377, %378 : vector<8x8xf32>
    %cst_162 = arith.constant dense<0xFF800000> : vector<8xf32>
    %380 = vector.multi_reduction <maximumf>, %379, %cst_162 [1] : vector<8x8xf32> to vector<8xf32>
    %381 = vector.shape_cast %380 : vector<8xf32> to vector<8x1xf32>
    %382 = vector.broadcast %381 : vector<8x1xf32> to vector<8x8xf32>
    %383 = arith.subf %379, %382 : vector<8x8xf32>
    %384 = math.exp %383 : vector<8x8xf32>
    %cst_163 = arith.constant dense<0.000000e+00> : vector<8xf32>
    %385 = vector.multi_reduction <add>, %384, %cst_163 [1] : vector<8x8xf32> to vector<8xf32>
    %386 = vector.shape_cast %385 : vector<8xf32> to vector<8x1xf32>
    %387 = tpu.reciprocal %386 {approx = true} : vector<8x1xf32> -> vector<8x1xf32>
    %388 = vector.broadcast %387 : vector<8x1xf32> to vector<8x8xf32>
    %389 = arith.mulf %384, %388 : vector<8x8xf32>
    %cst_164 = arith.constant dense<0.000000e+00> : vector<8x8xf32>
    %390 = tpu.matmul %389, %375, %cst_164 {dimension_numbers = #tpu.dot_dimension_numbers<[1], [0], [0], [1], [0, 0, 1, 1], [], []>} : vector<8x8xf32>, vector<8x8xf32>, vector<8x8xf32> -> vector<8x8xf32>
    %391 = tpu.concatenate %336, %354, %372, %390 in 1 : vector<8x8xf32>, vector<8x8xf32>, vector<8x8xf32>, vector<8x8xf32> -> vector<8x32xf32>
    %c1_165 = arith.constant 1 : index
    %c0_166 = arith.constant 0 : index
    %c0_167 = arith.constant 0 : index
    %392 = vector.load %arg7[%c1_165, %c0_166, %c0_167] : memref<2x32x32xf32, #tpu.memory_space<vmem>>, vector<1x32x32xf32>
    %393 = vector.shape_cast %392 : vector<1x32x32xf32> to vector<32x32xf32>
    %cst_168 = arith.constant dense<0.000000e+00> : vector<8x32xf32>
    %394 = tpu.matmul %391, %393, %cst_168 {dimension_numbers = #tpu.dot_dimension_numbers<[1], [0], [0], [1], [0, 0, 1, 1], [], []>} : vector<8x32xf32>, vector<32x32xf32>, vector<8x32xf32> -> vector<8x32xf32>
    %395 = arith.addf %283, %394 : vector<8x32xf32>
    %c1_169 = arith.constant 1 : index
    %c0_170 = arith.constant 0 : index
    %c0_171 = arith.constant 0 : index
    %396 = vector.load %arg8[%c1_169, %c0_170, %c0_171] : memref<2x1x32xf32, #tpu.memory_space<vmem>>, vector<1x1x32xf32>
    %397 = vector.shape_cast %396 : vector<1x1x32xf32> to vector<1x32xf32>
    %398 = vector.broadcast %397 : vector<1x32xf32> to vector<8x32xf32>
    %399 = arith.addf %395, %398 : vector<8x32xf32>
    %c1_172 = arith.constant 1 : index
    %c1_173 = arith.constant 1 : index
    %c0_174 = arith.constant 0 : index
    %c0_175 = arith.constant 0 : index
    %400 = vector.load %arg3[%c1_172, %c1_173, %c0_174, %c0_175] : memref<2x3x1x32xf32, #tpu.memory_space<vmem>>, vector<1x1x1x32xf32>
    %401 = vector.shape_cast %400 : vector<1x1x1x32xf32> to vector<1x32xf32>
    %c1_176 = arith.constant 1 : index
    %c1_177 = arith.constant 1 : index
    %c0_178 = arith.constant 0 : index
    %c0_179 = arith.constant 0 : index
    %402 = vector.load %arg4[%c1_176, %c1_177, %c0_178, %c0_179] : memref<2x3x1x32xf32, #tpu.memory_space<vmem>>, vector<1x1x1x32xf32>
    %403 = vector.shape_cast %402 : vector<1x1x1x32xf32> to vector<1x32xf32>
    %cst_180 = arith.constant dense<0.000000e+00> : vector<8xf32>
    %404 = vector.multi_reduction <add>, %399, %cst_180 [1] : vector<8x32xf32> to vector<8xf32>
    %405 = vector.shape_cast %404 : vector<8xf32> to vector<8x1xf32>
    %cst_181 = arith.constant 3.200000e+01 : f32
    %406 = vector.broadcast %cst_181 : f32 to vector<8x1xf32>
    %407 = arith.divf %405, %406 : vector<8x1xf32>
    %408 = vector.broadcast %407 : vector<8x1xf32> to vector<8x32xf32>
    %409 = arith.subf %399, %408 : vector<8x32xf32>
    %410 = arith.mulf %409, %409 : vector<8x32xf32>
    %cst_182 = arith.constant dense<0.000000e+00> : vector<8xf32>
    %411 = vector.multi_reduction <add>, %410, %cst_182 [1] : vector<8x32xf32> to vector<8xf32>
    %412 = vector.shape_cast %411 : vector<8xf32> to vector<8x1xf32>
    %cst_183 = arith.constant 3.100000e+01 : f32
    %413 = vector.broadcast %cst_183 : f32 to vector<8x1xf32>
    %414 = arith.divf %412, %413 : vector<8x1xf32>
    %415 = math.sqrt %414 : vector<8x1xf32>
    %cst_184 = arith.constant 9.99999997E-7 : f32
    %416 = vector.broadcast %cst_184 : f32 to vector<8x1xf32>
    %417 = arith.addf %415, %416 : vector<8x1xf32>
    %418 = tpu.reciprocal %417 {approx = true} : vector<8x1xf32> -> vector<8x1xf32>
    %419 = vector.broadcast %401 : vector<1x32xf32> to vector<8x32xf32>
    %420 = arith.mulf %419, %409 : vector<8x32xf32>
    %421 = vector.broadcast %418 : vector<8x1xf32> to vector<8x32xf32>
    %422 = arith.mulf %420, %421 : vector<8x32xf32>
    %423 = vector.broadcast %403 : vector<1x32xf32> to vector<8x32xf32>
    %424 = arith.addf %422, %423 : vector<8x32xf32>
    %c1_185 = arith.constant 1 : index
    %c0_186 = arith.constant 0 : index
    %c0_187 = arith.constant 0 : index
    %425 = vector.load %arg9[%c1_185, %c0_186, %c0_187] : memref<2x32x96xf32, #tpu.memory_space<vmem>>, vector<1x32x96xf32>
    %426 = vector.shape_cast %425 : vector<1x32x96xf32> to vector<32x96xf32>
    %c1_188 = arith.constant 1 : index
    %c0_189 = arith.constant 0 : index
    %c0_190 = arith.constant 0 : index
    %427 = vector.load %arg10[%c1_188, %c0_189, %c0_190] : memref<2x1x96xf32, #tpu.memory_space<vmem>>, vector<1x1x96xf32>
    %428 = vector.shape_cast %427 : vector<1x1x96xf32> to vector<1x96xf32>
    %429 = vector.extract_strided_slice %426 {offsets = [0, 0], sizes = [32, 32], strides = [1, 1]} : vector<32x96xf32> to vector<32x32xf32>
    %cst_191 = arith.constant dense<0.000000e+00> : vector<8x32xf32>
    %430 = tpu.matmul %424, %429, %cst_191 {dimension_numbers = #tpu.dot_dimension_numbers<[1], [0], [0], [1], [0, 0, 1, 1], [], []>} : vector<8x32xf32>, vector<32x32xf32>, vector<8x32xf32> -> vector<8x32xf32>
    %431 = vector.extract_strided_slice %428 {offsets = [0, 0], sizes = [1, 32], strides = [1, 1]} : vector<1x96xf32> to vector<1x32xf32>
    %432 = vector.broadcast %431 : vector<1x32xf32> to vector<8x32xf32>
    %433 = arith.addf %430, %432 : vector<8x32xf32>
    %434 = vector.extract_strided_slice %426 {offsets = [0, 32], sizes = [32, 64], strides = [1, 1]} : vector<32x96xf32> to vector<32x64xf32>
    %cst_192 = arith.constant dense<0.000000e+00> : vector<8x64xf32>
    %435 = tpu.matmul %3, %434, %cst_192 {dimension_numbers = #tpu.dot_dimension_numbers<[1], [0], [0], [1], [0, 0, 1, 1], [], []>} : vector<8x32xf32>, vector<32x64xf32>, vector<8x64xf32> -> vector<8x64xf32>
    %436 = vector.extract_strided_slice %428 {offsets = [0, 32], sizes = [1, 64], strides = [1, 1]} : vector<1x96xf32> to vector<1x64xf32>
    %437 = vector.broadcast %436 : vector<1x64xf32> to vector<8x64xf32>
    %438 = arith.addf %435, %437 : vector<8x64xf32>
    %439 = vector.extract_strided_slice %438 {offsets = [0, 0], sizes = [8, 32], strides = [1, 1]} : vector<8x64xf32> to vector<8x32xf32>
    %440 = vector.extract_strided_slice %438 {offsets = [0, 32], sizes = [8, 32], strides = [1, 1]} : vector<8x64xf32> to vector<8x32xf32>
    %441 = vector.extract_strided_slice %433 {offsets = [0, 0], sizes = [8, 8], strides = [1, 1]} : vector<8x32xf32> to vector<8x8xf32>
    %442 = vector.extract_strided_slice %439 {offsets = [0, 0], sizes = [8, 8], strides = [1, 1]} : vector<8x32xf32> to vector<8x8xf32>
    %443 = vector.extract_strided_slice %440 {offsets = [0, 0], sizes = [8, 8], strides = [1, 1]} : vector<8x32xf32> to vector<8x8xf32>
    %444 = tpu.transpose %442, [1, 0] : vector<8x8xf32> -> vector<8x8xf32>
    %cst_193 = arith.constant dense<0.000000e+00> : vector<8x8xf32>
    %445 = tpu.matmul %441, %444, %cst_193 {dimension_numbers = #tpu.dot_dimension_numbers<[1], [0], [0], [1], [0, 0, 1, 1], [], []>} : vector<8x8xf32>, vector<8x8xf32>, vector<8x8xf32> -> vector<8x8xf32>
    %cst_194 = arith.constant 0.353553385 : f32
    %446 = vector.broadcast %cst_194 : f32 to vector<8x8xf32>
    %447 = arith.mulf %445, %446 : vector<8x8xf32>
    %cst_195 = arith.constant dense<0xFF800000> : vector<8xf32>
    %448 = vector.multi_reduction <maximumf>, %447, %cst_195 [1] : vector<8x8xf32> to vector<8xf32>
    %449 = vector.shape_cast %448 : vector<8xf32> to vector<8x1xf32>
    %450 = vector.broadcast %449 : vector<8x1xf32> to vector<8x8xf32>
    %451 = arith.subf %447, %450 : vector<8x8xf32>
    %452 = math.exp %451 : vector<8x8xf32>
    %cst_196 = arith.constant dense<0.000000e+00> : vector<8xf32>
    %453 = vector.multi_reduction <add>, %452, %cst_196 [1] : vector<8x8xf32> to vector<8xf32>
    %454 = vector.shape_cast %453 : vector<8xf32> to vector<8x1xf32>
    %455 = tpu.reciprocal %454 {approx = true} : vector<8x1xf32> -> vector<8x1xf32>
    %456 = vector.broadcast %455 : vector<8x1xf32> to vector<8x8xf32>
    %457 = arith.mulf %452, %456 : vector<8x8xf32>
    %cst_197 = arith.constant dense<0.000000e+00> : vector<8x8xf32>
    %458 = tpu.matmul %457, %443, %cst_197 {dimension_numbers = #tpu.dot_dimension_numbers<[1], [0], [0], [1], [0, 0, 1, 1], [], []>} : vector<8x8xf32>, vector<8x8xf32>, vector<8x8xf32> -> vector<8x8xf32>
    %459 = vector.extract_strided_slice %433 {offsets = [0, 8], sizes = [8, 8], strides = [1, 1]} : vector<8x32xf32> to vector<8x8xf32>
    %460 = vector.extract_strided_slice %439 {offsets = [0, 8], sizes = [8, 8], strides = [1, 1]} : vector<8x32xf32> to vector<8x8xf32>
    %461 = vector.extract_strided_slice %440 {offsets = [0, 8], sizes = [8, 8], strides = [1, 1]} : vector<8x32xf32> to vector<8x8xf32>
    %462 = tpu.transpose %460, [1, 0] : vector<8x8xf32> -> vector<8x8xf32>
    %cst_198 = arith.constant dense<0.000000e+00> : vector<8x8xf32>
    %463 = tpu.matmul %459, %462, %cst_198 {dimension_numbers = #tpu.dot_dimension_numbers<[1], [0], [0], [1], [0, 0, 1, 1], [], []>} : vector<8x8xf32>, vector<8x8xf32>, vector<8x8xf32> -> vector<8x8xf32>
    %cst_199 = arith.constant 0.353553385 : f32
    %464 = vector.broadcast %cst_199 : f32 to vector<8x8xf32>
    %465 = arith.mulf %463, %464 : vector<8x8xf32>
    %cst_200 = arith.constant dense<0xFF800000> : vector<8xf32>
    %466 = vector.multi_reduction <maximumf>, %465, %cst_200 [1] : vector<8x8xf32> to vector<8xf32>
    %467 = vector.shape_cast %466 : vector<8xf32> to vector<8x1xf32>
    %468 = vector.broadcast %467 : vector<8x1xf32> to vector<8x8xf32>
    %469 = arith.subf %465, %468 : vector<8x8xf32>
    %470 = math.exp %469 : vector<8x8xf32>
    %cst_201 = arith.constant dense<0.000000e+00> : vector<8xf32>
    %471 = vector.multi_reduction <add>, %470, %cst_201 [1] : vector<8x8xf32> to vector<8xf32>
    %472 = vector.shape_cast %471 : vector<8xf32> to vector<8x1xf32>
    %473 = tpu.reciprocal %472 {approx = true} : vector<8x1xf32> -> vector<8x1xf32>
    %474 = vector.broadcast %473 : vector<8x1xf32> to vector<8x8xf32>
    %475 = arith.mulf %470, %474 : vector<8x8xf32>
    %cst_202 = arith.constant dense<0.000000e+00> : vector<8x8xf32>
    %476 = tpu.matmul %475, %461, %cst_202 {dimension_numbers = #tpu.dot_dimension_numbers<[1], [0], [0], [1], [0, 0, 1, 1], [], []>} : vector<8x8xf32>, vector<8x8xf32>, vector<8x8xf32> -> vector<8x8xf32>
    %477 = vector.extract_strided_slice %433 {offsets = [0, 16], sizes = [8, 8], strides = [1, 1]} : vector<8x32xf32> to vector<8x8xf32>
    %478 = vector.extract_strided_slice %439 {offsets = [0, 16], sizes = [8, 8], strides = [1, 1]} : vector<8x32xf32> to vector<8x8xf32>
    %479 = vector.extract_strided_slice %440 {offsets = [0, 16], sizes = [8, 8], strides = [1, 1]} : vector<8x32xf32> to vector<8x8xf32>
    %480 = tpu.transpose %478, [1, 0] : vector<8x8xf32> -> vector<8x8xf32>
    %cst_203 = arith.constant dense<0.000000e+00> : vector<8x8xf32>
    %481 = tpu.matmul %477, %480, %cst_203 {dimension_numbers = #tpu.dot_dimension_numbers<[1], [0], [0], [1], [0, 0, 1, 1], [], []>} : vector<8x8xf32>, vector<8x8xf32>, vector<8x8xf32> -> vector<8x8xf32>
    %cst_204 = arith.constant 0.353553385 : f32
    %482 = vector.broadcast %cst_204 : f32 to vector<8x8xf32>
    %483 = arith.mulf %481, %482 : vector<8x8xf32>
    %cst_205 = arith.constant dense<0xFF800000> : vector<8xf32>
    %484 = vector.multi_reduction <maximumf>, %483, %cst_205 [1] : vector<8x8xf32> to vector<8xf32>
    %485 = vector.shape_cast %484 : vector<8xf32> to vector<8x1xf32>
    %486 = vector.broadcast %485 : vector<8x1xf32> to vector<8x8xf32>
    %487 = arith.subf %483, %486 : vector<8x8xf32>
    %488 = math.exp %487 : vector<8x8xf32>
    %cst_206 = arith.constant dense<0.000000e+00> : vector<8xf32>
    %489 = vector.multi_reduction <add>, %488, %cst_206 [1] : vector<8x8xf32> to vector<8xf32>
    %490 = vector.shape_cast %489 : vector<8xf32> to vector<8x1xf32>
    %491 = tpu.reciprocal %490 {approx = true} : vector<8x1xf32> -> vector<8x1xf32>
    %492 = vector.broadcast %491 : vector<8x1xf32> to vector<8x8xf32>
    %493 = arith.mulf %488, %492 : vector<8x8xf32>
    %cst_207 = arith.constant dense<0.000000e+00> : vector<8x8xf32>
    %494 = tpu.matmul %493, %479, %cst_207 {dimension_numbers = #tpu.dot_dimension_numbers<[1], [0], [0], [1], [0, 0, 1, 1], [], []>} : vector<8x8xf32>, vector<8x8xf32>, vector<8x8xf32> -> vector<8x8xf32>
    %495 = vector.extract_strided_slice %433 {offsets = [0, 24], sizes = [8, 8], strides = [1, 1]} : vector<8x32xf32> to vector<8x8xf32>
    %496 = vector.extract_strided_slice %439 {offsets = [0, 24], sizes = [8, 8], strides = [1, 1]} : vector<8x32xf32> to vector<8x8xf32>
    %497 = vector.extract_strided_slice %440 {offsets = [0, 24], sizes = [8, 8], strides = [1, 1]} : vector<8x32xf32> to vector<8x8xf32>
    %498 = tpu.transpose %496, [1, 0] : vector<8x8xf32> -> vector<8x8xf32>
    %cst_208 = arith.constant dense<0.000000e+00> : vector<8x8xf32>
    %499 = tpu.matmul %495, %498, %cst_208 {dimension_numbers = #tpu.dot_dimension_numbers<[1], [0], [0], [1], [0, 0, 1, 1], [], []>} : vector<8x8xf32>, vector<8x8xf32>, vector<8x8xf32> -> vector<8x8xf32>
    %cst_209 = arith.constant 0.353553385 : f32
    %500 = vector.broadcast %cst_209 : f32 to vector<8x8xf32>
    %501 = arith.mulf %499, %500 : vector<8x8xf32>
    %cst_210 = arith.constant dense<0xFF800000> : vector<8xf32>
    %502 = vector.multi_reduction <maximumf>, %501, %cst_210 [1] : vector<8x8xf32> to vector<8xf32>
    %503 = vector.shape_cast %502 : vector<8xf32> to vector<8x1xf32>
    %504 = vector.broadcast %503 : vector<8x1xf32> to vector<8x8xf32>
    %505 = arith.subf %501, %504 : vector<8x8xf32>
    %506 = math.exp %505 : vector<8x8xf32>
    %cst_211 = arith.constant dense<0.000000e+00> : vector<8xf32>
    %507 = vector.multi_reduction <add>, %506, %cst_211 [1] : vector<8x8xf32> to vector<8xf32>
    %508 = vector.shape_cast %507 : vector<8xf32> to vector<8x1xf32>
    %509 = tpu.reciprocal %508 {approx = true} : vector<8x1xf32> -> vector<8x1xf32>
    %510 = vector.broadcast %509 : vector<8x1xf32> to vector<8x8xf32>
    %511 = arith.mulf %506, %510 : vector<8x8xf32>
    %cst_212 = arith.constant dense<0.000000e+00> : vector<8x8xf32>
    %512 = tpu.matmul %511, %497, %cst_212 {dimension_numbers = #tpu.dot_dimension_numbers<[1], [0], [0], [1], [0, 0, 1, 1], [], []>} : vector<8x8xf32>, vector<8x8xf32>, vector<8x8xf32> -> vector<8x8xf32>
    %513 = tpu.concatenate %458, %476, %494, %512 in 1 : vector<8x8xf32>, vector<8x8xf32>, vector<8x8xf32>, vector<8x8xf32> -> vector<8x32xf32>
    %c1_213 = arith.constant 1 : index
    %c0_214 = arith.constant 0 : index
    %c0_215 = arith.constant 0 : index
    %514 = vector.load %arg11[%c1_213, %c0_214, %c0_215] : memref<2x32x32xf32, #tpu.memory_space<vmem>>, vector<1x32x32xf32>
    %515 = vector.shape_cast %514 : vector<1x32x32xf32> to vector<32x32xf32>
    %cst_216 = arith.constant dense<0.000000e+00> : vector<8x32xf32>
    %516 = tpu.matmul %513, %515, %cst_216 {dimension_numbers = #tpu.dot_dimension_numbers<[1], [0], [0], [1], [0, 0, 1, 1], [], []>} : vector<8x32xf32>, vector<32x32xf32>, vector<8x32xf32> -> vector<8x32xf32>
    %517 = arith.addf %399, %516 : vector<8x32xf32>
    %c1_217 = arith.constant 1 : index
    %c0_218 = arith.constant 0 : index
    %c0_219 = arith.constant 0 : index
    %518 = vector.load %arg12[%c1_217, %c0_218, %c0_219] : memref<2x1x32xf32, #tpu.memory_space<vmem>>, vector<1x1x32xf32>
    %519 = vector.shape_cast %518 : vector<1x1x32xf32> to vector<1x32xf32>
    %520 = vector.broadcast %519 : vector<1x32xf32> to vector<8x32xf32>
    %521 = arith.addf %517, %520 : vector<8x32xf32>
    %c1_220 = arith.constant 1 : index
    %c2_221 = arith.constant 2 : index
    %c0_222 = arith.constant 0 : index
    %c0_223 = arith.constant 0 : index
    %522 = vector.load %arg3[%c1_220, %c2_221, %c0_222, %c0_223] : memref<2x3x1x32xf32, #tpu.memory_space<vmem>>, vector<1x1x1x32xf32>
    %523 = vector.shape_cast %522 : vector<1x1x1x32xf32> to vector<1x32xf32>
    %c1_224 = arith.constant 1 : index
    %c2_225 = arith.constant 2 : index
    %c0_226 = arith.constant 0 : index
    %c0_227 = arith.constant 0 : index
    %524 = vector.load %arg4[%c1_224, %c2_225, %c0_226, %c0_227] : memref<2x3x1x32xf32, #tpu.memory_space<vmem>>, vector<1x1x1x32xf32>
    %525 = vector.shape_cast %524 : vector<1x1x1x32xf32> to vector<1x32xf32>
    %cst_228 = arith.constant dense<0.000000e+00> : vector<8xf32>
    %526 = vector.multi_reduction <add>, %521, %cst_228 [1] : vector<8x32xf32> to vector<8xf32>
    %527 = vector.shape_cast %526 : vector<8xf32> to vector<8x1xf32>
    %cst_229 = arith.constant 3.200000e+01 : f32
    %528 = vector.broadcast %cst_229 : f32 to vector<8x1xf32>
    %529 = arith.divf %527, %528 : vector<8x1xf32>
    %530 = vector.broadcast %529 : vector<8x1xf32> to vector<8x32xf32>
    %531 = arith.subf %521, %530 : vector<8x32xf32>
    %532 = arith.mulf %531, %531 : vector<8x32xf32>
    %cst_230 = arith.constant dense<0.000000e+00> : vector<8xf32>
    %533 = vector.multi_reduction <add>, %532, %cst_230 [1] : vector<8x32xf32> to vector<8xf32>
    %534 = vector.shape_cast %533 : vector<8xf32> to vector<8x1xf32>
    %cst_231 = arith.constant 3.100000e+01 : f32
    %535 = vector.broadcast %cst_231 : f32 to vector<8x1xf32>
    %536 = arith.divf %534, %535 : vector<8x1xf32>
    %537 = math.sqrt %536 : vector<8x1xf32>
    %cst_232 = arith.constant 9.99999997E-7 : f32
    %538 = vector.broadcast %cst_232 : f32 to vector<8x1xf32>
    %539 = arith.addf %537, %538 : vector<8x1xf32>
    %540 = tpu.reciprocal %539 {approx = true} : vector<8x1xf32> -> vector<8x1xf32>
    %541 = vector.broadcast %523 : vector<1x32xf32> to vector<8x32xf32>
    %542 = arith.mulf %541, %531 : vector<8x32xf32>
    %543 = vector.broadcast %540 : vector<8x1xf32> to vector<8x32xf32>
    %544 = arith.mulf %542, %543 : vector<8x32xf32>
    %545 = vector.broadcast %525 : vector<1x32xf32> to vector<8x32xf32>
    %546 = arith.addf %544, %545 : vector<8x32xf32>
    %c1_233 = arith.constant 1 : index
    %c0_234 = arith.constant 0 : index
    %c0_235 = arith.constant 0 : index
    %547 = vector.load %arg13[%c1_233, %c0_234, %c0_235] : memref<2x32x64xf32, #tpu.memory_space<vmem>>, vector<1x32x64xf32>
    %548 = vector.shape_cast %547 : vector<1x32x64xf32> to vector<32x64xf32>
    %cst_236 = arith.constant dense<0.000000e+00> : vector<8x64xf32>
    %549 = tpu.matmul %546, %548, %cst_236 {dimension_numbers = #tpu.dot_dimension_numbers<[1], [0], [0], [1], [0, 0, 1, 1], [], []>} : vector<8x32xf32>, vector<32x64xf32>, vector<8x64xf32> -> vector<8x64xf32>
    %c1_237 = arith.constant 1 : index
    %c0_238 = arith.constant 0 : index
    %c0_239 = arith.constant 0 : index
    %550 = vector.load %arg14[%c1_237, %c0_238, %c0_239] : memref<2x1x64xf32, #tpu.memory_space<vmem>>, vector<1x1x64xf32>
    %551 = vector.shape_cast %550 : vector<1x1x64xf32> to vector<1x64xf32>
    %552 = vector.broadcast %551 : vector<1x64xf32> to vector<8x64xf32>
    %553 = arith.addf %549, %552 : vector<8x64xf32>
    %cst_240 = arith.constant 0.000000e+00 : f32
    %554 = vector.broadcast %cst_240 : f32 to vector<8x64xf32>
    %555 = arith.maximumf %553, %554 : vector<8x64xf32>
    %c1_241 = arith.constant 1 : index
    %c0_242 = arith.constant 0 : index
    %c0_243 = arith.constant 0 : index
    %556 = vector.load %arg15[%c1_241, %c0_242, %c0_243] : memref<2x64x32xf32, #tpu.memory_space<vmem>>, vector<1x64x32xf32>
    %557 = vector.shape_cast %556 : vector<1x64x32xf32> to vector<64x32xf32>
    %cst_244 = arith.constant dense<0.000000e+00> : vector<8x32xf32>
    %558 = tpu.matmul %555, %557, %cst_244 {dimension_numbers = #tpu.dot_dimension_numbers<[1], [0], [0], [1], [0, 0, 1, 1], [], []>} : vector<8x64xf32>, vector<64x32xf32>, vector<8x32xf32> -> vector<8x32xf32>
    %559 = arith.addf %521, %558 : vector<8x32xf32>
    %c1_245 = arith.constant 1 : index
    %c0_246 = arith.constant 0 : index
    %c0_247 = arith.constant 0 : index
    %560 = vector.load %arg16[%c1_245, %c0_246, %c0_247] : memref<2x1x32xf32, #tpu.memory_space<vmem>>, vector<1x1x32xf32>
    %561 = vector.shape_cast %560 : vector<1x1x32xf32> to vector<1x32xf32>
    %562 = vector.broadcast %561 : vector<1x32xf32> to vector<8x32xf32>
    %563 = arith.addf %559, %562 : vector<8x32xf32>
    %c0_248 = arith.constant 0 : index
    %c0_249 = arith.constant 0 : index
    %564 = vector.load %arg17[%c0_248, %c0_249] : memref<1x32xf32, #tpu.memory_space<vmem>>, vector<1x32xf32>
    %c0_250 = arith.constant 0 : index
    %c0_251 = arith.constant 0 : index
    %565 = vector.load %arg18[%c0_250, %c0_251] : memref<1x32xf32, #tpu.memory_space<vmem>>, vector<1x32xf32>
    %cst_252 = arith.constant dense<0.000000e+00> : vector<8xf32>
    %566 = vector.multi_reduction <add>, %563, %cst_252 [1] : vector<8x32xf32> to vector<8xf32>
    %567 = vector.shape_cast %566 : vector<8xf32> to vector<8x1xf32>
    %cst_253 = arith.constant 3.200000e+01 : f32
    %568 = vector.broadcast %cst_253 : f32 to vector<8x1xf32>
    %569 = arith.divf %567, %568 : vector<8x1xf32>
    %570 = vector.broadcast %569 : vector<8x1xf32> to vector<8x32xf32>
    %571 = arith.subf %563, %570 : vector<8x32xf32>
    %572 = arith.mulf %571, %571 : vector<8x32xf32>
    %cst_254 = arith.constant dense<0.000000e+00> : vector<8xf32>
    %573 = vector.multi_reduction <add>, %572, %cst_254 [1] : vector<8x32xf32> to vector<8xf32>
    %574 = vector.shape_cast %573 : vector<8xf32> to vector<8x1xf32>
    %cst_255 = arith.constant 3.100000e+01 : f32
    %575 = vector.broadcast %cst_255 : f32 to vector<8x1xf32>
    %576 = arith.divf %574, %575 : vector<8x1xf32>
    %577 = math.sqrt %576 : vector<8x1xf32>
    %cst_256 = arith.constant 9.99999997E-7 : f32
    %578 = vector.broadcast %cst_256 : f32 to vector<8x1xf32>
    %579 = arith.addf %577, %578 : vector<8x1xf32>
    %580 = tpu.reciprocal %579 {approx = true} : vector<8x1xf32> -> vector<8x1xf32>
    %581 = vector.broadcast %564 : vector<1x32xf32> to vector<8x32xf32>
    %582 = arith.mulf %581, %571 : vector<8x32xf32>
    %583 = vector.broadcast %580 : vector<8x1xf32> to vector<8x32xf32>
    %584 = arith.mulf %582, %583 : vector<8x32xf32>
    %585 = vector.broadcast %565 : vector<1x32xf32> to vector<8x32xf32>
    %586 = arith.addf %584, %585 : vector<8x32xf32>
    %c0_257 = arith.constant 0 : index
    %c0_258 = arith.constant 0 : index
    %c0_259 = arith.constant 0 : index
    %587 = vector.load %arg19[%c0_257, %c0_258, %c0_259] : memref<1x8x32xf32, #tpu.memory_space<vmem>>, vector<1x8x32xf32>
    %588 = vector.shape_cast %587 : vector<1x8x32xf32> to vector<8x32xf32>
    %589 = vector.shape_cast %586 : vector<8x32xf32> to vector<1x8x32xf32>
    tpu.vector_store %arg19[%c0_257, %c0_258, %c0_259], %589 {strides = array<i32>} : memref<1x8x32xf32, #tpu.memory_space<vmem>>, vector<1x8x32xf32>,
    return
  }
  func.func @transform_0(%arg0: i32) -> (i32, i32, i32) {
    %c0_i32 = arith.constant 0 : i32
    %c0_i32_0 = arith.constant 0 : i32
    %c0_i32_1 = arith.constant 0 : i32
    return %arg0, %c0_i32, %c0_i32_0 : i32, i32, i32
  }
  func.func @transform_1(%arg0: i32) -> (i32, i32, i32) {
    %c0_i32 = arith.constant 0 : i32
    %c0_i32_0 = arith.constant 0 : i32
    %c0_i32_1 = arith.constant 0 : i32
    return %arg0, %c0_i32, %c0_i32_0 : i32, i32, i32
  }
  func.func @transform_2(%arg0: i32) -> (i32, i32, i32, i32) {
    %c0_i32 = arith.constant 0 : i32
    %c0_i32_0 = arith.constant 0 : i32
    %c0_i32_1 = arith.constant 0 : i32
    %c0_i32_2 = arith.constant 0 : i32
    %c0_i32_3 = arith.constant 0 : i32
    return %c0_i32, %c0_i32_0, %c0_i32_1, %c0_i32_2 : i32, i32, i32, i32
  }
  func.func @transform_3(%arg0: i32) -> (i32, i32, i32, i32) {
    %c0_i32 = arith.constant 0 : i32
    %c0_i32_0 = arith.constant 0 : i32
    %c0_i32_1 = arith.constant 0 : i32
    %c0_i32_2 = arith.constant 0 : i32
    %c0_i32_3 = arith.constant 0 : i32
    return %c0_i32, %c0_i32_0, %c0_i32_1, %c0_i32_2 : i32, i32, i32, i32
  }
  func.func @transform_4(%arg0: i32) -> (i32, i32, i32) {
    %c0_i32 = arith.constant 0 : i32
    %c0_i32_0 = arith.constant 0 : i32
    %c0_i32_1 = arith.constant 0 : i32
    %c0_i32_2 = arith.constant 0 : i32
    return %c0_i32, %c0_i32_0, %c0_i32_1 : i32, i32, i32
  }
  func.func @transform_5(%arg0: i32) -> (i32, i32, i32) {
    %c0_i32 = arith.constant 0 : i32
    %c0_i32_0 = arith.constant 0 : i32
    %c0_i32_1 = arith.constant 0 : i32
    %c0_i32_2 = arith.constant 0 : i32
    return %c0_i32, %c0_i32_0, %c0_i32_1 : i32, i32, i32
  }
  func.func @transform_6(%arg0: i32) -> (i32, i32, i32) {
    %c0_i32 = arith.constant 0 : i32
    %c0_i32_0 = arith.constant 0 : i32
    %c0_i32_1 = arith.constant 0 : i32
    %c0_i32_2 = arith.constant 0 : i32
    return %c0_i32, %c0_i32_0, %c0_i32_1 : i32, i32, i32
  }
  func.func @transform_7(%arg0: i32) -> (i32, i32, i32) {
    %c0_i32 = arith.constant 0 : i32
    %c0_i32_0 = arith.constant 0 : i32
    %c0_i32_1 = arith.constant 0 : i32
    %c0_i32_2 = arith.constant 0 : i32
    return %c0_i32, %c0_i32_0, %c0_i32_1 : i32, i32, i32
  }
  func.func @transform_8(%arg0: i32) -> (i32, i32, i32) {
    %c0_i32 = arith.constant 0 : i32
    %c0_i32_0 = arith.constant 0 : i32
    %c0_i32_1 = arith.constant 0 : i32
    %c0_i32_2 = arith.constant 0 : i32
    return %c0_i32, %c0_i32_0, %c0_i32_1 : i32, i32, i32
  }
  func.func @transform_9(%arg0: i32) -> (i32, i32, i32) {
    %c0_i32 = arith.constant 0 : i32
    %c0_i32_0 = arith.constant 0 : i32
    %c0_i32_1 = arith.constant 0 : i32
    %c0_i32_2 = arith.constant 0 : i32
    return %c0_i32, %c0_i32_0, %c0_i32_1 : i32, i32, i32
  }
  func.func @transform_10(%arg0: i32) -> (i32, i32, i32) {
    %c0_i32 = arith.constant 0 : i32
    %c0_i32_0 = arith.constant 0 : i32
    %c0_i32_1 = arith.constant 0 : i32
    %c0_i32_2 = arith.constant 0 : i32
    return %c0_i32, %c0_i32_0, %c0_i32_1 : i32, i32, i32
  }
  func.func @transform_11(%arg0: i32) -> (i32, i32, i32) {
    %c0_i32 = arith.constant 0 : i32
    %c0_i32_0 = arith.constant 0 : i32
    %c0_i32_1 = arith.constant 0 : i32
    %c0_i32_2 = arith.constant 0 : i32
    return %c0_i32, %c0_i32_0, %c0_i32_1 : i32, i32, i32
  }
  func.func @transform_12(%arg0: i32) -> (i32, i32, i32) {
    %c0_i32 = arith.constant 0 : i32
    %c0_i32_0 = arith.constant 0 : i32
    %c0_i32_1 = arith.constant 0 : i32
    %c0_i32_2 = arith.constant 0 : i32
    return %c0_i32, %c0_i32_0, %c0_i32_1 : i32, i32, i32
  }
  func.func @transform_13(%arg0: i32) -> (i32, i32, i32) {
    %c0_i32 = arith.constant 0 : i32
    %c0_i32_0 = arith.constant 0 : i32
    %c0_i32_1 = arith.constant 0 : i32
    %c0_i32_2 = arith.constant 0 : i32
    return %c0_i32, %c0_i32_0, %c0_i32_1 : i32, i32, i32
  }
  func.func @transform_14(%arg0: i32) -> (i32, i32, i32) {
    %c0_i32 = arith.constant 0 : i32
    %c0_i32_0 = arith.constant 0 : i32
    %c0_i32_1 = arith.constant 0 : i32
    %c0_i32_2 = arith.constant 0 : i32
    return %c0_i32, %c0_i32_0, %c0_i32_1 : i32, i32, i32
  }
  func.func @transform_15(%arg0: i32) -> (i32, i32, i32) {
    %c0_i32 = arith.constant 0 : i32
    %c0_i32_0 = arith.constant 0 : i32
    %c0_i32_1 = arith.constant 0 : i32
    %c0_i32_2 = arith.constant 0 : i32
    return %c0_i32, %c0_i32_0, %c0_i32_1 : i32, i32, i32
  }
  func.func @transform_16(%arg0: i32) -> (i32, i32) {
    %c0_i32 = arith.constant 0 : i32
    %c0_i32_0 = arith.constant 0 : i32
    %c0_i32_1 = arith.constant 0 : i32
    return %c0_i32, %c0_i32_0 : i32, i32
  }
  func.func @transform_17(%arg0: i32) -> (i32, i32) {
    %c0_i32 = arith.constant 0 : i32
    %c0_i32_0 = arith.constant 0 : i32
    %c0_i32_1 = arith.constant 0 : i32
    return %c0_i32, %c0_i32_0 : i32, i32
  }
  func.func @transform_18(%arg0: i32) -> (i32, i32, i32) {
    %c0_i32 = arith.constant 0 : i32
    %c0_i32_0 = arith.constant 0 : i32
    %c0_i32_1 = arith.constant 0 : i32
    return %arg0, %c0_i32, %c0_i32_0 : i32, i32, i32
  }
}

</mosaic_0001>

<bundles_post_ra>
// kernel: decoder_forward.1
= control target key start
LH: loop header
LB: loop body
LE: loop exit
PB: predicated region body
PF: predicated region fallthrough
CT: control target
= control target key end

     0   :  { %s6709_s0 = inlined_call_operand.vmem [shape: f32[2,8,32], index: 0, kind: input, shape index: {}]   ;;  %s6710_s1 = inlined_call_operand.vmem [shape: f32[2,8,32], index: 1, kind: input, shape index: {}]   ;;  %s6711_s2 = inlined_call_operand.vmem [shape: f32[2,3,1,32], index: 2, kind: input, shape index: {}]   ;;  %s6712_s3 = inlined_call_operand.vmem [shape: f32[2,3,1,32], index: 3, kind: input, shape index: {}]   ;;  %s6713_s4 = inlined_call_operand.vmem [shape: f32[2,32,96], index: 4, kind: input, shape index: {}]   ;;  %s6714_s5 = inlined_call_operand.vmem [shape: f32[2,1,96], index: 5, kind: input, shape index: {}]   ;;  %s6715_s6 = inlined_call_operand.vmem [shape: f32[2,32,32], index: 6, kind: input, shape index: {}]   ;;  %s6716_s7 = inlined_call_operand.vmem [shape: f32[2,1,32], index: 7, kind: input, shape index: {}]   ;;  %s6717_s8 = inlined_call_operand.vmem [shape: f32[2,32,96], index: 8, kind: input, shape index: {}]   ;;  %s6718_s9 = inlined_call_operand.vmem [shape: f32[2,1,96], index: 9, kind: input, shape index: {}]   ;;  %s6719_s10 = inlined_call_operand.vmem [shape: f32[2,32,32], index: 10, kind: input, shape index: {}]   ;;  %s6720_s11 = inlined_call_operand.vmem [shape: f32[2,1,32], index: 11, kind: input, shape index: {}]   ;;  %s6721_s12 = inlined_call_operand.vmem [shape: f32[2,32,64], index: 12, kind: input, shape index: {}]   ;;  %s6722_s13 = inlined_call_operand.vmem [shape: f32[2,1,64], index: 13, kind: input, shape index: {}]   ;;  %s6723_s14 = inlined_call_operand.vmem [shape: f32[2,64,32], index: 14, kind: input, shape index: {}]   ;;  %s6724_s15 = inlined_call_operand.vmem [shape: f32[2,1,32], index: 15, kind: input, shape index: {}]   ;;  %s6725_s16 = inlined_call_operand.vmem [shape: f32[1,32], index: 16, kind: input, shape index: {}]   ;;  %s6726_s17 = inlined_call_operand.vmem [shape: f32[1,32], index: 17, kind: input, shape index: {}]   ;;  %s6727_s18 = inlined_call_operand.hbm [shape: f32[2,8,32], index: 18, kind: output, shape index: {}]  }
   0x1   :  { %6766 = sst [smem:[#allocation14_spill]] %s6709_s0 }
   0x2   :  { %6767 = sst [smem:[#allocation15_spill]] %s6710_s1 }
   0x3   :  { %6768 = sst [smem:[#allocation16_spill]] %s6711_s2 }
   0x4   :  { %6769 = sst [smem:[#allocation17_spill]] %s6720_s11 }
   0x5   :  { %6770 = sst [smem:[#allocation18_spill]] %s6721_s12 }
   0x6   :  { %6771 = sst [smem:[#allocation19_spill]] %s6725_s16 }
   0x7   :  { %6772 = sst [smem:[#allocation20_spill]] %s6726_s17 }
   0x8   :  { %6773 = sst [smem:[#allocation21_spill]] %s6727_s18 }
   0x9   :  { %23 = vsyncpa [#allocation3], 0 }
   0xa   :  { %25 = vsyncpa [#allocation3 + $0x1], 0  ;;  %s5934_s27 = smov 0   ;;  %s5936_s28 = smov 0  }
   0xb   :  { %s5938_s29 = smov 0   ;;  %s5940_s30 = smov 0  }
   0xc LB: > { %6774 = sst [smem:[#allocation5_spill]] %s5807_s27  ;;  %s5955_s0 = sadd.s32 4294967295, %s5819_s30   ;;  %s5819_s30 = sphi %s5940_s30, %s6816_s30   ;;  %s5815_s29 = sphi %s5938_s29, %s6819_s29   ;;  %s5811_s28 = sphi %s5936_s28, %s6818_s28   ;;  %s5807_s27 = sphi %s5934_s27, %s6817_s27  }
   0xd   : > { %6775 = sst [smem:[#allocation6_spill]] %s5811_s28  ;;  %s4878_s19 = sadd.s32 4294967294, %s5819_s30  }
   0xe   : > { %6776 = sst [smem:[#allocation7_spill]] %s5815_s29  ;;  %s5959_s1 = sadd.s32 1, %s5819_s30  }
   0xf   : > { %6777 = sst [smem:[#allocation8_spill]] %s5819_s30  ;;  %s426_s20 = sadd.s32 1, %s5815_s29 }
  0x10   : > { %6778 = sst [smem:[#allocation9_spill]] %s5955_s0  ;;  %s423_s21 = ssub.s32 %s5819_s30, %s5959_s1 }
  0x11   : > { %6779 = sst [smem:[#allocation10_spill]] %s5959_s1  ;;  %p436_p0 = scmp.ne.s32.totalorder %s5815_s29, %s5811_s28 }
  0x12   : > { %p424_p1 = scmp.eq.s32.totalorder %s423_s21, 0  ;;  %p437_p2 = scmp.eq.s32.totalorder %s5955_s0, 1 }
  0x13   : > { %p442_p3 = scmp.ne.s32.totalorder %s5811_s28, %s5807_s27  ;;  %p443_p4 = scmp.eq.s32.totalorder %s4878_s19, 1 }
  0x14   : > { %s5970_s22 = scalar_select %p424_p1, %s5815_s29, %s426_s20  }
  0x15   : > { %p5972_p5 = por %p437_p2, %p436_p0  ;;  %p5976_p6 = por %p443_p4, %p442_p3 }
  0x16   : > { %6780 = sst [smem:[#allocation11_spill]] %s5970_s22  ;;  %p4881_p7 = scmp.ge.s32.totalorder %s5819_s30, 1 }
  0x17   : > { %s6781_s2 = scalar_select %p5972_p5, 1, 0 }
  0x18   : > { %s6783_s23 = scalar_select %p5976_p6, 1, 0 }
  0x19   : > { %6782 = sst [smem:[#allocation12_spill]] %s6781_s2  ;;  %p523_p8 = scmp.lt.s32.totalorder %s5819_s30, 3 }
  0x1a   : > { %6784 = sst [smem:[#allocation13_spill]] %s6783_s23 }
  0x1b   : > { %p524_p9 = pnand %p4881_p7, %p523_p8 }
  0x1c   : > { %p580_p10 = scmp.lt.s32.totalorder (!%p524_p9), %s5955_s0, 1  ;;  %vm592_vm0 = vcmask (!%p524_p9), 261120   ;;  %s6785_s20 = sld [smem:[#allocation14_spill]] (!%p524_p9)  ;;  %v629_v7 = vld [vmem:[%s6713_s4] sm:$0xff] (!%p524_p9)  ;;  %v630_v8 = vld [vmem:[%s6713_s4 + $0x8] sm:$0xff] (!%p524_p9)  ;;  %v631_v9 = vld [vmem:[%s6713_s4 + $0x10] sm:$0xff] (!%p524_p9) }
  0x1d   : > { %527 = sbr.rel (%p524_p9) target bundleno = 8856 (0x2298), region = 92  ;;  %v5821_v10 = vmov (!%p524_p9), 0.0|0.0   ;;  %v5494_v11 = vpack.c.bf16 (!%p524_p9), %v630_v8, %v629_v7  ;;  %v632_v12 = vld [vmem:[%s6713_s4 + $0x18] sm:$0xff] (!%p524_p9)  ;;  %vm5822_vm1 = vmmov (!%p524_p9), 0   ;;  %v5823_v13 = vmov (!%p524_p9), 0.0   ;;  %s6786_s22 = sld [smem:[#allocation16_spill]] (!%p524_p9) }
  0x1e   : > { %5493 = vmatprep.subr.bf16.mxu1 (!%p524_p9), %v5821_v10  ;;  %5171 = vmatprep.mubr.msk.f32.mxu1 (!%p524_p9), %vm5822_vm1, %v5823_v13  ;;  %v5497_v14 = vpack.c.bf16 (!%p524_p9), %v632_v12, %v631_v9  ;;  %v4886_v26 = vld [vmem:[%s6712_s3] ss:$0 sm:$0xff] (!%p524_p9)  ;;  %s6749_s29 = smov (!%p524_p9), 96   ;;  %s6733_s1 = smov (!%p524_p9), 88   ;;  %vm716_vm4 = vcmask (!%p524_p9), 64512   ;;  %vm1390_vm5 = vcmask (!%p524_p9), 130048  }
  0x1f   : > { %5184 = vmatprep.subr.mxu0 (!%p524_p9), %v5823_v13  ;;  %5186 = vmatprep.mubr.msk.f32.mxu0 (!%p524_p9), %vm5822_vm1, %v5823_v13  ;;  %v4887_v29 = vld [vmem:[%s6714_s5] ss:$0 sm:$0xff] (!%p524_p9)  ;;  %s6745_s26 = smov (!%p524_p9), 112   ;;  %s6736_s19 = smov (!%p524_p9), 72   ;;  %vm1392_vm6 = vcmask (!%p524_p9), 195584   ;;  %vm2588_vm11 = vcmask (!%p524_p9), 523264  }
  0x20   : > { %5495 = vmatpush3.bf16.msra.mxu1 (!%p524_p9), %v5494_v11  ;;  %s6789_s23 = sld [smem:[#allocation15_spill]] (!%p524_p9)  ;;  %s6797_s27 = smov (!%p524_p9), 16  }
  0x21   : > { %5496 = vmatprep.subr.bf16.mxu1 (!%p524_p9), %v5821_v10  ;;  %s6798_s30 = smov (!%p524_p9), 24   ;;  %s6799_s11 = sld [smem:[#allocation17_spill]] (!%p524_p9) }
  0x22   : > { %s6800_s12 = sld [smem:[#allocation18_spill]] (!%p524_p9)  ;;  %s6803_s16 = smov (!%p524_p9), 40  }
  0x23   : > { %v4885_v23 = vld [vmem:[%s6786_s22] ss:$0 sm:$0xff] (!%p524_p9)  ;;  %s6806_s17 = sld [smem:[#allocation18_spill]] (!%p524_p9)  ;;  %s6811_s18 = sld [smem:[#allocation20_spill]] (!%p524_p9) }
  0x24   : > { %s5984_s24 = scalar_select %p580_p10, %s5955_s0, 1  ;;  %5498 = vmatpush3.bf16.msra.mxu1 %v5497_v14 }
  0x25   : > { %5174 = vmatprep.subr.mxu1 %v5823_v13  ;;  %s6804_s0 = smov 56  }
  0x26   : > { %s6730_s25 = sshll.u32 %s5984_s24, 3 }
  0x27   : > { %s583_s21 = scalar_lea.vmem %s6785_s20, %s6730_s25  ;;  %s6738_s25 = smov 80  }
  0x28   : > { %v5992_v0 = vld [vmem:[%s583_s21] sm:$0xff]  ;;  %s6747_s21 = smov 120   ;;  %s6743_s20 = smov 104  }
  0x29   : > { %v593_v1 = vsel %vm592_vm0, %v5992_v0, 0.0 }
  0x2a   : > { %594 = vadd.xlane.f32.xlu0 %v593_v1 }
  0xb7   : > { %v595_v2 = vpop.xlane.xlu0 %594 }
  0xb8   : > { %v597_v3 = vmul.f32 0.03125, %v595_v2 }
  0xba   : > { %v598_v4 = vsub.f32 %v5992_v0, %v597_v3 }
  0xbc   : > { %v599_v5 = vmul.f32 %v598_v4, %v598_v4  ;;  %v620_v24 = vmul.f32 %v4885_v23, %v598_v4 }
  0xbe   : > { %v600_v6 = vsel %vm592_vm0, %v599_v5, 0.0 }
  0xbf   : > { %601 = vadd.xlane.f32.xlu0 %v600_v6 }
 0x14c   : > { %v602_v15 = vpop.xlane.xlu0 %601 }
 0x14d   : > { %v604_v16 = vmul.f32 0.032258064, %v602_v15 }
 0x14f   : > { %5665 = vrsqrt.f32 %v604_v16  ;;  %vm607_vm2 = vcmp.eq.f32.partialorder %v604_v16, inf  ;;  %v610_v19 = vand.u32 2147483648, %v604_v16  ;;  %vm609_vm3 = vcmp.eq.f32.partialorder %v604_v16, 0.0 }
 0x159   : > { %v5666_v17 = vpop.eup %5665 }
 0x15a   : > { %v606_v18 = vmul.f32 %v5666_v17, %v604_v16 }
 0x15c   : > { %v608_v20 = vsel %vm607_vm2, %v604_v16, %v606_v18 }
 0x15d   : > { %v611_v21 = vsel %vm609_vm3, %v610_v19, %v608_v20 }
 0x15e   : > { %v612_v22 = vadd.f32 1e-06, %v611_v21 }
 0x160   : > { %5667 = vrcp.f32 %v612_v22 }
 0x16a   : > { %v5668_v25 = vpop.eup %5667 }
 0x16b   : > { %v621_v27 = vmul.f32 %v5668_v25, %v620_v24 }
 0x16d   : > { %v628_v28 = vadd.f32 %v4886_v26, %v621_v27 }
 0x16f   : > { %5172 = vmatmul.mubr.msk.f32.vlgmr.msra.gmra.mrb[0].mxu1 %vm592_vm0, %v628_v28 }
 0x170   : > { %5176 = vmatprep.mubr.msk.f32.mxu1 %vm5822_vm1, %v5823_v13 }
 0x242   : > { %v709_v30 = vpop.f32.mrb[0].mxu1 }
 0x243   : > { %v6030_v31 = vadd.f32 %v4887_v29, %v709_v30  ;;  %v5173_v32 = vpop.f32.mrb[1].mxu1 }
 0x244   : > { %v1395_v32 = vld [vmem:[%s6715_s6 + $0x8] sm:$0xff] }
 0x245   : > { %879 = vrot.lane.b32.xlu0 %v6030_v31, %s6747_s21  ;;  %714 = vrot.lane.b32.xlu1 %v6030_v31, %s6749_s29  ;;  %s6752_s21 = smov 24  }
 0x249   : > { %881 = vrot.lane.b32.xlu1 %v6030_v31, %s6733_s1  ;;  %s6735_s1 = smov 64  }
 0x24d   : > { %1047 = vrot.lane.b32.xlu1 %v6030_v31, %s6738_s25  ;;  %s6740_s25 = smov 56  }
 0x251   : > { %1045 = vrot.lane.b32.xlu1 %v6030_v31, %s6745_s26  ;;  %s6787_s26 = smov 96  }
 0x255   : > { %1213 = vrot.lane.b32.xlu1 %v6030_v31, %s6736_s19  ;;  %s6741_s19 = smov 40  }
 0x259   : > { %1211 = vrot.lane.b32.xlu1 %v6030_v31, %s6743_s20  ;;  %s6791_s20 = smov 112  }
 0x2b7   : > { %v715_v33 = vpop.permute.xlu1 %714  ;;  %v880_v35 = vpop.permute.xlu0 %879 }
 0x2b8   : > { %5175 = vmatpush3.xpose.msk.msra.mxu1 %vm716_vm4, %v715_v33 }
 0x2b9   : > { %5179 = vmatprep.subr.mxu1 %v5823_v13 }
 0x2bb   : > { %5177 = vmatmul.mubr.msk.f32.vlgmr.msra.gmra.mrb[2].mxu1 %vm716_vm4, %v6030_v31  ;;  %v882_v34 = vpop.permute.xlu1 %881 }
 0x2bc   : > { %5185 = vmatpush3.xpose.msk.msra.mxu0 %vm716_vm4, %v882_v34  ;;  %5181 = vmatprep.mubr.msk.f32.mxu1 %vm5822_vm1, %v5823_v13 }
 0x2bd   : > { %5194 = vmatprep.subr.mxu0 %v5823_v13 }
 0x2bf   : > { %5187 = vmatmul.mubr.msk.f32.vlgmr.msra.gmra.mrb[0].mxu0 %vm716_vm4, %v880_v35  ;;  %v1048_v36 = vpop.permute.xlu1 %1047 }
 0x2c0   : > { %5195 = vmatpush3.xpose.msk.msra.mxu0 %vm716_vm4, %v1048_v36  ;;  %5196 = vmatprep.mubr.msk.f32.mxu0 %vm5822_vm1, %v5823_v13  ;;  %v1396_v36 = vld [vmem:[%s6715_s6 + $0x10] sm:$0xff] }
 0x2c1   : > { %5204 = vmatprep.subr.mxu0 %v5823_v13 }
 0x2c3   : > { %v1046_v37 = vpop.permute.xlu1 %1045 }
 0x2c4   : > { %5197 = vmatmul.mubr.msk.f32.vlgmr.msra.gmra.mrb[2].mxu0 %vm716_vm4, %v1046_v37  ;;  %v1397_v37 = vld [vmem:[%s6715_s6 + $0x18] sm:$0xff] }
 0x2c5   : > { %5206 = vmatprep.mubr.msk.f32.mxu0 %vm5822_vm1, %v5823_v13 }
 0x2c7   : > { %v1214_v38 = vpop.permute.xlu1 %1213 }
 0x2c8   : > { %5205 = vmatpush3.xpose.msk.msra.mxu0 %vm716_vm4, %v1214_v38  ;;  %v5503_v38 = vpack.c.bf16 %v1397_v37, %v1396_v36 }
 0x2c9   : > { %5499 = vmatprep.subr.bf16.mxu0 %v5821_v10 }
 0x2cb   : > { %v1212_v39 = vpop.permute.xlu1 %1211 }
 0x2cc   : > { %5207 = vmatmul.mubr.msk.f32.vlgmr.msra.gmra.mrb[4].mxu0 %vm716_vm4, %v1212_v39 }
 0x2cd   : > { %5222 = vmatprep.mubr.msk.f32.mxu0 %vm5822_vm1, %v5823_v13 }
 0x38e   : > { %v787_v40 = vpop.f32.mrb[2].mxu1 }
 0x38f   : > { %v791_v41 = vmul.f32 0.35355338, %v787_v40  ;;  %v5178_v42 = vpop.f32.mrb[3].mxu1 }
 0x391   : > { %v792_v43 = vsel %vm716_vm4, %v791_v41, -inf }
 0x392   : > { %v953_v44 = vpop.f32.mrb[0].mxu0  ;;  %793 = vmax.xlane.f32.xlu1 %v792_v43 }
 0x393   : > { %v957_v45 = vmul.f32 0.35355338, %v953_v44  ;;  %v5188_v46 = vpop.f32.mrb[1].mxu0 }
 0x395   : > { %v958_v47 = vsel %vm716_vm4, %v957_v45, -inf }
 0x396   : > { %959 = vmax.xlane.f32.xlu0 %v958_v47 }
 0x397   : > { %v1119_v48 = vpop.f32.mrb[2].mxu0 }
 0x398   : > { %v1123_v49 = vmul.f32 0.35355338, %v1119_v48  ;;  %v5198_v50 = vpop.f32.mrb[3].mxu0 }
 0x39a   : > { %v1124_v51 = vsel %vm716_vm4, %v1123_v49, -inf }
 0x39b   : > { %1125 = vmax.xlane.f32.xlu1 %v1124_v51 }
 0x39f   : > { %v1285_v52 = vpop.f32.mrb[4].mxu0 }
 0x3a0   : > { %v1289_v53 = vmul.f32 0.35355338, %v1285_v52  ;;  %v5208_v54 = vpop.f32.mrb[5].mxu0  ;;  %v4902_v52 = vld [vmem:[%s6716_s7] ss:$0 sm:$0xff] }
 0x3a2   : > { %v1290_v55 = vsel %vm716_vm4, %v1289_v53, -inf }
 0x3a3   : > { %1291 = vmax.xlane.f32.xlu0 %v1290_v55 }
 0x3ac   : > { %803 = vrot.lane.b32.xlu1 %v6030_v31, %s6735_s1  ;;  %s6742_s1 = smov 48  }
 0x41f   : > { %v794_v56 = vpop.xlane.xlu1 %793 }
 0x420   : > { %v795_v57 = vsub.f32 %v791_v41, %v794_v56 }
 0x422   : > { %v796_v58 = vmul.f32 1.442695, %v795_v57  ;;  %v1518_v57 = vld [vmem:[%s6717_s8] sm:$0xff] }
 0x423   : > { %v960_v59 = vpop.xlane.xlu0 %959 }
 0x424   : > { %5669 = vpow2.f32 %v796_v58  ;;  %v961_v60 = vsub.f32 %v957_v45, %v960_v59  ;;  %v1519_v58 = vld [vmem:[%s6717_s8 + $0x8] sm:$0xff] }
 0x425   : > { %v5645_v59 = vpack.i.bf16 %v1519_v58, %v1518_v57 }
 0x426   : > { %v962_v61 = vmul.f32 1.442695, %v961_v60  ;;  %v5506_v60 = vpack.c.bf16 %v1519_v58, %v1518_v57 }
 0x428   : > { %5671 = vpow2.f32 %v962_v61  ;;  %v1126_v62 = vpop.xlane.xlu1 %1125  ;;  %v1521_v61 = vld [vmem:[%s6717_s8 + $0x18] sm:$0xff] }
 0x429   : > { %v1127_v63 = vsub.f32 %v1123_v49, %v1126_v62 }
 0x42b   : > { %v1128_v1 = vmul.f32 1.442695, %v1127_v63 }
 0x42c   : > { %v804_v2 = vpop.permute.xlu1 %803 }
 0x42d   : > { %5673 = vpow2.f32 %v1128_v1  ;;  %5180 = vmatpush3.msra.mxu1 %v804_v2 }
 0x42e   : > { %v5670_v3 = vpop.eup %5669  ;;  %5189 = vmatprep.subr.mxu1 %v5823_v13 }
 0x42f   : > { %v798_v4 = vsel %vm716_vm4, %v5670_v3, 0.0 }
 0x430   : > { %v1292_v5 = vpop.xlane.xlu0 %1291  ;;  %799 = vadd.xlane.f32.xlu1 %v798_v4 }
 0x431   : > { %v1293_v6 = vsub.f32 %v1289_v53, %v1292_v5 }
 0x432   : > { %v5672_v7 = vpop.eup %5671 }
 0x433   : > { %v1294_v8 = vmul.f32 1.442695, %v1293_v6  ;;  %v964_v9 = vsel %vm716_vm4, %v5672_v7, 0.0  ;;  %v4907_v6 = vld [vmem:[%s6718_s9] ss:$0 sm:$0xff] }
 0x434   : > { %965 = vadd.xlane.f32.xlu0 %v964_v9 }
 0x435   : > { %5675 = vpow2.f32 %v1294_v8 }
 0x437   : > { %v5674_v11 = vpop.eup %5673 }
 0x438   : > { %v1130_v12 = vsel %vm716_vm4, %v5674_v11, 0.0 }
 0x439   : > { %1131 = vadd.xlane.f32.xlu1 %v1130_v12 }
 0x43f   : > { %v5676_v14 = vpop.eup %5675 }
 0x440   : > { %v1296_v15 = vsel %vm716_vm4, %v5676_v14, 0.0 }
 0x441   : > { %1297 = vadd.xlane.f32.xlu0 %v1296_v15 }
 0x44a   : > { %1135 = vrot.lane.b32.xlu1 %v6030_v31, %s6742_s1  ;;  %s6756_s1 = smov 8  }
 0x44e   : > { %1301 = vrot.lane.b32.xlu1 %v6030_v31, %s6741_s19  ;;  %s6790_s19 = smov 120  }
 0x457   : > { %969 = vrot.lane.b32.xlu0 %v6030_v31, %s6740_s25  ;;  %v1394_v31 = vld [vmem:[%s6715_s6] sm:$0xff]  ;;  %s6754_s25 = smov 16  }
 0x458   : > { %v5500_v33 = vpack.c.bf16 %v1395_v32, %v1394_v31 }
 0x45a   : > { %5501 = vmatpush3.bf16.msra.mxu0 %v5500_v33 }
 0x45b   : > { %5502 = vmatprep.subr.bf16.mxu0 %v5821_v10 }
 0x45e   : > { %5504 = vmatpush3.bf16.msra.mxu0 %v5503_v38 }
 0x45f   : > { %5511 = vmatprep.subr.bf16.mxu0 %v5821_v10 }
 0x4bd   : > { %v800_v16 = vpop.xlane.xlu1 %799 }
 0x4be   : > { %5677 = vrcp.f32 %v800_v16 }
 0x4c1   : > { %v966_v17 = vpop.xlane.xlu0 %965 }
 0x4c2   : > { %5679 = vrcp.f32 %v966_v17 }
 0x4c6   : > { %v1132_v18 = vpop.xlane.xlu1 %1131 }
 0x4c7   : > { %5681 = vrcp.f32 %v1132_v18 }
 0x4c8   : > { %v5678_v19 = vpop.eup %5677 }
 0x4c9   : > { %v802_v20 = vmul.f32 %v5678_v19, %v5670_v3 }
 0x4ca   : > { %v1136_v24 = vpop.permute.xlu1 %1135 }
 0x4cb   : > { %5182 = vmatmul.mubr.msk.f32.vlgmr.msra.gmra.mrb[4].mxu1 %vm716_vm4, %v802_v20 }
 0x4cc   : > { %5191 = vmatprep.mubr.msk.f32.mxu1 %vm5822_vm1, %v5823_v13  ;;  %v5680_v22 = vpop.eup %5679 }
 0x4cd   : > { %v968_v23 = vmul.f32 %v5680_v22, %v5672_v7 }
 0x4ce   : > { %v1298_v21 = vpop.xlane.xlu0 %1297  ;;  %v1302_v28 = vpop.permute.xlu1 %1301 }
 0x4cf   : > { %5683 = vrcp.f32 %v1298_v21 }
 0x4d1   : > { %v5682_v26 = vpop.eup %5681 }
 0x4d2   : > { %v970_v25 = vpop.permute.xlu0 %969  ;;  %v1134_v27 = vmul.f32 %v5682_v26, %v5674_v11  ;;  %v4905_v26 = vld [vmem:[%s6786_s22 + $0x1] ss:$0 sm:$0xff] }
 0x4d3   : > { %5190 = vmatpush3.msra.mxu1 %v970_v25 }
 0x4d4   : > { %5192 = vmatmul.mubr.msk.f32.vlgmr.msra.gmra.mrb[6].mxu1 %vm716_vm4, %v968_v23  ;;  %5199 = vmatprep.subr.mxu1 %v5823_v13 }
 0x4d5   : > { %5200 = vmatpush3.msra.mxu1 %v1136_v24  ;;  %5201 = vmatprep.mubr.msk.f32.mxu1 %vm5822_vm1, %v5823_v13 }
 0x4d6   : > { %5209 = vmatprep.subr.mxu1 %v5823_v13 }
 0x4d8   : > { %5202 = vmatmul.mubr.msk.f32.vlgmr.msra.gmra.mrb[8].mxu1 %vm716_vm4, %v1134_v27 }
 0x4d9   : > { %v5684_v29 = vpop.eup %5683  ;;  %5210 = vmatpush3.msra.mxu1 %v1302_v28  ;;  %5211 = vmatprep.mubr.msk.f32.mxu1 %vm5822_vm1, %v5823_v13 }
 0x4da   : > { %v1300_v30 = vmul.f32 %v5684_v29, %v5676_v14  ;;  %5505 = vmatprep.subr.bf16.mxu1 %v5821_v10  ;;  %v4906_v29 = vld [vmem:[%s6712_s3 + $0x1] ss:$0 sm:$0xff] }
 0x4dc   : > { %5212 = vmatmul.mubr.msk.f32.vlgmr.msra.gmra.mrb[10].mxu1 %vm716_vm4, %v1300_v30 }
 0x4dd   : > { %5233 = vmatprep.mubr.msk.f32.mxu1 %vm5822_vm1, %v5823_v13  ;;  %5507 = vmatpush3.bf16.msra.mxu1 %v5506_v60 }
 0x4de   : > { %5508 = vmatprep.subr.bf16.mxu1 %v5821_v10 }
 0x59e   : > { %v875_v34 = vpop.f32.mrb[4].mxu1 }
 0x59f   : > { %v5183_v35 = vpop.f32.mrb[5].mxu1 }
 0x5a7   : > { %v1041_v39 = vpop.f32.mrb[6].mxu1 }
 0x5a8   : > { %1378 = vrot.lane.b32.xlu0 %v1041_v39, %s6756_s1  ;;  %v5193_v40 = vpop.f32.mrb[7].mxu1  ;;  %s6795_s1 = smov 88  }
 0x5ab   : > { %v1207_v41 = vpop.f32.mrb[8].mxu1 }
 0x5ac   : > { %1382 = vrot.lane.b32.xlu1 %v1207_v41, %s6754_s25  ;;  %v5203_v42 = vpop.f32.mrb[9].mxu1  ;;  %s6796_s25 = smov 8  }
 0x5af   : > { %v1373_v43 = vpop.f32.mrb[10].mxu1 }
 0x5b0   : > { %1386 = vrot.lane.b32.xlu0 %v1373_v43, %s6752_s21  ;;  %v5213_v44 = vpop.f32.mrb[11].mxu1  ;;  %s6788_s21 = sshll.u32 %s5984_s24, 3  ;;  %s6794_s24 = smov 72  }
 0x5b1   : > { %s587_s29 = scalar_lea.vmem %s6789_s23, %s6788_s21  ;;  %s6792_s23 = smov 104  }
 0x5b2   : > { %v6158_v20 = vld [vmem:[%s587_s29] sm:$0xff]  ;;  %s6793_s29 = smov 80   ;;  %s6801_s21 = smov 64  }
 0x61a   : > { %v1379_v45 = vpop.permute.xlu0 %1378 }
 0x61b   : > { %v1389_v47 = vsel %vm716_vm4, %v875_v34, %v1379_v45 }
 0x61e   : > { %v1383_v46 = vpop.permute.xlu1 %1382 }
 0x61f   : > { %v1391_v48 = vsel %vm1390_vm5, %v1389_v47, %v1383_v46 }
 0x622   : > { %v1387_v49 = vpop.permute.xlu0 %1386 }
 0x623   : > { %v1393_v50 = vsel %vm1392_vm6, %v1391_v48, %v1387_v49 }
 0x624   : > { %5223 = vmatmul.mubr.msk.f32.vlgmr.msra.gmra.mrb[6].mxu0 %vm592_vm0, %v1393_v50 }
 0x625   : > { %5244 = vmatprep.mubr.msk.f32.mxu0 %vm5822_vm1, %v5823_v13 }
 0x6f7   : > { %v1467_v51 = vpop.f32.mrb[6].mxu0 }
 0x6f8   : > { %v1471_v53 = vadd.f32 %v1467_v51, %v5992_v0  ;;  %v5224_v54 = vpop.f32.mrb[7].mxu0  ;;  %v1520_v0 = vld [vmem:[%s6717_s8 + $0x10] sm:$0xff] }
 0x6f9   : > { %v5650_v62 = vpack.i.bf16 %v1521_v61, %v1520_v0  ;;  %v5509_v63 = vpack.c.bf16 %v1521_v61, %v1520_v0 }
 0x6fa   : > { %v6126_v55 = vadd.f32 %v4902_v52, %v1471_v53 }
 0x6fb   : > { %5510 = vmatpush3.bf16.msra.mxu1 %v5509_v63 }
 0x6fc   : > { %v1484_v56 = vsel %vm592_vm0, %v6126_v55, 0.0  ;;  %5247 = vmatprep.subr.mxu1 %v5823_v13 }
 0x6fd   : > { %1485 = vadd.xlane.f32.xlu1 %v1484_v56 }
 0x70e   : > { %5651 = vrot.lane.b32.xlu1 %v5650_v62, %s6787_s26 }
 0x712   : > { %1618 = vrot.lane.b32.xlu1 %v4907_v6, %s6787_s26 }
 0x78a   : > { %v1486_v1 = vpop.xlane.xlu1 %1485 }
 0x78b   : > { %v1487_v2 = vmul.f32 0.03125, %v1486_v1 }
 0x78d   : > { %v1488_v3 = vsub.f32 %v6126_v55, %v1487_v2 }
 0x78e   : > { %v5652_v9 = vpop.permute.xlu1 %5651 }
 0x78f   : > { %v1489_v4 = vmul.f32 %v1488_v3, %v1488_v3  ;;  %v5654_v15 = vunpack.i.h.bf16 %v5652_v9  ;;  %v5653_v16 = vunpack.i.l.bf16 %v5652_v9  ;;  %v1509_v27 = vmul.f32 %v4905_v26, %v1488_v3 }
 0x791   : > { %v1490_v5 = vsel %vm592_vm0, %v1489_v4, 0.0  ;;  %v5515_v18 = vpack.c.bf16 %v5654_v15, %v5653_v16 }
 0x792   : > { %1491 = vadd.xlane.f32.xlu0 %v1490_v5  ;;  %v1619_v32 = vpop.permute.xlu1 %1618 }
 0x7a8   : > { %5646 = vrot.lane.b32.xlu0 %v5645_v59, %s6787_s26 }
 0x81f   : > { %v1492_v7 = vpop.xlane.xlu0 %1491 }
 0x820   : > { %v1493_v8 = vmul.f32 0.032258064, %v1492_v7 }
 0x822   : > { %5685 = vrsqrt.f32 %v1493_v8  ;;  %vm1496_vm7 = vcmp.eq.f32.partialorder %v1493_v8, inf  ;;  %v1499_v22 = vand.u32 2147483648, %v1493_v8  ;;  %vm1498_vm8 = vcmp.eq.f32.partialorder %v1493_v8, 0.0 }
 0x823   : > { %v5647_v11 = vpop.permute.xlu0 %5646 }
 0x824   : > { %v5649_v12 = vunpack.i.h.bf16 %v5647_v11  ;;  %v5648_v14 = vunpack.i.l.bf16 %v5647_v11 }
 0x826   : > { %v5512_v17 = vpack.c.bf16 %v5649_v12, %v5648_v14 }
 0x828   : > { %5513 = vmatpush3.bf16.msra.mxu0 %v5512_v17 }
 0x829   : > { %5514 = vmatprep.subr.bf16.mxu0 %v5821_v10 }
 0x82c   : > { %v5686_v19 = vpop.eup %5685  ;;  %5516 = vmatpush3.bf16.msra.mxu0 %v5515_v18 }
 0x82d   : > { %v1495_v21 = vmul.f32 %v5686_v19, %v1493_v8  ;;  %5257 = vmatprep.subr.mxu0 %v5823_v13 }
 0x82f   : > { %v1497_v23 = vsel %vm1496_vm7, %v1493_v8, %v1495_v21  ;;  %5245 = vmatmul.mubr.msk.f32.vlgmr.msra.gmra.mrb[8].mxu0 %vm592_vm0, %v6158_v20 }
 0x830   : > { %v1500_v24 = vsel %vm1498_vm8, %v1499_v22, %v1497_v23  ;;  %5259 = vmatprep.mubr.msk.f32.mxu0 %vm5822_vm1, %v5823_v13 }
 0x831   : > { %v1501_v25 = vadd.f32 1e-06, %v1500_v24 }
 0x833   : > { %5687 = vrcp.f32 %v1501_v25 }
 0x83d   : > { %v5688_v28 = vpop.eup %5687 }
 0x83e   : > { %v1510_v30 = vmul.f32 %v5688_v28, %v1509_v27 }
 0x840   : > { %v1517_v31 = vadd.f32 %v4906_v29, %v1510_v30 }
 0x842   : > { %5234 = vmatmul.mubr.msk.f32.vlgmr.msra.gmra.mrb[12].mxu1 %vm592_vm0, %v1517_v31 }
 0x843   : > { %5249 = vmatprep.mubr.msk.f32.mxu1 %vm5822_vm1, %v5823_v13 }
 0x902   : > { %v1690_v33 = vpop.f32.mrb[8].mxu0 }
 0x903   : > { %v6174_v34 = vadd.f32 %v1690_v33, %v1619_v32  ;;  %v5246_v35 = vpop.f32.mrb[9].mxu0 }
 0x905   : > { %1860 = vrot.lane.b32.xlu0 %v6174_v34, %s6790_s19  ;;  %5248 = vmatpush3.xpose.msk.msra.mxu1 %vm716_vm4, %v6174_v34 }
 0x906   : > { %5252 = vmatprep.subr.mxu1 %v5823_v13 }
 0x909   : > { %2026 = vrot.lane.b32.xlu0 %v6174_v34, %s6791_s20 }
 0x90d   : > { %2192 = vrot.lane.b32.xlu0 %v6174_v34, %s6792_s23 }
 0x915   : > { %v1598_v36 = vpop.f32.mrb[12].mxu1 }
 0x916   : > { %v1599_v37 = vadd.f32 %v4907_v6, %v1598_v36  ;;  %v5235_v38 = vpop.f32.mrb[13].mxu1 }
 0x918   : > { %1858 = vrot.lane.b32.xlu1 %v1599_v37, %s6790_s19  ;;  %5250 = vmatmul.mubr.msk.f32.vlgmr.msra.gmra.mrb[14].mxu1 %vm716_vm4, %v1599_v37 }
 0x919   : > { %5254 = vmatprep.mubr.msk.f32.mxu1 %vm5822_vm1, %v5823_v13 }
 0x91c   : > { %2024 = vrot.lane.b32.xlu1 %v1599_v37, %s6791_s20 }
 0x920   : > { %2190 = vrot.lane.b32.xlu1 %v1599_v37, %s6792_s23 }
 0x977   : > { %v1861_v39 = vpop.permute.xlu0 %1860 }
 0x978   : > { %5258 = vmatpush3.xpose.msk.msra.mxu0 %vm716_vm4, %v1861_v39  ;;  %v2371_v39 = vld [vmem:[%s6719_s10] sm:$0xff] }
 0x979   : > { %5267 = vmatprep.subr.mxu0 %v5823_v13 }
 0x97b   : > { %v2027_v40 = vpop.permute.xlu0 %2026 }
 0x97f   : > { %v2193_v43 = vpop.permute.xlu0 %2192 }
 0x98a   : > { %v1859_v41 = vpop.permute.xlu1 %1858 }
 0x98b   : > { %5260 = vmatmul.mubr.msk.f32.vlgmr.msra.gmra.mrb[10].mxu0 %vm716_vm4, %v1859_v41 }
 0x98c   : > { %5268 = vmatpush3.xpose.msk.msra.mxu0 %vm716_vm4, %v2027_v40  ;;  %5269 = vmatprep.mubr.msk.f32.mxu0 %vm5822_vm1, %v5823_v13  ;;  %v2372_v40 = vld [vmem:[%s6719_s10 + $0x8] sm:$0xff] }
 0x98d   : > { %5277 = vmatprep.subr.mxu0 %v5823_v13  ;;  %v5518_v41 = vpack.c.bf16 %v2372_v40, %v2371_v39  ;;  %v4928_v39 = vld [vmem:[%s6722_s13] ss:$0 sm:$0xff] }
 0x98e   : > { %v2025_v42 = vpop.permute.xlu1 %2024 }
 0x98f   : > { %5270 = vmatmul.mubr.msk.f32.vlgmr.msra.gmra.mrb[12].mxu0 %vm716_vm4, %v2025_v42  ;;  %v2373_v42 = vld [vmem:[%s6719_s10 + $0x10] sm:$0xff] }
 0x990   : > { %5278 = vmatpush3.xpose.msk.msra.mxu0 %vm716_vm4, %v2193_v43  ;;  %5279 = vmatprep.mubr.msk.f32.mxu0 %vm5822_vm1, %v5823_v13  ;;  %v2374_v43 = vld [vmem:[%s6719_s10 + $0x18] sm:$0xff] }
 0x991   : > { %5517 = vmatprep.subr.bf16.mxu0 %v5821_v10 }
 0x992   : > { %v2191_v44 = vpop.permute.xlu1 %2190 }
 0x993   : > { %5280 = vmatmul.mubr.msk.f32.vlgmr.msra.gmra.mrb[14].mxu0 %vm716_vm4, %v2191_v44  ;;  %v5521_v44 = vpack.c.bf16 %v2374_v43, %v2373_v42 }
 0x994   : > { %5295 = vmatprep.mubr.msk.f32.mxu0 %vm5822_vm1, %v5823_v13  ;;  %5519 = vmatpush3.bf16.msra.mxu0 %v5518_v41 }
 0x995   : > { %5520 = vmatprep.subr.bf16.mxu0 %v5821_v10 }
 0x998   : > { %5522 = vmatpush3.bf16.msra.mxu0 %v5521_v44 }
 0x999   : > { %5529 = vmatprep.subr.bf16.mxu0 %v5821_v10 }
 0x9eb   : > { %v1766_v45 = vpop.f32.mrb[14].mxu1 }
 0x9ec   : > { %v1770_v46 = vmul.f32 0.35355338, %v1766_v45  ;;  %v5251_v47 = vpop.f32.mrb[15].mxu1 }
 0x9ee   : > { %v1771_v48 = vsel %vm716_vm4, %v1770_v46, -inf }
 0x9ef   : > { %1772 = vmax.xlane.f32.xlu0 %v1771_v48 }
 0xa5e   : > { %v1932_v49 = vpop.f32.mrb[10].mxu0 }
 0xa5f   : > { %v1936_v50 = vmul.f32 0.35355338, %v1932_v49  ;;  %v5261_v51 = vpop.f32.mrb[11].mxu0 }
 0xa61   : > { %v1937_v52 = vsel %vm716_vm4, %v1936_v50, -inf }
 0xa62   : > { %1938 = vmax.xlane.f32.xlu1 %v1937_v52  ;;  %v2098_v53 = vpop.f32.mrb[12].mxu0 }
 0xa63   : > { %v2102_v54 = vmul.f32 0.35355338, %v2098_v53  ;;  %v5271_v56 = vpop.f32.mrb[13].mxu0 }
 0xa65   : > { %v2103_v57 = vsel %vm716_vm4, %v2102_v54, -inf }
 0xa66   : > { %v2264_v58 = vpop.f32.mrb[14].mxu0  ;;  %2104 = vmax.xlane.f32.xlu0 %v2103_v57 }
 0xa67   : > { %v2268_v59 = vmul.f32 0.35355338, %v2264_v58  ;;  %v5281_v60 = vpop.f32.mrb[15].mxu0 }
 0xa69   : > { %v2269_v0 = vsel %vm716_vm4, %v2268_v59, -inf }
 0xa6a   : > { %2270 = vmax.xlane.f32.xlu0 %v2269_v0 }
 0xa73   : > { %1782 = vrot.lane.b32.xlu1 %v6174_v34, %s6787_s26 }
 0xa7c   : > { %v1773_v61 = vpop.xlane.xlu0 %1772 }
 0xa7d   : > { %v1774_v62 = vsub.f32 %v1770_v46, %v1773_v61 }
 0xa7f   : > { %v1775_v63 = vmul.f32 1.442695, %v1774_v62 }
 0xa81   : > { %5689 = vpow2.f32 %v1775_v63 }
 0xa8b   : > { %v5690_v1 = vpop.eup %5689 }
 0xa8c   : > { %v1777_v2 = vsel %vm716_vm4, %v5690_v1, 0.0 }
 0xa97   : > { %1778 = vadd.xlane.f32.xlu1 %v1777_v2 }
 0xaef   : > { %v1939_v3 = vpop.xlane.xlu1 %1938 }
 0xaf0   : > { %v1940_v4 = vsub.f32 %v1936_v50, %v1939_v3 }
 0xaf2   : > { %v1941_v5 = vmul.f32 1.442695, %v1940_v4 }
 0xaf3   : > { %v1783_v6 = vpop.permute.xlu1 %1782  ;;  %v2105_v7 = vpop.xlane.xlu0 %2104 }
 0xaf4   : > { %5691 = vpow2.f32 %v1941_v5  ;;  %v2106_v8 = vsub.f32 %v2102_v54, %v2105_v7  ;;  %5253 = vmatpush3.msra.mxu1 %v1783_v6  ;;  %v2495_v5 = vld [vmem:[%s6800_s12] sm:$0xff]  ;;  %v2497_v6 = vld [vmem:[%s6800_s12 + $0x10] sm:$0xff] }
 0xaf5   : > { %5262 = vmatprep.subr.mxu1 %v5823_v13 }
 0xaf6   : > { %v2107_v9 = vmul.f32 1.442695, %v2106_v8  ;;  %v2498_v8 = vld [vmem:[%s6800_s12 + $0x18] sm:$0xff] }
 0xaf7   : > { %v2271_v11 = vpop.xlane.xlu0 %2270 }
 0xaf8   : > { %5693 = vpow2.f32 %v2107_v9  ;;  %v2272_v12 = vsub.f32 %v2268_v59, %v2271_v11  ;;  %v4923_v59 = vld [vmem:[%s6799_s11] ss:$0 sm:$0xff]  ;;  %v5527_v9 = vpack.c.bf16 %v2498_v8, %v2497_v6  ;;  %v4935_v8 = vld [vmem:[%s6712_s3 + $0x3] ss:$0 sm:$0xff] }
 0xaf9   : > { %v2580_v11 = vld [vmem:[%s6723_s14] sm:$0xff] }
 0xafa   : > { %v2273_v14 = vmul.f32 1.442695, %v2272_v12  ;;  %v2581_v12 = vld [vmem:[%s6723_s14 + $0x8] sm:$0xff] }
 0xafc   : > { %5695 = vpow2.f32 %v2273_v14  ;;  %v2582_v14 = vld [vmem:[%s6723_s14 + $0x10] sm:$0xff] }
 0xafe   : > { %v5692_v15 = vpop.eup %5691 }
 0xaff   : > { %v1943_v16 = vsel %vm716_vm4, %v5692_v15, 0.0 }
 0xb00   : > { %1944 = vadd.xlane.f32.xlu0 %v1943_v16  ;;  %v2583_v16 = vld [vmem:[%s6723_s14 + $0x18] sm:$0xff] }
 0xb02   : > { %v5694_v17 = vpop.eup %5693 }
 0xb03   : > { %v2109_v18 = vsel %vm716_vm4, %v5694_v17, 0.0 }
 0xb04   : > { %2110 = vadd.xlane.f32.xlu1 %v2109_v18  ;;  %v2584_v18 = vld [vmem:[%s6723_s14 + $0x20] sm:$0xff] }
 0xb06   : > { %v5696_v19 = vpop.eup %5695 }
 0xb07   : > { %v2275_v21 = vsel %vm716_vm4, %v5696_v19, 0.0 }
 0xb08   : > { %2276 = vadd.xlane.f32.xlu0 %v2275_v21 }
 0xb15   : > { %2114 = vrot.lane.b32.xlu1 %v6174_v34, %s6793_s29 }
 0xb19   : > { %2280 = vrot.lane.b32.xlu1 %v6174_v34, %s6794_s24 }
 0xb1e   : > { %1948 = vrot.lane.b32.xlu0 %v6174_v34, %s6795_s1 }
 0xb24   : > { %v1779_v22 = vpop.xlane.xlu1 %1778 }
 0xb25   : > { %5697 = vrcp.f32 %v1779_v22 }
 0xb2f   : > { %v5698_v23 = vpop.eup %5697 }
 0xb30   : > { %v1781_v24 = vmul.f32 %v5698_v23, %v5690_v1 }
 0xb32   : > { %5255 = vmatmul.mubr.msk.f32.vlgmr.msra.gmra.mrb[16].mxu1 %vm716_vm4, %v1781_v24 }
 0xb33   : > { %5264 = vmatprep.mubr.msk.f32.mxu1 %vm5822_vm1, %v5823_v13 }
 0xb8d   : > { %v1945_v25 = vpop.xlane.xlu0 %1944 }
 0xb8e   : > { %5699 = vrcp.f32 %v1945_v25 }
 0xb91   : > { %v2111_v26 = vpop.xlane.xlu1 %2110 }
 0xb92   : > { %5701 = vrcp.f32 %v2111_v26 }
 0xb95   : > { %v2277_v27 = vpop.xlane.xlu0 %2276  ;;  %v2115_v30 = vpop.permute.xlu1 %2114 }
 0xb96   : > { %5703 = vrcp.f32 %v2277_v27 }
 0xb98   : > { %v5700_v28 = vpop.eup %5699 }
 0xb99   : > { %v1947_v29 = vmul.f32 %v5700_v28, %v5692_v15  ;;  %v1949_v31 = vpop.permute.xlu0 %1948  ;;  %v2281_v34 = vpop.permute.xlu1 %2280  ;;  %v5530_v15 = vpack.c.bf16 %v2581_v12, %v2580_v11  ;;  %v4941_v12 = vld [vmem:[%s6714_s5 + $0x1] ss:$0 sm:$0xff] }
 0xb9a   : > { %5263 = vmatpush3.msra.mxu1 %v1949_v31 }
 0xb9b   : > { %5265 = vmatmul.mubr.msk.f32.vlgmr.msra.gmra.mrb[18].mxu1 %vm716_vm4, %v1947_v29  ;;  %5272 = vmatprep.subr.mxu1 %v5823_v13 }
 0xb9c   : > { %v5702_v32 = vpop.eup %5701  ;;  %5273 = vmatpush3.msra.mxu1 %v2115_v30  ;;  %5274 = vmatprep.mubr.msk.f32.mxu1 %vm5822_vm1, %v5823_v13  ;;  %v4926_v30 = vld [vmem:[%s6786_s22 + $0x2] ss:$0 sm:$0xff] }
 0xb9d   : > { %v2113_v33 = vmul.f32 %v5702_v32, %v5694_v17  ;;  %5282 = vmatprep.subr.mxu1 %v5823_v13  ;;  %v5533_v17 = vpack.c.bf16 %v2583_v16, %v2582_v14 }
 0xb9f   : > { %5275 = vmatmul.mubr.msk.f32.vlgmr.msra.gmra.mrb[20].mxu1 %vm716_vm4, %v2113_v33  ;;  %v4927_v33 = vld [vmem:[%s6712_s3 + $0x2] ss:$0 sm:$0xff] }
 0xba0   : > { %v5704_v35 = vpop.eup %5703  ;;  %5283 = vmatpush3.msra.mxu1 %v2281_v34  ;;  %5284 = vmatprep.mubr.msk.f32.mxu1 %vm5822_vm1, %v5823_v13 }
 0xba1   : > { %v2279_v36 = vmul.f32 %v5704_v35, %v5696_v19  ;;  %5523 = vmatprep.subr.bf16.mxu1 %v5821_v10  ;;  %v2585_v19 = vld [vmem:[%s6723_s14 + $0x28] sm:$0xff] }
 0xba2   : > { %v5536_v21 = vpack.c.bf16 %v2585_v19, %v2584_v18 }
 0xba3   : > { %5285 = vmatmul.mubr.msk.f32.vlgmr.msra.gmra.mrb[22].mxu1 %vm716_vm4, %v2279_v36  ;;  %v2586_v36 = vld [vmem:[%s6723_s14 + $0x30] sm:$0xff] }
 0xba4   : > { %5306 = vmatprep.mubr.msk.f32.mxu1 %vm5822_vm1, %v5823_v13 }
 0xc05   : > { %v1854_v37 = vpop.f32.mrb[16].mxu1 }
 0xc06   : > { %v5256_v38 = vpop.f32.mrb[17].mxu1 }
 0xc6e   : > { %v2020_v45 = vpop.f32.mrb[18].mxu1 }
 0xc6f   : > { %2357 = vrot.lane.b32.xlu0 %v2020_v45, %s6796_s25  ;;  %v5266_v46 = vpop.f32.mrb[19].mxu1  ;;  %v4931_v45 = vld [vmem:[%s6724_s15] ss:$0 sm:$0xff] }
 0xc72   : > { %v2186_v47 = vpop.f32.mrb[20].mxu1 }
 0xc73   : > { %2361 = vrot.lane.b32.xlu1 %v2186_v47, %s6797_s27  ;;  %v5276_v48 = vpop.f32.mrb[21].mxu1 }
 0xc76   : > { %v2352_v49 = vpop.f32.mrb[22].mxu1 }
 0xc77   : > { %2365 = vrot.lane.b32.xlu0 %v2352_v49, %s6798_s30  ;;  %v5286_v50 = vpop.f32.mrb[23].mxu1 }
 0xce1   : > { %v2358_v51 = vpop.permute.xlu0 %2357 }
 0xce2   : > { %v2368_v53 = vsel %vm716_vm4, %v1854_v37, %v2358_v51  ;;  %v2587_v37 = vld [vmem:[%s6723_s14 + $0x38] sm:$0xff] }
 0xce3   : > { %v5539_v38 = vpack.c.bf16 %v2587_v37, %v2586_v36 }
 0xce5   : > { %v2362_v52 = vpop.permute.xlu1 %2361 }
 0xce6   : > { %v2369_v54 = vsel %vm1390_vm5, %v2368_v53, %v2362_v52 }
 0xce9   : > { %v2366_v56 = vpop.permute.xlu0 %2365 }
 0xcea   : > { %v2370_v57 = vsel %vm1392_vm6, %v2369_v54, %v2366_v56  ;;  %v4936_v56 = vld [vmem:[%s6713_s4 + $0x20] sm:$0xff] }
 0xceb   : > { %5296 = vmatmul.mubr.msk.f32.vlgmr.msra.gmra.mrb[16].mxu0 %vm592_vm0, %v2370_v57  ;;  %v4937_v57 = vld [vmem:[%s6713_s4 + $0x28] sm:$0xff] }
 0xcec   : > { %5325 = vmatprep.mubr.msk.f32.mxu0 %vm5822_vm1, %v5823_v13  ;;  %5531 = vmatpush3.bf16.msra.mxu0 %v5530_v15 }
 0xced   : > { %5532 = vmatprep.subr.bf16.mxu0 %v5821_v10 }
 0xcf0   : > { %5534 = vmatpush3.bf16.msra.mxu0 %v5533_v17 }
 0xcf1   : > { %5535 = vmatprep.subr.bf16.mxu0 %v5821_v10 }
 0xcf4   : > { %5537 = vmatpush3.bf16.msra.mxu0 %v5536_v21 }
 0xcf5   : > { %5538 = vmatprep.subr.bf16.mxu0 %v5821_v10 }
 0xcf8   : > { %5540 = vmatpush3.bf16.msra.mxu0 %v5539_v38 }
 0xcf9   : > { %5349 = vmatprep.subr.mxu0 %v5823_v13 }
 0xdbe   : > { %v2444_v58 = vpop.f32.mrb[16].mxu0 }
 0xdbf   : > { %v2448_v60 = vadd.f32 %v2444_v58, %v6126_v55  ;;  %v5297_v0 = vpop.f32.mrb[17].mxu0  ;;  %v2496_v55 = vld [vmem:[%s6800_s12 + $0x8] sm:$0xff]  ;;  %v4938_v58 = vld [vmem:[%s6713_s4 + $0x30] sm:$0xff]  ;;  %s6802_s12 = smov 48  }
 0xdc0   : > { %v5524_v7 = vpack.c.bf16 %v2496_v55, %v2495_v5  ;;  %v4934_v55 = vld [vmem:[%s6786_s22 + $0x3] ss:$0 sm:$0xff] }
 0xdc1   : > { %v6265_v61 = vadd.f32 %v4923_v59, %v2448_v60  ;;  %v5542_v59 = vpack.c.bf16 %v4937_v57, %v4936_v56  ;;  %v4939_v60 = vld [vmem:[%s6713_s4 + $0x38] sm:$0xff] }
 0xdc2   : > { %5525 = vmatpush3.bf16.msra.mxu1 %v5524_v7  ;;  %v5545_v0 = vpack.c.bf16 %v4939_v60, %v4938_v58 }
 0xdc3   : > { %v2461_v62 = vsel %vm592_vm0, %v6265_v61, 0.0  ;;  %5526 = vmatprep.subr.bf16.mxu1 %v5821_v10 }
 0xdc4   : > { %2462 = vadd.xlane.f32.xlu1 %v2461_v62 }
 0xdc6   : > { %5528 = vmatpush3.bf16.msra.mxu1 %v5527_v9 }
 0xdc7   : > { %5541 = vmatprep.subr.bf16.mxu1 %v5821_v10 }
 0xe51   : > { %v2463_v63 = vpop.xlane.xlu1 %2462 }
 0xe52   : > { %v2464_v1 = vmul.f32 0.03125, %v2463_v63 }
 0xe54   : > { %v2465_v2 = vsub.f32 %v6265_v61, %v2464_v1 }
 0xe56   : > { %v2466_v3 = vmul.f32 %v2465_v2, %v2465_v2  ;;  %v2486_v31 = vmul.f32 %v4926_v30, %v2465_v2 }
 0xe58   : > { %v2467_v4 = vsel %vm592_vm0, %v2466_v3, 0.0 }
 0xe59   : > { %2468 = vadd.xlane.f32.xlu0 %v2467_v4 }
 0xee6   : > { %v2469_v22 = vpop.xlane.xlu0 %2468 }
 0xee7   : > { %v2470_v23 = vmul.f32 0.032258064, %v2469_v22 }
 0xee9   : > { %5705 = vrsqrt.f32 %v2470_v23  ;;  %vm2473_vm9 = vcmp.eq.f32.partialorder %v2470_v23, inf  ;;  %v2476_v26 = vand.u32 2147483648, %v2470_v23  ;;  %vm2475_vm10 = vcmp.eq.f32.partialorder %v2470_v23, 0.0 }
 0xef3   : > { %v5706_v24 = vpop.eup %5705 }
 0xef4   : > { %v2472_v25 = vmul.f32 %v5706_v24, %v2470_v23 }
 0xef6   : > { %v2474_v27 = vsel %vm2473_vm9, %v2470_v23, %v2472_v25 }
 0xef7   : > { %v2477_v28 = vsel %vm2475_vm10, %v2476_v26, %v2474_v27 }
 0xef8   : > { %v2478_v29 = vadd.f32 1e-06, %v2477_v28 }
 0xefa   : > { %5707 = vrcp.f32 %v2478_v29 }
 0xf04   : > { %v5708_v32 = vpop.eup %5707 }
 0xf05   : > { %v2487_v34 = vmul.f32 %v5708_v32, %v2486_v31 }
 0xf07   : > { %v2494_v35 = vadd.f32 %v4927_v33, %v2487_v34 }
 0xf09   : > { %5307 = vmatmul.mubr.msk.f32.vlgmr.msra.gmra.mrb[24].mxu1 %vm592_vm0, %v2494_v35 }
 0xf0a   : > { %5336 = vmatprep.mubr.msk.f32.mxu1 %vm5822_vm1, %v5823_v13  ;;  %5543 = vmatpush3.bf16.msra.mxu1 %v5542_v59 }
 0xf0b   : > { %5544 = vmatprep.subr.bf16.mxu1 %v5821_v10 }
 0xf0e   : > { %5546 = vmatpush3.bf16.msra.mxu1 %v5545_v0 }
 0xf0f   : > { %5339 = vmatprep.subr.mxu1 %v5823_v13 }
 0xfdc   : > { %v2575_v40 = vpop.f32.mrb[24].mxu1 }
 0xfdd   : > { %v2576_v41 = vadd.f32 %v4928_v39, %v2575_v40  ;;  %v5308_v42 = vpop.f32.mrb[25].mxu1 }
 0xfdf   : > { %v2579_v43 = vmax.f32 %v2576_v41, 0.0 }
 0xfe1   : > { %5326 = vmatmul.mubr.msk.f32.vlgmr.msra.gmra.mrb[18].mxu0 %vm2588_vm11, %v2579_v43 }
 0xfe2   : > { %5351 = vmatprep.mubr.msk.f32.mxu0 %vm5822_vm1, %v5823_v13 }
0x10b4   : > { %v2658_v44 = vpop.f32.mrb[18].mxu0 }
0x10b5   : > { %v2662_v46 = vadd.f32 %v2658_v44, %v6265_v61  ;;  %v5327_v47 = vpop.f32.mrb[19].mxu0 }
0x10b7   : > { %v6332_v48 = vadd.f32 %v4931_v45, %v2662_v46 }
0x10b9   : > { %v2675_v49 = vsel %vm592_vm0, %v6332_v48, 0.0 }
0x10ba   : > { %2676 = vadd.xlane.f32.xlu0 %v2675_v49 }
0x1147   : > { %v2677_v50 = vpop.xlane.xlu0 %2676 }
0x1148   : > { %v2678_v51 = vmul.f32 0.03125, %v2677_v50 }
0x114a   : > { %v2679_v52 = vsub.f32 %v6332_v48, %v2678_v51 }
0x114c   : > { %v2680_v53 = vmul.f32 %v2679_v52, %v2679_v52  ;;  %v2700_v6 = vmul.f32 %v4934_v55, %v2679_v52 }
0x114e   : > { %v2681_v54 = vsel %vm592_vm0, %v2680_v53, 0.0 }
0x114f   : > { %2682 = vadd.xlane.f32.xlu1 %v2681_v54 }
0x11dc   : > { %v2683_v61 = vpop.xlane.xlu1 %2682 }
0x11dd   : > { %v2684_v62 = vmul.f32 0.032258064, %v2683_v61 }
0x11df   : > { %5709 = vrsqrt.f32 %v2684_v62  ;;  %vm2687_vm12 = vcmp.eq.f32.partialorder %v2684_v62, inf  ;;  %v2690_v2 = vand.u32 2147483648, %v2684_v62  ;;  %vm2689_vm13 = vcmp.eq.f32.partialorder %v2684_v62, 0.0 }
0x11e9   : > { %v5710_v63 = vpop.eup %5709 }
0x11ea   : > { %v2686_v1 = vmul.f32 %v5710_v63, %v2684_v62 }
0x11ec   : > { %v2688_v3 = vsel %vm2687_vm12, %v2684_v62, %v2686_v1 }
0x11ed   : > { %v2691_v4 = vsel %vm2689_vm13, %v2690_v2, %v2688_v3 }
0x11ee   : > { %v2692_v5 = vadd.f32 1e-06, %v2691_v4 }
0x11f0   : > { %5711 = vrcp.f32 %v2692_v5 }
0x11fa   : > { %v5712_v7 = vpop.eup %5711 }
0x11fb   : > { %v2701_v9 = vmul.f32 %v5712_v7, %v2700_v6 }
0x11fd   : > { %v2708_v11 = vadd.f32 %v4935_v8, %v2701_v9 }
0x11ff   : > { %5337 = vmatmul.mubr.msk.f32.vlgmr.msra.gmra.mrb[26].mxu1 %vm592_vm0, %v2708_v11 }
0x1200   : > { %5341 = vmatprep.mubr.msk.f32.mxu1 %vm5822_vm1, %v5823_v13 }
0x12d2   : > { %v2791_v14 = vpop.f32.mrb[26].mxu1 }
0x12d3   : > { %v6364_v15 = vadd.f32 %v4941_v12, %v2791_v14  ;;  %v5338_v16 = vpop.f32.mrb[27].mxu1 }
0x12d4   : > { %v4955_v16 = vld [vmem:[%s6715_s6 + $0x20] sm:$0xff] }
0x12d5   : > { %2962 = vrot.lane.b32.xlu1 %v6364_v15, %s6795_s1  ;;  %2796 = vrot.lane.b32.xlu0 %v6364_v15, %s6787_s26 }
0x12d9   : > { %2960 = vrot.lane.b32.xlu1 %v6364_v15, %s6790_s19  ;;  %3128 = vrot.lane.b32.xlu0 %v6364_v15, %s6793_s29 }
0x12dd   : > { %3126 = vrot.lane.b32.xlu1 %v6364_v15, %s6791_s20  ;;  %3294 = vrot.lane.b32.xlu0 %v6364_v15, %s6794_s24 }
0x12e1   : > { %3292 = vrot.lane.b32.xlu1 %v6364_v15, %s6792_s23 }
0x1347   : > { %v2963_v17 = vpop.permute.xlu1 %2962  ;;  %v2797_v18 = vpop.permute.xlu0 %2796 }
0x1348   : > { %5340 = vmatpush3.xpose.msk.msra.mxu1 %vm716_vm4, %v2797_v18  ;;  %5350 = vmatpush3.xpose.msk.msra.mxu0 %vm716_vm4, %v2963_v17  ;;  %v4956_v17 = vld [vmem:[%s6715_s6 + $0x28] sm:$0xff] }
0x1349   : > { %5359 = vmatprep.subr.mxu0 %v5823_v13  ;;  %5344 = vmatprep.subr.mxu1 %v5823_v13  ;;  %v5548_v18 = vpack.c.bf16 %v4956_v17, %v4955_v16 }
0x134b   : > { %v2961_v19 = vpop.permute.xlu1 %2960  ;;  %5342 = vmatmul.mubr.msk.f32.vlgmr.msra.gmra.mrb[28].mxu1 %vm716_vm4, %v6364_v15  ;;  %v3129_v21 = vpop.permute.xlu0 %3128 }
0x134c   : > { %5352 = vmatmul.mubr.msk.f32.vlgmr.msra.gmra.mrb[20].mxu0 %vm716_vm4, %v2961_v19  ;;  %5346 = vmatprep.mubr.msk.f32.mxu1 %vm5822_vm1, %v5823_v13  ;;  %v4957_v19 = vld [vmem:[%s6715_s6 + $0x30] sm:$0xff] }
0x134d   : > { %5360 = vmatpush3.xpose.msk.msra.mxu0 %vm716_vm4, %v3129_v21  ;;  %5361 = vmatprep.mubr.msk.f32.mxu0 %vm5822_vm1, %v5823_v13  ;;  %v4958_v21 = vld [vmem:[%s6715_s6 + $0x38] sm:$0xff] }
0x134e   : > { %5369 = vmatprep.subr.mxu0 %v5823_v13 }
0x134f   : > { %v3127_v22 = vpop.permute.xlu1 %3126  ;;  %v3295_v23 = vpop.permute.xlu0 %3294 }
0x1350   : > { %5362 = vmatmul.mubr.msk.f32.vlgmr.msra.gmra.mrb[22].mxu0 %vm716_vm4, %v3127_v22  ;;  %v5551_v22 = vpack.c.bf16 %v4958_v21, %v4957_v19 }
0x1351   : > { %5370 = vmatpush3.xpose.msk.msra.mxu0 %vm716_vm4, %v3295_v23  ;;  %5371 = vmatprep.mubr.msk.f32.mxu0 %vm5822_vm1, %v5823_v13 }
0x1352   : > { %5547 = vmatprep.subr.bf16.mxu0 %v5821_v10 }
0x1353   : > { %v3293_v24 = vpop.permute.xlu1 %3292 }
0x1354   : > { %5372 = vmatmul.mubr.msk.f32.vlgmr.msra.gmra.mrb[24].mxu0 %vm716_vm4, %v3293_v24 }
0x1355   : > { %5387 = vmatprep.mubr.msk.f32.mxu0 %vm5822_vm1, %v5823_v13  ;;  %5549 = vmatpush3.bf16.msra.mxu0 %v5548_v18 }
0x1356   : > { %5550 = vmatprep.subr.bf16.mxu0 %v5821_v10 }
0x1359   : > { %5552 = vmatpush3.bf16.msra.mxu0 %v5551_v22 }
0x135a   : > { %5559 = vmatprep.subr.bf16.mxu0 %v5821_v10 }
0x141e   : > { %v2868_v25 = vpop.f32.mrb[28].mxu1 }
0x141f   : > { %v2872_v26 = vmul.f32 0.35355338, %v2868_v25  ;;  %v5343_v27 = vpop.f32.mrb[29].mxu1  ;;  %v3034_v28 = vpop.f32.mrb[20].mxu0 }
0x1420   : > { %v3038_v29 = vmul.f32 0.35355338, %v3034_v28  ;;  %v5353_v30 = vpop.f32.mrb[21].mxu0 }
0x1421   : > { %v2873_v31 = vsel %vm716_vm4, %v2872_v26, -inf }
0x1422   : > { %2874 = vmax.xlane.f32.xlu0 %v2873_v31  ;;  %v3039_v32 = vsel %vm716_vm4, %v3038_v29, -inf }
0x1423   : > { %3040 = vmax.xlane.f32.xlu1 %v3039_v32  ;;  %v3200_v33 = vpop.f32.mrb[22].mxu0 }
0x1424   : > { %v3204_v34 = vmul.f32 0.35355338, %v3200_v33  ;;  %v5363_v35 = vpop.f32.mrb[23].mxu0 }
0x1426   : > { %v3205_v36 = vsel %vm716_vm4, %v3204_v34, -inf }
0x1427   : > { %v3366_v37 = vpop.f32.mrb[24].mxu0  ;;  %3206 = vmax.xlane.f32.xlu0 %v3205_v36 }
0x1428   : > { %v3370_v38 = vmul.f32 0.35355338, %v3366_v37  ;;  %v5373_v39 = vpop.f32.mrb[25].mxu0 }
0x142a   : > { %v3371_v40 = vsel %vm716_vm4, %v3370_v38, -inf }
0x142b   : > { %3372 = vmax.xlane.f32.xlu0 %v3371_v40 }
0x1434   : > { %2884 = vrot.lane.b32.xlu1 %v6364_v15, %s6801_s21 }
0x14af   : > { %v2875_v41 = vpop.xlane.xlu0 %2874 }
0x14b0   : > { %v2876_v42 = vsub.f32 %v2872_v26, %v2875_v41  ;;  %v3041_v43 = vpop.xlane.xlu1 %3040 }
0x14b1   : > { %v3042_v44 = vsub.f32 %v3038_v29, %v3041_v43  ;;  %v4966_v43 = vld [vmem:[%s6717_s8 + $0x20] sm:$0xff] }
0x14b2   : > { %v2877_v45 = vmul.f32 1.442695, %v2876_v42 }
0x14b3   : > { %v3043_v46 = vmul.f32 1.442695, %v3042_v44  ;;  %v4967_v44 = vld [vmem:[%s6717_s8 + $0x28] sm:$0xff] }
0x14b4   : > { %5713 = vpow2.f32 %v2877_v45  ;;  %v2885_v47 = vpop.permute.xlu1 %2884  ;;  %v3207_v49 = vpop.xlane.xlu0 %3206  ;;  %v5655_v45 = vpack.i.bf16 %v4967_v44, %v4966_v43 }
0x14b5   : > { %5715 = vpow2.f32 %v3043_v46  ;;  %v3208_v50 = vsub.f32 %v3204_v34, %v3207_v49  ;;  %5345 = vmatpush3.msra.mxu1 %v2885_v47  ;;  %v5554_v46 = vpack.c.bf16 %v4967_v44, %v4966_v43  ;;  %v4969_v47 = vld [vmem:[%s6717_s8 + $0x38] sm:$0xff] }
0x14b6   : > { %5354 = vmatprep.subr.mxu1 %v5823_v13 }
0x14b7   : > { %v3209_v51 = vmul.f32 1.442695, %v3208_v50 }
0x14b8   : > { %v3373_v52 = vpop.xlane.xlu0 %3372 }
0x14b9   : > { %5717 = vpow2.f32 %v3209_v51  ;;  %v3374_v53 = vsub.f32 %v3370_v38, %v3373_v52  ;;  %v4961_v38 = vld [vmem:[%s6716_s7 + $0x1] ss:$0 sm:$0xff] }
0x14bb   : > { %v3375_v54 = vmul.f32 1.442695, %v3374_v53 }
0x14bd   : > { %5719 = vpow2.f32 %v3375_v54 }
0x14be   : > { %v5714_v56 = vpop.eup %5713 }
0x14bf   : > { %v5716_v57 = vpop.eup %5715  ;;  %v2879_v58 = vsel %vm716_vm4, %v5714_v56, 0.0 }
0x14c0   : > { %2880 = vadd.xlane.f32.xlu1 %v2879_v58  ;;  %v3045_v59 = vsel %vm716_vm4, %v5716_v57, 0.0 }
0x14c1   : > { %3046 = vadd.xlane.f32.xlu0 %v3045_v59 }
0x14c3   : > { %v5718_v60 = vpop.eup %5717 }
0x14c4   : > { %v3211_v0 = vsel %vm716_vm4, %v5718_v60, 0.0 }
0x14c5   : > { %3212 = vadd.xlane.f32.xlu1 %v3211_v0 }
0x14c7   : > { %v5720_v61 = vpop.eup %5719 }
0x14c8   : > { %v3377_v62 = vsel %vm716_vm4, %v5720_v61, 0.0 }
0x14c9   : > { %3378 = vadd.xlane.f32.xlu0 %v3377_v62 }
0x14d6   : > { %3216 = vrot.lane.b32.xlu1 %v6364_v15, %s6802_s12  ;;  %s6808_s12 = sld [smem:[#allocation9_spill]] }
0x14da   : > { %3382 = vrot.lane.b32.xlu1 %v6364_v15, %s6803_s16  ;;  %s6805_s16 = sld [smem:[#allocation17_spill]] }
0x14dc   : > { %s5018_s2 = sshll.u32 %s6808_s12, 7  ;;  %s5838_s12 = smov [#allocation2]  }
0x14df   : > { %3050 = vrot.lane.b32.xlu0 %v6364_v15, %s6804_s0  ;;  %s6809_s0 = sld [smem:[#allocation19_spill]] }
0x154d   : > { %v2881_v63 = vpop.xlane.xlu1 %2880 }
0x154e   : > { %5721 = vrcp.f32 %v2881_v63  ;;  %v3047_v1 = vpop.xlane.xlu0 %3046 }
0x154f   : > { %5723 = vrcp.f32 %v3047_v1 }
0x1552   : > { %v3213_v2 = vpop.xlane.xlu1 %3212 }
0x1553   : > { %5725 = vrcp.f32 %v3213_v2 }
0x1556   : > { %v3379_v3 = vpop.xlane.xlu0 %3378  ;;  %v3217_v8 = vpop.permute.xlu1 %3216 }
0x1557   : > { %5727 = vrcp.f32 %v3379_v3 }
0x1558   : > { %v5722_v4 = vpop.eup %5721 }
0x1559   : > { %v2883_v5 = vmul.f32 %v5722_v4, %v5714_v56  ;;  %v5724_v55 = vpop.eup %5723 }
0x155a   : > { %v3051_v6 = vpop.permute.xlu0 %3050  ;;  %v3049_v7 = vmul.f32 %v5724_v55, %v5716_v57  ;;  %v3383_v14 = vpop.permute.xlu1 %3382  ;;  %v4971_v57 = vld [vmem:[%s6718_s9 + $0x1] ss:$0 sm:$0xff] }
0x155b   : > { %5347 = vmatmul.mubr.msk.f32.vlgmr.msra.gmra.mrb[30].mxu1 %vm716_vm4, %v2883_v5 }
0x155c   : > { %5355 = vmatpush3.msra.mxu1 %v3051_v6  ;;  %5356 = vmatprep.mubr.msk.f32.mxu1 %vm5822_vm1, %v5823_v13 }
0x155d   : > { %5364 = vmatprep.subr.mxu1 %v5823_v13  ;;  %v5726_v9 = vpop.eup %5725 }
0x155e   : > { %v3215_v11 = vmul.f32 %v5726_v9, %v5718_v60  ;;  %v4964_v9 = vld [vmem:[%s6786_s22 + $0x4] ss:$0 sm:$0xff] }
0x155f   : > { %5357 = vmatmul.mubr.msk.f32.vlgmr.msra.gmra.mrb[32].mxu1 %vm716_vm4, %v3049_v7 }
0x1560   : > { %5365 = vmatpush3.msra.mxu1 %v3217_v8  ;;  %5366 = vmatprep.mubr.msk.f32.mxu1 %vm5822_vm1, %v5823_v13 }
0x1561   : > { %5374 = vmatprep.subr.mxu1 %v5823_v13  ;;  %v5728_v12 = vpop.eup %5727 }
0x1562   : > { %v3381_v15 = vmul.f32 %v5728_v12, %v5720_v61 }
0x1563   : > { %5367 = vmatmul.mubr.msk.f32.vlgmr.msra.gmra.mrb[34].mxu1 %vm716_vm4, %v3215_v11 }
0x1564   : > { %5375 = vmatpush3.msra.mxu1 %v3383_v14  ;;  %5376 = vmatprep.mubr.msk.f32.mxu1 %vm5822_vm1, %v5823_v13  ;;  %v4965_v14 = vld [vmem:[%s6712_s3 + $0x4] ss:$0 sm:$0xff] }
0x1565   : > { %5553 = vmatprep.subr.bf16.mxu1 %v5821_v10 }
0x1567   : > { %5377 = vmatmul.mubr.msk.f32.vlgmr.msra.gmra.mrb[36].mxu1 %vm716_vm4, %v3381_v15 }
0x1568   : > { %5398 = vmatprep.mubr.msk.f32.mxu1 %vm5822_vm1, %v5823_v13  ;;  %5555 = vmatpush3.bf16.msra.mxu1 %v5554_v46 }
0x1569   : > { %5556 = vmatprep.subr.bf16.mxu1 %v5821_v10 }
0x162e   : > { %v2956_v23 = vpop.f32.mrb[30].mxu1 }
0x162f   : > { %v5348_v24 = vpop.f32.mrb[31].mxu1 }
0x1632   : > { %v3122_v25 = vpop.f32.mrb[32].mxu1 }
0x1633   : > { %3459 = vrot.lane.b32.xlu0 %v3122_v25, %s6796_s25  ;;  %v5358_v26 = vpop.f32.mrb[33].mxu1 }
0x1636   : > { %v3288_v27 = vpop.f32.mrb[34].mxu1 }
0x1637   : > { %3463 = vrot.lane.b32.xlu1 %v3288_v27, %s6797_s27  ;;  %v5368_v28 = vpop.f32.mrb[35].mxu1 }
0x163a   : > { %v3454_v29 = vpop.f32.mrb[36].mxu1 }
0x163b   : > { %3467 = vrot.lane.b32.xlu0 %v3454_v29, %s6798_s30  ;;  %v5378_v30 = vpop.f32.mrb[37].mxu1 }
0x16a5   : > { %v3460_v31 = vpop.permute.xlu0 %3459 }
0x16a6   : > { %v3470_v33 = vsel %vm716_vm4, %v2956_v23, %v3460_v31 }
0x16a9   : > { %v3464_v32 = vpop.permute.xlu1 %3463 }
0x16aa   : > { %v3471_v34 = vsel %vm1390_vm5, %v3470_v33, %v3464_v32 }
0x16ad   : > { %v3468_v35 = vpop.permute.xlu0 %3467 }
0x16ae   : > { %v3472_v36 = vsel %vm1392_vm6, %v3471_v34, %v3468_v35 }
0x16af   : > { %5388 = vmatmul.mubr.msk.f32.vlgmr.msra.gmra.mrb[26].mxu0 %vm592_vm0, %v3472_v36 }
0x16b0   : > { %5409 = vmatprep.mubr.msk.f32.mxu0 %vm5822_vm1, %v5823_v13 }
0x1782   : > { %v3547_v37 = vpop.f32.mrb[26].mxu0 }
0x1783   : > { %v3551_v39 = vadd.f32 %v3547_v37, %v6332_v48  ;;  %v5389_v40 = vpop.f32.mrb[27].mxu0  ;;  %v4968_v48 = vld [vmem:[%s6717_s8 + $0x30] sm:$0xff] }
0x1784   : > { %v5660_v49 = vpack.i.bf16 %v4969_v47, %v4968_v48  ;;  %v5557_v50 = vpack.c.bf16 %v4969_v47, %v4968_v48 }
0x1785   : > { %v6460_v41 = vadd.f32 %v4961_v38, %v3551_v39 }
0x1786   : > { %5558 = vmatpush3.bf16.msra.mxu1 %v5557_v50 }
0x1787   : > { %v3565_v42 = vsel %vm592_vm0, %v6460_v41, 0.0  ;;  %5412 = vmatprep.subr.mxu1 %v5823_v13 }
0x1788   : > { %3566 = vadd.xlane.f32.xlu1 %v3565_v42 }
0x1799   : > { %5661 = vrot.lane.b32.xlu1 %v5660_v49, %s6787_s26 }
0x179d   : > { %3701 = vrot.lane.b32.xlu1 %v4971_v57, %s6787_s26 }
0x1815   : > { %v3567_v51 = vpop.xlane.xlu1 %3566 }
0x1816   : > { %v3568_v52 = vmul.f32 0.03125, %v3567_v51 }
0x1818   : > { %v3569_v53 = vsub.f32 %v6460_v41, %v3568_v52 }
0x1819   : > { %v5662_v60 = vpop.permute.xlu1 %5661 }
0x181a   : > { %v3570_v54 = vmul.f32 %v3569_v53, %v3569_v53  ;;  %v5664_v63 = vunpack.i.h.bf16 %v5662_v60  ;;  %v5663_v1 = vunpack.i.l.bf16 %v5662_v60  ;;  %v3590_v11 = vmul.f32 %v4964_v9, %v3569_v53 }
0x181c   : > { %v3571_v56 = vsel %vm592_vm0, %v3570_v54, 0.0  ;;  %v5563_v3 = vpack.c.bf16 %v5664_v63, %v5663_v1 }
0x181d   : > { %3572 = vadd.xlane.f32.xlu0 %v3571_v56 }
0x1833   : > { %5656 = vrot.lane.b32.xlu0 %v5655_v45, %s6787_s26 }
0x18aa   : > { %v3573_v58 = vpop.xlane.xlu0 %3572 }
0x18ab   : > { %v3574_v59 = vmul.f32 0.032258064, %v3573_v58 }
0x18ad   : > { %5729 = vrsqrt.f32 %v3574_v59  ;;  %vm3577_vm14 = vcmp.eq.f32.partialorder %v3574_v59, inf  ;;  %v3580_v55 = vand.u32 2147483648, %v3574_v59  ;;  %vm3579_vm15 = vcmp.eq.f32.partialorder %v3574_v59, 0.0 }
0x18ae   : > { %v5657_v0 = vpop.permute.xlu0 %5656 }
0x18af   : > { %v5659_v61 = vunpack.i.h.bf16 %v5657_v0  ;;  %v5658_v62 = vunpack.i.l.bf16 %v5657_v0 }
0x18b1   : > { %v5560_v2 = vpack.c.bf16 %v5659_v61, %v5658_v62 }
0x18b3   : > { %5561 = vmatpush3.bf16.msra.mxu0 %v5560_v2 }
0x18b4   : > { %5562 = vmatprep.subr.bf16.mxu0 %v5821_v10 }
0x18b7   : > { %v5730_v4 = vpop.eup %5729  ;;  %5564 = vmatpush3.bf16.msra.mxu0 %v5563_v3 }
0x18b8   : > { %v3576_v5 = vmul.f32 %v5730_v4, %v3574_v59  ;;  %5422 = vmatprep.subr.mxu0 %v5823_v13 }
0x18ba   : > { %v3578_v6 = vsel %vm3577_vm14, %v3574_v59, %v3576_v5  ;;  %5410 = vmatmul.mubr.msk.f32.vlgmr.msra.gmra.mrb[28].mxu0 %vm592_vm0, %v6158_v20  ;;  %v3702_v20 = vpop.permute.xlu1 %3701 }
0x18bb   : > { %v3581_v7 = vsel %vm3579_vm15, %v3580_v55, %v3578_v6  ;;  %5424 = vmatprep.mubr.msk.f32.mxu0 %vm5822_vm1, %v5823_v13 }
0x18bc   : > { %v3582_v8 = vadd.f32 1e-06, %v3581_v7 }
0x18be   : > { %5731 = vrcp.f32 %v3582_v8 }
0x18c8   : > { %v5732_v12 = vpop.eup %5731 }
0x18c9   : > { %v3591_v15 = vmul.f32 %v5732_v12, %v3590_v11 }
0x18cb   : > { %v3598_v16 = vadd.f32 %v4965_v14, %v3591_v15 }
0x18cd   : > { %5399 = vmatmul.mubr.msk.f32.vlgmr.msra.gmra.mrb[38].mxu1 %vm592_vm0, %v3598_v16 }
0x18ce   : > { %5414 = vmatprep.mubr.msk.f32.mxu1 %vm5822_vm1, %v5823_v13 }
0x198d   : > { %v3770_v17 = vpop.f32.mrb[28].mxu0 }
0x198e   : > { %v6501_v18 = vadd.f32 %v3770_v17, %v3702_v20  ;;  %v5411_v19 = vpop.f32.mrb[29].mxu0 }
0x1990   : > { %3940 = vrot.lane.b32.xlu0 %v6501_v18, %s6790_s19  ;;  %5413 = vmatpush3.xpose.msk.msra.mxu1 %vm716_vm4, %v6501_v18 }
0x1991   : > { %5417 = vmatprep.subr.mxu1 %v5823_v13 }
0x1994   : > { %4106 = vrot.lane.b32.xlu0 %v6501_v18, %s6791_s20 }
0x1998   : > { %4272 = vrot.lane.b32.xlu0 %v6501_v18, %s6792_s23 }
0x19a0   : > { %v3681_v21 = vpop.f32.mrb[38].mxu1 }
0x19a1   : > { %v3682_v22 = vadd.f32 %v4971_v57, %v3681_v21  ;;  %v5400_v23 = vpop.f32.mrb[39].mxu1 }
0x19a2   : > { %v4986_v23 = vld [vmem:[%s6719_s10 + $0x20] sm:$0xff] }
0x19a3   : > { %3938 = vrot.lane.b32.xlu1 %v3682_v22, %s6790_s19  ;;  %5415 = vmatmul.mubr.msk.f32.vlgmr.msra.gmra.mrb[40].mxu1 %vm716_vm4, %v3682_v22 }
0x19a4   : > { %5419 = vmatprep.mubr.msk.f32.mxu1 %vm5822_vm1, %v5823_v13 }
0x19a7   : > { %4104 = vrot.lane.b32.xlu1 %v3682_v22, %s6791_s20 }
0x19ab   : > { %4270 = vrot.lane.b32.xlu1 %v3682_v22, %s6792_s23  ;;  %s6812_s23 = sld [smem:[#allocation21_spill]] }
0x1a02   : > { %v3941_v24 = vpop.permute.xlu0 %3940 }
0x1a03   : > { %5423 = vmatpush3.xpose.msk.msra.mxu0 %vm716_vm4, %v3941_v24  ;;  %v4987_v24 = vld [vmem:[%s6719_s10 + $0x28] sm:$0xff] }
0x1a04   : > { %5432 = vmatprep.subr.mxu0 %v5823_v13 }
0x1a06   : > { %v4107_v25 = vpop.permute.xlu0 %4106 }
0x1a0a   : > { %v4273_v28 = vpop.permute.xlu0 %4272 }
0x1a15   : > { %v3939_v26 = vpop.permute.xlu1 %3938 }
0x1a16   : > { %5425 = vmatmul.mubr.msk.f32.vlgmr.msra.gmra.mrb[30].mxu0 %vm716_vm4, %v3939_v26  ;;  %v4988_v26 = vld [vmem:[%s6719_s10 + $0x30] sm:$0xff] }
0x1a17   : > { %5433 = vmatpush3.xpose.msk.msra.mxu0 %vm716_vm4, %v4107_v25  ;;  %5434 = vmatprep.mubr.msk.f32.mxu0 %vm5822_vm1, %v5823_v13  ;;  %v5566_v25 = vpack.c.bf16 %v4987_v24, %v4986_v23 }
0x1a18   : > { %5442 = vmatprep.subr.mxu0 %v5823_v13 }
0x1a19   : > { %v4105_v27 = vpop.permute.xlu1 %4104 }
0x1a1a   : > { %5435 = vmatmul.mubr.msk.f32.vlgmr.msra.gmra.mrb[32].mxu0 %vm716_vm4, %v4105_v27  ;;  %v4989_v27 = vld [vmem:[%s6719_s10 + $0x38] sm:$0xff] }
0x1a1b   : > { %5443 = vmatpush3.xpose.msk.msra.mxu0 %vm716_vm4, %v4273_v28  ;;  %5444 = vmatprep.mubr.msk.f32.mxu0 %vm5822_vm1, %v5823_v13  ;;  %v5569_v28 = vpack.c.bf16 %v4989_v27, %v4988_v26  ;;  %v5014_v26 = vld [vmem:[%s6724_s15 + $0x1] ss:$0 sm:$0xff] }
0x1a1c   : > { %5565 = vmatprep.subr.bf16.mxu0 %v5821_v10 }
0x1a1d   : > { %v4271_v29 = vpop.permute.xlu1 %4270 }
0x1a1e   : > { %5445 = vmatmul.mubr.msk.f32.vlgmr.msra.gmra.mrb[34].mxu0 %vm716_vm4, %v4271_v29 }
0x1a1f   : > { %5460 = vmatprep.mubr.msk.f32.mxu0 %vm5822_vm1, %v5823_v13  ;;  %5567 = vmatpush3.bf16.msra.mxu0 %v5566_v25 }
0x1a20   : > { %5568 = vmatprep.subr.bf16.mxu0 %v5821_v10 }
0x1a23   : > { %5570 = vmatpush3.bf16.msra.mxu0 %v5569_v28 }
0x1a24   : > { %5577 = vmatprep.subr.bf16.mxu0 %v5821_v10 }
0x1a76   : > { %v3846_v30 = vpop.f32.mrb[40].mxu1 }
0x1a77   : > { %v3850_v31 = vmul.f32 0.35355338, %v3846_v30  ;;  %v5416_v32 = vpop.f32.mrb[41].mxu1 }
0x1a79   : > { %v3851_v33 = vsel %vm716_vm4, %v3850_v31, -inf }
0x1a7a   : > { %3852 = vmax.xlane.f32.xlu0 %v3851_v33 }
0x1ae9   : > { %v4012_v34 = vpop.f32.mrb[30].mxu0 }
0x1aea   : > { %v4016_v35 = vmul.f32 0.35355338, %v4012_v34  ;;  %v5426_v36 = vpop.f32.mrb[31].mxu0 }
0x1aec   : > { %v4017_v37 = vsel %vm716_vm4, %v4016_v35, -inf }
0x1aed   : > { %4018 = vmax.xlane.f32.xlu1 %v4017_v37  ;;  %v4178_v38 = vpop.f32.mrb[32].mxu0 }
0x1aee   : > { %v4182_v39 = vmul.f32 0.35355338, %v4178_v38  ;;  %v5436_v40 = vpop.f32.mrb[33].mxu0 }
0x1af0   : > { %v4183_v42 = vsel %vm716_vm4, %v4182_v39, -inf }
0x1af1   : > { %v4344_v43 = vpop.f32.mrb[34].mxu0  ;;  %4184 = vmax.xlane.f32.xlu0 %v4183_v42 }
0x1af2   : > { %v4348_v44 = vmul.f32 0.35355338, %v4344_v43  ;;  %v5446_v45 = vpop.f32.mrb[35].mxu0  ;;  %v4992_v43 = vld [vmem:[%s6805_s16 + $0x1] ss:$0 sm:$0xff] }
0x1af4   : > { %v4349_v46 = vsel %vm716_vm4, %v4348_v44, -inf }
0x1af5   : > { %4350 = vmax.xlane.f32.xlu0 %v4349_v46 }
0x1afe   : > { %3862 = vrot.lane.b32.xlu1 %v6501_v18, %s6787_s26 }
0x1b07   : > { %v3853_v48 = vpop.xlane.xlu0 %3852 }
0x1b08   : > { %v3854_v47 = vsub.f32 %v3850_v31, %v3853_v48 }
0x1b0a   : > { %v3855_v49 = vmul.f32 1.442695, %v3854_v47 }
0x1b0c   : > { %5733 = vpow2.f32 %v3855_v49 }
0x1b16   : > { %v5734_v50 = vpop.eup %5733 }
0x1b17   : > { %v3857_v51 = vsel %vm716_vm4, %v5734_v50, 0.0 }
0x1b22   : > { %3858 = vadd.xlane.f32.xlu1 %v3857_v51 }
0x1b7a   : > { %v4019_v52 = vpop.xlane.xlu1 %4018 }
0x1b7b   : > { %v4020_v53 = vsub.f32 %v4016_v35, %v4019_v52  ;;  %v4997_v52 = vld [vmem:[%s6806_s17 + $0x20] sm:$0xff] }
0x1b7d   : > { %v4021_v54 = vmul.f32 1.442695, %v4020_v53  ;;  %v4999_v53 = vld [vmem:[%s6806_s17 + $0x30] sm:$0xff] }
0x1b7e   : > { %v3863_v56 = vpop.permute.xlu1 %3862  ;;  %v4185_v57 = vpop.xlane.xlu0 %4184 }
0x1b7f   : > { %5735 = vpow2.f32 %v4021_v54  ;;  %v4186_v58 = vsub.f32 %v4182_v39, %v4185_v57  ;;  %5418 = vmatpush3.msra.mxu1 %v3863_v56  ;;  %v5000_v56 = vld [vmem:[%s6806_s17 + $0x38] sm:$0xff] }
0x1b80   : > { %5427 = vmatprep.subr.mxu1 %v5823_v13  ;;  %v5575_v57 = vpack.c.bf16 %v5000_v56, %v4999_v53 }
0x1b81   : > { %v4187_v59 = vmul.f32 1.442695, %v4186_v58  ;;  %v5004_v58 = vld [vmem:[%s6723_s14 + $0x40] sm:$0xff] }
0x1b82   : > { %v4351_v60 = vpop.xlane.xlu0 %4350 }
0x1b83   : > { %5737 = vpow2.f32 %v4187_v59  ;;  %v4352_v0 = vsub.f32 %v4348_v44, %v4351_v60  ;;  %v5005_v59 = vld [vmem:[%s6723_s14 + $0x48] sm:$0xff]  ;;  %v5006_v60 = vld [vmem:[%s6723_s14 + $0x50] sm:$0xff] }
0x1b85   : > { %v4353_v61 = vmul.f32 1.442695, %v4352_v0  ;;  %v5578_v0 = vpack.c.bf16 %v5005_v59, %v5004_v58 }
0x1b87   : > { %5739 = vpow2.f32 %v4353_v61  ;;  %v5007_v61 = vld [vmem:[%s6723_s14 + $0x58] sm:$0xff] }
0x1b89   : > { %v5736_v62 = vpop.eup %5735 }
0x1b8a   : > { %v4023_v63 = vsel %vm716_vm4, %v5736_v62, 0.0 }
0x1b8b   : > { %4024 = vadd.xlane.f32.xlu0 %v4023_v63  ;;  %v5008_v63 = vld [vmem:[%s6723_s14 + $0x60] sm:$0xff] }
0x1b8d   : > { %v5738_v1 = vpop.eup %5737 }
0x1b8e   : > { %v4189_v2 = vsel %vm716_vm4, %v5738_v1, 0.0 }
0x1b8f   : > { %4190 = vadd.xlane.f32.xlu1 %v4189_v2 }
0x1b91   : > { %v5740_v3 = vpop.eup %5739 }
0x1b92   : > { %v4355_v4 = vsel %vm716_vm4, %v5740_v3, 0.0 }
0x1b93   : > { %4356 = vadd.xlane.f32.xlu0 %v4355_v4 }
0x1ba0   : > { %4194 = vrot.lane.b32.xlu1 %v6501_v18, %s6793_s29  ;;  %s6666_s29 = scalar_lea.hbm %s6812_s23, %s5018_s2 }
0x1ba4   : > { %4360 = vrot.lane.b32.xlu1 %v6501_v18, %s6794_s24 }
0x1ba9   : > { %4028 = vrot.lane.b32.xlu0 %v6501_v18, %s6795_s1  ;;  %s6807_s1 = sld [smem:[#allocation6_spill]] }
0x1baf   : > { %v3859_v5 = vpop.xlane.xlu1 %3858 }
0x1bb0   : > { %5741 = vrcp.f32 %v3859_v5 }
0x1bba   : > { %v5742_v55 = vpop.eup %5741 }
0x1bbb   : > { %v3861_v6 = vmul.f32 %v5742_v55, %v5734_v50 }
0x1bbd   : > { %5420 = vmatmul.mubr.msk.f32.vlgmr.msra.gmra.mrb[42].mxu1 %vm716_vm4, %v3861_v6 }
0x1bbe   : > { %5429 = vmatprep.mubr.msk.f32.mxu1 %vm5822_vm1, %v5823_v13 }
0x1c18   : > { %v4025_v7 = vpop.xlane.xlu0 %4024 }
0x1c19   : > { %5743 = vrcp.f32 %v4025_v7 }
0x1c1c   : > { %v4191_v8 = vpop.xlane.xlu1 %4190 }
0x1c1d   : > { %5745 = vrcp.f32 %v4191_v8 }
0x1c20   : > { %v4357_v9 = vpop.xlane.xlu0 %4356  ;;  %v4195_v14 = vpop.permute.xlu1 %4194 }
0x1c21   : > { %5747 = vrcp.f32 %v4357_v9 }
0x1c23   : > { %v5744_v11 = vpop.eup %5743 }
0x1c24   : > { %v4027_v12 = vmul.f32 %v5744_v11, %v5736_v62  ;;  %v4029_v15 = vpop.permute.xlu0 %4028  ;;  %v4361_v17 = vpop.permute.xlu1 %4360  ;;  %v5581_v62 = vpack.c.bf16 %v5007_v61, %v5006_v60  ;;  %v4995_v11 = vld [vmem:[%s6786_s22 + $0x5] ss:$0 sm:$0xff] }
0x1c25   : > { %5428 = vmatpush3.msra.mxu1 %v4029_v15 }
0x1c26   : > { %5430 = vmatmul.mubr.msk.f32.vlgmr.msra.gmra.mrb[44].mxu1 %vm716_vm4, %v4027_v12  ;;  %5437 = vmatprep.subr.mxu1 %v5823_v13 }
0x1c27   : > { %v5746_v16 = vpop.eup %5745  ;;  %5438 = vmatpush3.msra.mxu1 %v4195_v14  ;;  %5439 = vmatprep.mubr.msk.f32.mxu1 %vm5822_vm1, %v5823_v13 }
0x1c28   : > { %v4193_v20 = vmul.f32 %v5746_v16, %v5738_v1  ;;  %5447 = vmatprep.subr.mxu1 %v5823_v13  ;;  %v5009_v1 = vld [vmem:[%s6723_s14 + $0x68] sm:$0xff] }
0x1c29   : > { %v5584_v2 = vpack.c.bf16 %v5009_v1, %v5008_v63 }
0x1c2a   : > { %5440 = vmatmul.mubr.msk.f32.vlgmr.msra.gmra.mrb[46].mxu1 %vm716_vm4, %v4193_v20  ;;  %v5010_v20 = vld [vmem:[%s6723_s14 + $0x70] sm:$0xff] }
0x1c2b   : > { %v5748_v18 = vpop.eup %5747  ;;  %5448 = vmatpush3.msra.mxu1 %v4361_v17  ;;  %5449 = vmatprep.mubr.msk.f32.mxu1 %vm5822_vm1, %v5823_v13  ;;  %v5011_v17 = vld [vmem:[%s6723_s14 + $0x78] sm:$0xff] }
0x1c2c   : > { %v4359_v19 = vmul.f32 %v5748_v18, %v5740_v3  ;;  %5571 = vmatprep.subr.bf16.mxu1 %v5821_v10  ;;  %v5587_v18 = vpack.c.bf16 %v5011_v17, %v5010_v20 }
0x1c2e   : > { %5450 = vmatmul.mubr.msk.f32.vlgmr.msra.gmra.mrb[48].mxu1 %vm716_vm4, %v4359_v19  ;;  %v5002_v19 = vld [vmem:[%s6722_s13 + $0x1] ss:$0 sm:$0xff] }
0x1c2f   : > { %5471 = vmatprep.mubr.msk.f32.mxu1 %vm5822_vm1, %v5823_v13 }
0x1c90   : > { %v3934_v21 = vpop.f32.mrb[42].mxu1 }
0x1c91   : > { %v5421_v22 = vpop.f32.mrb[43].mxu1 }
0x1cf9   : > { %v4100_v29 = vpop.f32.mrb[44].mxu1 }
0x1cfa   : > { %4437 = vrot.lane.b32.xlu0 %v4100_v29, %s6796_s25  ;;  %v5431_v30 = vpop.f32.mrb[45].mxu1  ;;  %s577_s25 = sand.u32 1, %s6807_s1  }
0x1cfb   : > { %s4794_s24 = scalar_lea.sflag [#allocation3], %s577_s25 }
0x1cfd   : > { %v4266_v31 = vpop.f32.mrb[46].mxu1 }
0x1cfe   : > { %4441 = vrot.lane.b32.xlu1 %v4266_v31, %s6797_s27  ;;  %v5441_v32 = vpop.f32.mrb[47].mxu1  ;;  %s4882_s27 = sshll.u32 %s577_s25, 3 }
0x1cff   : > { %s579_s21 = scalar_lea.vmem [#allocation2], %s4882_s27  ;;  %s5761_s27 = sshll.u32 %s5838_s12, 4  ;;  %s5762_s27 = int_to_ptr.vmem [resolvable:$false] %s5761_s27 }
0x1d00   : > { %s4807_s26 = sshll.u32 %s579_s21, 4  ;;  %s5763_s16 = scalar_lea.vmem %s5762_s27, 256  ;;  %s6668_s26 = int_to_ptr.vmem [resolvable:$true] %s4807_s26 }
0x1d01   : > { %v4432_v33 = vpop.f32.mrb[48].mxu1  ;;  %s5757_s1 = scalar_lea.vmem %s6668_s26, 128  ;;  %p5764_p0 = scmp.lt.s32.totalorder %s6668_s26, %s5762_s27 }
0x1d02   : > { %4445 = vrot.lane.b32.xlu0 %v4432_v33, %s6798_s30  ;;  %v5451_v34 = vpop.f32.mrb[49].mxu1  ;;  %p5758_p11 = scmp.ne.s32.totalorder %s6668_s26, %s5757_s1  ;;  %p5765_p1 = scmp.lt.s32.totalorder %s5763_s16, %s5757_s1 }
0x1d04   : > { %p5759_p12 = pnand %p5758_p11, %p5972_p5  ;;  %p5766_p2 = por %p5765_p1, %p5764_p0 }
0x1d06   : > { %p5760_p13 = pneg %p5759_p12 }
0x1d08   : > { %p5767_p3 = pnand %p5766_p2, %p5760_p13 }
0x1d6c   : > { %v4438_v35 = vpop.permute.xlu0 %4437 }
0x1d6d   : > { %v4448_v37 = vsel %vm716_vm4, %v3934_v21, %v4438_v35 }
0x1d70   : > { %v4442_v36 = vpop.permute.xlu1 %4441 }
0x1d71   : > { %v4449_v38 = vsel %vm1390_vm5, %v4448_v37, %v4442_v36 }
0x1d74   : > { %v4446_v39 = vpop.permute.xlu0 %4445 }
0x1d75   : > { %v4450_v40 = vsel %vm1392_vm6, %v4449_v38, %v4446_v39 }
0x1d76   : > { %5461 = vmatmul.mubr.msk.f32.vlgmr.msra.gmra.mrb[36].mxu0 %vm592_vm0, %v4450_v40 }
0x1d77   : > { %5490 = vmatprep.mubr.msk.f32.mxu0 %vm5822_vm1, %v5823_v13  ;;  %5579 = vmatpush3.bf16.msra.mxu0 %v5578_v0 }
0x1d78   : > { %5580 = vmatprep.subr.bf16.mxu0 %v5821_v10 }
0x1d7b   : > { %5582 = vmatpush3.bf16.msra.mxu0 %v5581_v62 }
0x1d7c   : > { %5583 = vmatprep.subr.bf16.mxu0 %v5821_v10 }
0x1d7f   : > { %5585 = vmatpush3.bf16.msra.mxu0 %v5584_v2 }
0x1d80   : > { %5586 = vmatprep.subr.bf16.mxu0 %v5821_v10 }
0x1d83   : > { %5588 = vmatpush3.bf16.msra.mxu0 %v5587_v18 }
0x1e49   : > { %v4525_v42 = vpop.f32.mrb[36].mxu0 }
0x1e4a   : > { %v4529_v44 = vadd.f32 %v4525_v42, %v6460_v41  ;;  %v5462_v45 = vpop.f32.mrb[37].mxu0  ;;  %v4998_v41 = vld [vmem:[%s6806_s17 + $0x28] sm:$0xff] }
0x1e4b   : > { %v5572_v54 = vpack.c.bf16 %v4998_v41, %v4997_v52  ;;  %v5015_v45 = vld [vmem:[%s6809_s0] ss:$0 sm:$0xff] }
0x1e4c   : > { %v6592_v46 = vadd.f32 %v4992_v43, %v4529_v44 }
0x1e4d   : > { %5573 = vmatpush3.bf16.msra.mxu1 %v5572_v54 }
0x1e4e   : > { %v4543_v48 = vsel %vm592_vm0, %v6592_v46, 0.0  ;;  %5574 = vmatprep.subr.bf16.mxu1 %v5821_v10  ;;  %v4996_v10 = vld [vmem:[%s6712_s3 + $0x5] ss:$0 sm:$0xff] }
0x1e4f   : > { %4544 = vadd.xlane.f32.xlu1 %v4543_v48 }
0x1e51   : > { %5576 = vmatpush3.bf16.msra.mxu1 %v5575_v57 }
0x1edc   : > { %v4545_v47 = vpop.xlane.xlu1 %4544 }
0x1edd   : > { %v4546_v49 = vmul.f32 0.03125, %v4545_v47  ;;  %v5016_v47 = vld [vmem:[%s6811_s18] ss:$0 sm:$0xff] }
0x1edf   : > { %v4547_v50 = vsub.f32 %v6592_v46, %v4546_v49 }
0x1ee1   : > { %v4548_v51 = vmul.f32 %v4547_v50, %v4547_v50  ;;  %v4568_v12 = vmul.f32 %v4995_v11, %v4547_v50 }
0x1ee3   : > { %v4549_v13 = vsel %vm592_vm0, %v4548_v51, 0.0 }
0x1ee4   : > { %4550 = vadd.xlane.f32.xlu0 %v4549_v13 }
0x1f71   : > { %v4551_v3 = vpop.xlane.xlu0 %4550 }
0x1f72   : > { %v4552_v4 = vmul.f32 0.032258064, %v4551_v3 }
0x1f74   : > { %5749 = vrsqrt.f32 %v4552_v4  ;;  %vm4555_vm1 = vcmp.eq.f32.partialorder %v4552_v4, inf  ;;  %v4558_v6 = vand.u32 2147483648, %v4552_v4  ;;  %vm4557_vm2 = vcmp.eq.f32.partialorder %v4552_v4, 0.0 }
0x1f7e   : > { %v5750_v5 = vpop.eup %5749 }
0x1f7f   : > { %v4554_v55 = vmul.f32 %v5750_v5, %v4552_v4 }
0x1f81   : > { %v4556_v7 = vsel %vm4555_vm1, %v4552_v4, %v4554_v55 }
0x1f82   : > { %v4559_v8 = vsel %vm4557_vm2, %v4558_v6, %v4556_v7 }
0x1f83   : > { %v4560_v9 = vadd.f32 1e-06, %v4559_v8 }
0x1f85   : > { %5751 = vrcp.f32 %v4560_v9 }
0x1f8f   : > { %v5752_v14 = vpop.eup %5751 }
0x1f90   : > { %v4569_v15 = vmul.f32 %v5752_v14, %v4568_v12 }
0x1f92   : > { %v4576_v16 = vadd.f32 %v4996_v10, %v4569_v15 }
0x1f94   : > { %5472 = vmatmul.mubr.msk.f32.vlgmr.msra.gmra.mrb[50].mxu1 %vm592_vm0, %v4576_v16 }
0x2067   : > { %v4659_v21 = vpop.f32.mrb[50].mxu1 }
0x2068   : > { %v4660_v22 = vadd.f32 %v5002_v19, %v4659_v21  ;;  %v5473_v23 = vpop.f32.mrb[51].mxu1 }
0x206a   : > { %v4663_v24 = vmax.f32 %v4660_v22, 0.0 }
0x206c   : > { %5491 = vmatmul.mubr.msk.f32.vlgmr.msra.gmra.mrb[38].mxu0 %vm2588_vm11, %v4663_v24 }
0x213f   : > { %v4742_v25 = vpop.f32.mrb[38].mxu0 }
0x2140   : > { %v4746_v27 = vadd.f32 %v4742_v25, %v6592_v46  ;;  %v5492_v28 = vpop.f32.mrb[39].mxu0 }
0x2142   : > { %v4755_v29 = vadd.f32 %v5014_v26, %v4746_v27 }
0x2144   : > { %v4758_v30 = vsel %vm592_vm0, %v4755_v29, 0.0 }
0x2145   : > { %4759 = vadd.xlane.f32.xlu0 %v4758_v30 }
0x21d2   : > { %v4760_v31 = vpop.xlane.xlu0 %4759 }
0x21d3   : > { %v4761_v32 = vmul.f32 0.03125, %v4760_v31 }
0x21d5   : > { %v4762_v33 = vsub.f32 %v4755_v29, %v4761_v32 }
0x21d7   : > { %v4763_v34 = vmul.f32 %v4762_v33, %v4762_v33  ;;  %v4783_v46 = vmul.f32 %v5015_v45, %v4762_v33 }
0x21d9   : > { %v4764_v35 = vsel %vm592_vm0, %v4763_v34, 0.0 }
0x21da   : > { %4765 = vadd.xlane.f32.xlu1 %v4764_v35 }
0x2267   : > { %v4766_v36 = vpop.xlane.xlu1 %4765 }
0x2268   : > { %v4767_v37 = vmul.f32 0.032258064, %v4766_v36 }
0x226a   : > { %5753 = vrsqrt.f32 %v4767_v37  ;;  %vm4770_vm3 = vcmp.eq.f32.partialorder %v4767_v37, inf  ;;  %v4773_v40 = vand.u32 2147483648, %v4767_v37  ;;  %vm4772_vm4 = vcmp.eq.f32.partialorder %v4767_v37, 0.0 }
0x2274   : > { %v5754_v38 = vpop.eup %5753 }
0x2275   : > { %v4769_v39 = vmul.f32 %v5754_v38, %v4767_v37 }
0x2277   : > { %v4771_v42 = vsel %vm4770_vm3, %v4767_v37, %v4769_v39 }
0x2278   : > { %v4774_v43 = vsel %vm4772_vm4, %v4773_v40, %v4771_v42 }
0x2279   : > { %v4775_v44 = vadd.f32 1e-06, %v4774_v43 }
0x227b   : > { %5755 = vrcp.f32 %v4775_v44 }
0x2285   : > { %v5756_v48 = vpop.eup %5755 }
0x2286   : > { %v4784_v49 = vmul.f32 %v5756_v48, %v4783_v46 }
0x2288   : > { %v4791_v50 = vadd.f32 %v5016_v47, %v4784_v49 }
0x228a   : > { %4792 = vst.msk [vmem:[%s579_s21] sm:$0xff] %vm592_vm0, %v4791_v50 }
0x228b   : > { %5770 = shalt.err (!%p5767_p3)
}
0x228c   : > { %s5771_s25 = scalar_lea.hbm %s6666_s29, 128  ;;  %s5775_s11 = scalar_lea.hbm %s6812_s23, 256 }
0x228d   : > { %p5772_p4 = scmp.ne.s32.totalorder %s6666_s29, %s5771_s25  ;;  %p5776_p9 = scmp.lt.u32.totalorder %s6666_s29, %s6812_s23 }
0x228e   : > { %p5777_p10 = scmp.lt.u32.totalorder %s5775_s11, %s5771_s25  ;;  %p5779_p12 = scmp.lt.u32.totalorder %s5771_s25, %s6666_s29 }
0x228f   : > { %p5773_p7 = pnand %p5772_p4, %p5972_p5 }
0x2290   : > { %p5778_p11 = por %p5777_p10, %p5776_p9 }
0x2291   : > { %p5774_p8 = pneg %p5773_p7 }
0x2292   : > { %p5780_p13 = por %p5779_p12, %p5778_p11 }
0x2294   : > { %p5781_p0 = pnand %p5780_p13, %p5774_p8 }
0x2296   : > { %5784 = shalt.err (!%p5781_p0)
}
0x2297   : > { %5589 = dma.vmem_to_hbm [thread:$0]  (%p5972_p5), %s6668_s26, 128, %s6666_s29, %s4794_s24  }
0x2298 PF: > { %s6813_s2 = sld [smem:[#allocation8_spill]]  ;;  %s6814_s21 = sld [smem:[#allocation5_spill]] }
0x229e   : > { %p5595_p1 = scmp.ge.s32.totalorder %s6813_s2, 2  ;;  %s4819_s20 = sand.u32 1, %s6814_s21  }
0x229f   : > { %s4820_s1 = scalar_lea.sflag [#allocation3], %s4819_s20 }
0x22a0   : > { %p5592_p2 = pnand %p5595_p1, %p5976_p6 }
0x22a2   : > { %5802 = dma.done.wait (!%p5592_p2), %s4820_s1, 128  }
0x22a3   : > { %5804 = vsyncadd (!%p5592_p2), %s4820_s1, 4294967168  ;;  %s6816_s30 = sld [smem:[#allocation10_spill]]  ;;  %s6817_s27 = sld [smem:[#allocation6_spill]] }
0x22a4   : > { %s6818_s28 = sld [smem:[#allocation7_spill]]  ;;  %s6819_s29 = sld [smem:[#allocation11_spill]] }
0x22a9   : > { %p28_p3 = scmp.ge.s32.totalorder %s6816_s30, 4  }
0x22ab   :  { %30 = sbr.rel (!%p28_p3) target bundleno = 12 (0xc), region = 152 }
0x22b2   :  { %4825 = vsyncpa [#allocation3], 1 }
0x22b3   :  { %4827 = vsyncpa [#allocation3 + $0x1], 1 }

</bundles_post_ra>
